<compile_context>
chip_gen: v6e
topology: v6e:2x2x1
jax: 0.10.0
libtpu: 0.0.40
codegen_flags: <defaults>
</compile_context>

<pallas_src>
import jax
import jax.numpy as jnp
import numpy as np
from jax import lax
from jax.experimental import pallas as pl
from jax.experimental.pallas import tpu as pltpu

N_HEAD = 4          # config.n_head
NEG = -1e30         # finite "-inf" for the causal mask (NaN-safe)

_PARAM_ORDER = ["ln1_g", "ln1_b", "w_attn", "b_attn", "w_proj", "b_proj",
                "ln2_g", "ln2_b", "w_fc", "b_fc", "w_out", "b_out"]
_BF16_WEIGHTS = ("w_attn", "w_proj", "w_fc", "w_out")


def _layernorm(h, g, b, eps=1e-5):
    mu = jnp.mean(h, axis=-1, keepdims=True)
    var = jnp.mean((h - mu) ** 2, axis=-1, keepdims=True)
    return (h - mu) * lax.rsqrt(var + eps) * g + b


def _gelu_tanh(x):
    # tanh-approximation GELU ("NewGELU").
    c = 0.7978845608028654  # sqrt(2/pi)
    return 0.5 * x * (1.0 + jnp.tanh(c * (x + 0.044715 * x * x * x)))


def _tpu_defaults():
    """(max K-block width, vmem_limit_bytes) derived from the current TPU."""
    tkb_max = 256                       # v6e/v7x MXU is 256 wide
    vmem_cap = 128 * 1024 * 1024
    try:
        kind = jax.devices()[0].device_kind.lower()
        if "v5 lite" in kind or "v5e" in kind or "v5litepod" in kind:
            tkb_max = 128               # v5e MXU is 128 wide
    except Exception:
        pass
    try:
        vmem_cap = int(getattr(pltpu.get_tpu_info(),
                               "vmem_capacity_bytes", vmem_cap))
    except Exception:
        pass
    # Leave headroom for compiler scratch + double-buffered activations:
    # ~40 MiB on a 64 MiB v7x part, ~80 MiB on 128 MiB v5e/v6e parts.
    vmem_limit = min(int(vmem_cap * 5 // 8), 100 * 1024 * 1024)
    return tkb_max, vmem_limit


def _pick_batch_fold(B, T, row_target=256):
    """Largest divisor Bb of B with Bb*T <= row_target (fills the MXU M dim)."""
    if T >= row_target:
        return 1
    best = 1
    for d in range(1, B + 1):
        if B % d == 0 and d * T <= row_target:
            best = d
    return best


def _make_kernel(Bb, T, C, n_head, TKB, nkb):
    R = Bb * T
    hd = C // n_head
    scale = 1.0 / (hd ** 0.5)
    F = 4 * C
    HC = min(F, 512)        # lane-aligned MLP hidden chunk (ragged tail below)

    def kernel(x_ref,
               ln1_g_ref, ln1_b_ref,
               w_attn_ref, b_attn_ref,
               w_proj_ref, b_proj_ref,
               ln2_g_ref, ln2_b_ref,
               w_fc_ref, b_fc_ref,
               w_out_ref, b_out_ref,
               o_ref,
               qkv_scr, y_scr):
        """One batch-group (Bb sequences) per grid step: full block forward."""
        x = x_ref[...].astype(jnp.float32).reshape(R, C)        # (R, C) f32

        # ---- ln_1 + qkv projection (bf16 MXU inputs, f32 accumulation) ----
        h1 = _layernorm(x, ln1_g_ref[...], ln1_b_ref[...])
        qkv = jnp.dot(h1.astype(jnp.bfloat16), w_attn_ref[...],
                      preferred_element_type=jnp.float32) + b_attn_ref[...]
        # fold the 1/sqrt(hd) attention scale into the q columns once
        col3 = lax.broadcasted_iota(jnp.int32, (1, 3 * C), 1)
        qkv = qkv * jnp.where(col3 < C, scale, 1.0)
        # stage in a bf16 VMEM slab; all attention operands slice this ref
        qkv_scr[...] = qkv.astype(jnp.bfloat16).reshape(Bb, T, 3 * C)

        # ---- causal self-attention: flash-style K/V streaming ----
        rows = lax.broadcasted_iota(jnp.int32, (Bb, T, TKB), 1)   # query index
        cols = lax.broadcasted_iota(jnp.int32, (Bb, T, TKB), 2)   # key offset

        for h in range(n_head):                       # static unroll over heads
            q_h = qkv_scr[:, :, h * hd:(h + 1) * hd]              # (Bb,T,hd) bf16

            def kv_step(j, carry):
                m, l, acc = carry
                start = jnp.minimum(j * TKB, T - TKB)   # clamp ragged tail
                k_blk = qkv_scr[:, pl.ds(start, TKB),
                                C + h * hd: C + (h + 1) * hd]     # (Bb,TKB,hd)
                v_blk = qkv_scr[:, pl.ds(start, TKB),
                                2 * C + h * hd: 2 * C + (h + 1) * hd]
                # q @ k^T, Bb sequences batched, no transpose materialized
                s = lax.dot_general(q_h, k_blk,
                                    (((2,), (2,)), ((0,), (0,))),
                                    preferred_element_type=jnp.float32)
                key_idx = cols + start
                # causal AND "not already processed in a previous block"
                valid = (key_idx <= rows) & (key_idx >= j * TKB)
                s = jnp.where(valid, s, NEG)
                m_new = jnp.maximum(m, jnp.max(s, axis=-1, keepdims=True))
                alpha = jnp.exp(m - m_new)
                p = jnp.exp(s - m_new)
                l_new = alpha * l + jnp.sum(p, axis=-1, keepdims=True)
                pv = lax.dot_general(p.astype(jnp.bfloat16), v_blk,
                                     (((2,), (1,)), ((0,), (0,))),
                                     preferred_element_type=jnp.float32)
                return m_new, l_new, alpha * acc + pv

            init = (jnp.full((Bb, T, 1), NEG, jnp.float32),
                    jnp.zeros((Bb, T, 1), jnp.float32),
                    jnp.zeros((Bb, T, hd), jnp.float32))
            if nkb == 1:
                m, l, acc = kv_step(0, init)
            else:
                m, l, acc = lax.fori_loop(0, nkb, kv_step, init,
                                          unroll=True if nkb <= 4 else False)

            # normalize with approx reciprocal (EUP) and write head slab
            y_scr[:, :, h * hd:(h + 1) * hd] = (
                acc * pl.reciprocal(l, approx=True)).astype(jnp.bfloat16)

        # ---- output projection + residual 1 ----
        y = y_scr[...].reshape(R, C)                              # bf16
        x1 = x + (jnp.dot(y, w_proj_ref[...],
                          preferred_element_type=jnp.float32) + b_proj_ref[...])

        # ---- ln_2 + MLP (hidden dim processed in lane-aligned chunks) ----
        h2 = _layernorm(x1, ln2_g_ref[...], ln2_b_ref[...]).astype(jnp.bfloat16)
        mlp = jnp.broadcast_to(b_out_ref[...], (R, C)).astype(jnp.float32)
        for c0 in range(0, F, HC):                  # static unroll over chunks
            c1 = min(c0 + HC, F)                    # ragged tail kept chunked
            ff = jnp.dot(h2, w_fc_ref[:, c0:c1],
                         preferred_element_type=jnp.float32) + b_fc_ref[:, c0:c1]
            g = _gelu_tanh(ff).astype(jnp.bfloat16)  # GELU in f32, cast for MXU
            mlp = mlp + jnp.dot(g, w_out_ref[c0:c1, :],
                                preferred_element_type=jnp.float32)

        o_ref[...] = (x1 + mlp).reshape(Bb, T, C).astype(o_ref.dtype)

    return kernel


def _build_call(B, T, C, x_dtype, param_list, *, n_head, buffered_weights):
    tkb_max, vmem_limit = _tpu_defaults()
    Bb = _pick_batch_fold(B, T)
    TKB = min(T, tkb_max)
    nkb = pl.cdiv(T, TKB)
    kernel = _make_kernel(Bb, T, C, n_head, TKB, nkb)

    def weight_spec(arr):
        n = arr.ndim
        if buffered_weights:
            # constant index_map -> single-buffered weight residency
            return pl.BlockSpec(arr.shape, lambda g, _n=n: (0,) * _n,
                                pipeline_mode=pl.Buffered(1))
        return pl.BlockSpec(arr.shape, lambda g, _n=n: (0,) * _n)

    in_specs = [pl.BlockSpec((Bb, T, C), lambda g: (g, 0, 0))]
    in_specs += [weight_spec(a) for a in param_list]

    return pl.pallas_call(
        kernel,
        out_shape=jax.ShapeDtypeStruct((B, T, C), x_dtype),
        grid_spec=pltpu.PrefetchScalarGridSpec(
            num_scalar_prefetch=0,
            grid=(B // Bb,),
            in_specs=in_specs,
            out_specs=pl.BlockSpec((Bb, T, C), lambda g: (g, 0, 0)),
            scratch_shapes=[pltpu.VMEM((Bb, T, 3 * C), jnp.bfloat16),  # qkv slab
                            pltpu.VMEM((Bb, T, C), jnp.bfloat16)],     # attn out
        ),
        compiler_params=pltpu.CompilerParams(
            dimension_semantics=("parallel",),
            vmem_limit_bytes=vmem_limit,
        ),
    )


def transformer_block(x, params):
    B, T, C = x.shape
    assert C % N_HEAD == 0
    # store the large matmul weights as bf16 (halves DMA + VMEM, matches MXU
    # bf16 peak); LN params and biases stay f32.
    p = dict(params)
    for name in _BF16_WEIGHTS:
        p[name] = p[name].astype(jnp.bfloat16)
    param_list = [p[k] for k in _PARAM_ORDER]

    try:
        fn = _build_call(B, T, C, x.dtype, param_list,
                         n_head=N_HEAD, buffered_weights=True)
        return jax.block_until_ready(fn(x, *param_list))
    except Exception:
        # fall back to default double-buffered weight specs
        fn = _build_call(B, T, C, x.dtype, param_list,
                         n_head=N_HEAD, buffered_weights=False)
        return jax.block_until_ready(fn(x, *param_list))


def init_params(key, C):
    ks = jax.random.split(key, 4)
    s = 0.02
    f32 = jnp.float32
    return {
        "ln1_g": jnp.ones((1, C), f32),
        "ln1_b": jnp.zeros((1, C), f32),
        "w_attn": (jax.random.normal(ks[0], (C, 3 * C)) * s).astype(f32),
        "b_attn": jnp.zeros((1, 3 * C), f32),
        "w_proj": (jax.random.normal(ks[1], (C, C)) * s).astype(f32),
        "b_proj": jnp.zeros((1, C), f32),
        "ln2_g": jnp.ones((1, C), f32),
        "ln2_b": jnp.zeros((1, C), f32),
        "w_fc": (jax.random.normal(ks[2], (C, 4 * C)) * s).astype(f32),
        "b_fc": jnp.zeros((1, 4 * C), f32),
        "w_out": (jax.random.normal(ks[3], (4 * C, C)) * s).astype(f32),
        "b_out": jnp.zeros((1, C), f32),
    }


def block_reference(x, p):
    """Pure-JAX f32 reference of the same forward (for correctness check)."""
    B, T, C = x.shape
    hd = C // N_HEAD
    h1 = _layernorm(x, p["ln1_g"], p["ln1_b"])
    qkv = h1 @ p["w_attn"] + p["b_attn"]
    q, k, v = jnp.split(qkv, 3, axis=-1)

    def heads(a):
        return a.reshape(B, T, N_HEAD, hd).transpose(0, 2, 1, 3)

    q, k, v = heads(q), heads(k), heads(v)
    att = jnp.einsum("bhqd,bhkd->bhqk", q, k) / (hd ** 0.5)
    mask = jnp.tril(jnp.ones((T, T), bool))
    att = jnp.where(mask, att, -jnp.inf)
    att = jax.nn.softmax(att, axis=-1)
    y = jnp.einsum("bhqk,bhkd->bhqd", att, v).transpose(0, 2, 1, 3).reshape(B, T, C)
    x1 = x + (y @ p["w_proj"] + p["b_proj"])
    h2 = _layernorm(x1, p["ln2_g"], p["ln2_b"])
    ff = _gelu_tanh(h2 @ p["w_fc"] + p["b_fc"]) @ p["w_out"] + p["b_out"]
    return x1 + ff


if __name__ == "__main__":
    B, T, C = 2, 8, 32          # batch=2, block_size=8, n_embd=32, n_head=4
    key = jax.random.PRNGKey(0)
    kx, kp = jax.random.split(key)
    x = jax.random.normal(kx, (B, T, C), dtype=jnp.float32)
    params = init_params(kp, C)

    out = transformer_block(x, params)
    out = jax.block_until_ready(out)

    ref = block_reference(x, params)
    # bf16 MXU inputs (f32 accumulation) -> loosened tolerance vs f32 reference.
    np.testing.assert_allclose(np.asarray(out), np.asarray(ref), rtol=2e-2, atol=2e-2)

    print("KERNEL_OK")
</pallas_src>

<mosaic_0001>
module attributes {stable_mosaic.version = 11 : i64} {
  func.func @kernel(%arg0: i32, %arg1: memref<2x8x32xf32, #tpu.memory_space<vmem>>, %arg2: memref<1x32xf32, #tpu.memory_space<vmem>>, %arg3: memref<1x32xf32, #tpu.memory_space<vmem>>, %arg4: memref<32x96xbf16, #tpu.memory_space<vmem>>, %arg5: memref<1x96xf32, #tpu.memory_space<vmem>>, %arg6: memref<32x32xbf16, #tpu.memory_space<vmem>>, %arg7: memref<1x32xf32, #tpu.memory_space<vmem>>, %arg8: memref<1x32xf32, #tpu.memory_space<vmem>>, %arg9: memref<1x32xf32, #tpu.memory_space<vmem>>, %arg10: memref<32x128xbf16, #tpu.memory_space<vmem>>, %arg11: memref<1x128xf32, #tpu.memory_space<vmem>>, %arg12: memref<128x32xbf16, #tpu.memory_space<vmem>>, %arg13: memref<1x32xf32, #tpu.memory_space<vmem>>, %arg14: memref<2x8x32xf32, #tpu.memory_space<vmem>>, %arg15: memref<2x8x96xbf16, #tpu.memory_space<vmem>>, %arg16: memref<2x8x32xbf16, #tpu.memory_space<vmem>>) attributes {dimension_semantics = [#tpu.dimension_semantics<parallel>], iteration_bounds = array<i64: 1>, scalar_prefetch = 0 : i64, scratch_operands = 2 : i64, tpu.core_type = #tpu.core_type<tc>, window_params = [{transform_indices = @transform_0, window_bounds = array<i64: 2, 8, 32>}, {pipeline_mode = #tpu.pipeline_mode<synchronous>, transform_indices = @transform_1, window_bounds = array<i64: 1, 32>}, {pipeline_mode = #tpu.pipeline_mode<synchronous>, transform_indices = @transform_2, window_bounds = array<i64: 1, 32>}, {pipeline_mode = #tpu.pipeline_mode<synchronous>, transform_indices = @transform_3, window_bounds = array<i64: 32, 96>}, {pipeline_mode = #tpu.pipeline_mode<synchronous>, transform_indices = @transform_4, window_bounds = array<i64: 1, 96>}, {pipeline_mode = #tpu.pipeline_mode<synchronous>, transform_indices = @transform_5, window_bounds = array<i64: 32, 32>}, {pipeline_mode = #tpu.pipeline_mode<synchronous>, transform_indices = @transform_6, window_bounds = array<i64: 1, 32>}, {pipeline_mode = #tpu.pipeline_mode<synchronous>, transform_indices = @transform_7, window_bounds = array<i64: 1, 32>}, {pipeline_mode = #tpu.pipeline_mode<synchronous>, transform_indices = @transform_8, window_bounds = array<i64: 1, 32>}, {pipeline_mode = #tpu.pipeline_mode<synchronous>, transform_indices = @transform_9, window_bounds = array<i64: 32, 128>}, {pipeline_mode = #tpu.pipeline_mode<synchronous>, transform_indices = @transform_10, window_bounds = array<i64: 1, 128>}, {pipeline_mode = #tpu.pipeline_mode<synchronous>, transform_indices = @transform_11, window_bounds = array<i64: 128, 32>}, {pipeline_mode = #tpu.pipeline_mode<synchronous>, transform_indices = @transform_12, window_bounds = array<i64: 1, 32>}, {transform_indices = @transform_13, window_bounds = array<i64: 2, 8, 32>}]} {
    %c0 = arith.constant 0 : index
    %c0_0 = arith.constant 0 : index
    %c0_1 = arith.constant 0 : index
    %0 = vector.load %arg1[%c0, %c0_0, %c0_1] : memref<2x8x32xf32, #tpu.memory_space<vmem>>, vector<2x8x32xf32>
    %1 = vector.shape_cast %0 : vector<2x8x32xf32> to vector<16x32xf32>
    %c0_2 = arith.constant 0 : index
    %c0_3 = arith.constant 0 : index
    %2 = vector.load %arg2[%c0_2, %c0_3] : memref<1x32xf32, #tpu.memory_space<vmem>>, vector<1x32xf32>
    %c0_4 = arith.constant 0 : index
    %c0_5 = arith.constant 0 : index
    %3 = vector.load %arg3[%c0_4, %c0_5] : memref<1x32xf32, #tpu.memory_space<vmem>>, vector<1x32xf32>
    %cst = arith.constant dense<0.000000e+00> : vector<16xf32>
    %4 = vector.multi_reduction <add>, %1, %cst [1] : vector<16x32xf32> to vector<16xf32>
    %5 = vector.shape_cast %4 : vector<16xf32> to vector<16x1xf32>
    %cst_6 = arith.constant 3.200000e+01 : f32
    %6 = vector.broadcast %cst_6 : f32 to vector<16x1xf32>
    %7 = arith.divf %5, %6 : vector<16x1xf32>
    %8 = vector.broadcast %7 : vector<16x1xf32> to vector<16x32xf32>
    %9 = arith.subf %1, %8 : vector<16x32xf32>
    %10 = arith.mulf %9, %9 : vector<16x32xf32>
    %cst_7 = arith.constant dense<0.000000e+00> : vector<16xf32>
    %11 = vector.multi_reduction <add>, %10, %cst_7 [1] : vector<16x32xf32> to vector<16xf32>
    %12 = vector.shape_cast %11 : vector<16xf32> to vector<16x1xf32>
    %cst_8 = arith.constant 3.200000e+01 : f32
    %13 = vector.broadcast %cst_8 : f32 to vector<16x1xf32>
    %14 = arith.divf %12, %13 : vector<16x1xf32>
    %15 = vector.broadcast %7 : vector<16x1xf32> to vector<16x32xf32>
    %16 = arith.subf %1, %15 : vector<16x32xf32>
    %cst_9 = arith.constant 9.99999974E-6 : f32
    %17 = vector.broadcast %cst_9 : f32 to vector<16x1xf32>
    %18 = arith.addf %14, %17 : vector<16x1xf32>
    %19 = math.rsqrt %18 : vector<16x1xf32>
    %20 = vector.broadcast %19 : vector<16x1xf32> to vector<16x32xf32>
    %21 = arith.mulf %16, %20 : vector<16x32xf32>
    %22 = vector.broadcast %2 : vector<1x32xf32> to vector<16x32xf32>
    %23 = arith.mulf %21, %22 : vector<16x32xf32>
    %24 = vector.broadcast %3 : vector<1x32xf32> to vector<16x32xf32>
    %25 = arith.addf %23, %24 : vector<16x32xf32>
    %26 = arith.truncf %25 : vector<16x32xf32> to vector<16x32xbf16>
    %c0_10 = arith.constant 0 : index
    %c0_11 = arith.constant 0 : index
    %27 = vector.load %arg4[%c0_10, %c0_11] : memref<32x96xbf16, #tpu.memory_space<vmem>>, vector<32x96xbf16>
    %cst_12 = arith.constant dense<0.000000e+00> : vector<16x96xf32>
    %28 = tpu.matmul %26, %27, %cst_12 {dimension_numbers = #tpu.dot_dimension_numbers<[1], [0], [0], [1], [0, 0, 1, 1], [], []>} : vector<16x32xbf16>, vector<32x96xbf16>, vector<16x96xf32> -> vector<16x96xf32>
    %c0_13 = arith.constant 0 : index
    %c0_14 = arith.constant 0 : index
    %29 = vector.load %arg5[%c0_13, %c0_14] : memref<1x96xf32, #tpu.memory_space<vmem>>, vector<1x96xf32>
    %30 = vector.broadcast %29 : vector<1x96xf32> to vector<16x96xf32>
    %31 = arith.addf %28, %30 : vector<16x96xf32>
    %32 = tpu.iota {dimensions = array<i32: 1>} : vector<1x96xi32>
    %c32_i32 = arith.constant 32 : i32
    %33 = vector.broadcast %c32_i32 : i32 to vector<1x96xi32>
    %34 = arith.cmpi slt, %32, %33 : vector<1x96xi32>
    %cst_15 = arith.constant 0.353553385 : f32
    %cst_16 = arith.constant 1.000000e+00 : f32
    %35 = vector.broadcast %cst_15 : f32 to vector<1x96xf32>
    %36 = vector.broadcast %cst_16 : f32 to vector<1x96xf32>
    %37 = arith.select %34, %35, %36 : vector<1x96xi1>, vector<1x96xf32>
    %38 = vector.broadcast %37 : vector<1x96xf32> to vector<16x96xf32>
    %39 = arith.mulf %31, %38 : vector<16x96xf32>
    %40 = arith.truncf %39 : vector<16x96xf32> to vector<16x96xbf16>
    %41 = vector.shape_cast %40 : vector<16x96xbf16> to vector<2x8x96xbf16>
    %c0_17 = arith.constant 0 : index
    %c0_18 = arith.constant 0 : index
    %c0_19 = arith.constant 0 : index
    %42 = vector.load %arg15[%c0_17, %c0_18, %c0_19] : memref<2x8x96xbf16, #tpu.memory_space<vmem>>, vector<2x8x96xbf16>
    tpu.vector_store %arg15[%c0_17, %c0_18, %c0_19], %41 {strides = array<i32>} : memref<2x8x96xbf16, #tpu.memory_space<vmem>>, vector<2x8x96xbf16>,
    %43 = tpu.iota {dimensions = array<i32: 1>} : vector<2x8x8xi32>
    %44 = tpu.iota {dimensions = array<i32: 2>} : vector<2x8x8xi32>
    %c0_20 = arith.constant 0 : index
    %c0_21 = arith.constant 0 : index
    %c0_22 = arith.constant 0 : index
    %45 = vector.load %arg15[%c0_20, %c0_21, %c0_22] : memref<2x8x96xbf16, #tpu.memory_space<vmem>>, vector<2x8x8xbf16>
    %cst_23 = arith.constant -1.000000e+30 : f32
    %46 = vector.broadcast %cst_23 : f32 to vector<2x8x1xf32>
    %cst_24 = arith.constant 0.000000e+00 : f32
    %47 = vector.broadcast %cst_24 : f32 to vector<2x8x1xf32>
    %cst_25 = arith.constant 0.000000e+00 : f32
    %48 = vector.broadcast %cst_25 : f32 to vector<2x8x8xf32>
    %c0_i32 = arith.constant 0 : i32
    %c0_i32_26 = arith.constant 0 : i32
    %49 = arith.minsi %c0_i32, %c0_i32_26 : i32
    %c0_27 = arith.constant 0 : index
    %50 = arith.index_cast %49 : i32 to index
    %c32 = arith.constant 32 : index
    %51 = vector.load %arg15[%c0_27, %50, %c32] : memref<2x8x96xbf16, #tpu.memory_space<vmem>>, vector<2x8x8xbf16>
    %c0_28 = arith.constant 0 : index
    %52 = arith.index_cast %49 : i32 to index
    %c64 = arith.constant 64 : index
    %53 = vector.load %arg15[%c0_28, %52, %c64] : memref<2x8x96xbf16, #tpu.memory_space<vmem>>, vector<2x8x8xbf16>
    %cst_29 = arith.constant dense<0.000000e+00> : vector<2x8x8xf32>
    %54 = tpu.matmul %45, %51, %cst_29 {dimension_numbers = #tpu.dot_dimension_numbers<[2], [2], [1], [1], [0, 0, 0, 1, 1, 1], [0], [0]>} : vector<2x8x8xbf16>, vector<2x8x8xbf16>, vector<2x8x8xf32> -> vector<2x8x8xf32>
    %55 = vector.broadcast %49 : i32 to vector<2x8x8xi32>
    %56 = arith.addi %44, %55 : vector<2x8x8xi32>
    %57 = arith.cmpi sle, %56, %43 : vector<2x8x8xi32>
    %c0_i32_30 = arith.constant 0 : i32
    %58 = vector.broadcast %c0_i32_30 : i32 to vector<2x8x8xi32>
    %59 = arith.cmpi sge, %56, %58 : vector<2x8x8xi32>
    %60 = arith.andi %57, %59 : vector<2x8x8xi1>
    %cst_31 = arith.constant -1.000000e+30 : f32
    %61 = vector.broadcast %cst_31 : f32 to vector<2x8x8xf32>
    %62 = arith.select %60, %54, %61 : vector<2x8x8xi1>, vector<2x8x8xf32>
    %cst_32 = arith.constant dense<0xFF800000> : vector<2x8xf32>
    %63 = vector.multi_reduction <maximumf>, %62, %cst_32 [2] : vector<2x8x8xf32> to vector<2x8xf32>
    %64 = vector.shape_cast %63 : vector<2x8xf32> to vector<2x8x1xf32>
    %65 = arith.maximumf %46, %64 : vector<2x8x1xf32>
    %66 = arith.subf %46, %65 : vector<2x8x1xf32>
    %67 = math.exp %66 : vector<2x8x1xf32>
    %68 = vector.broadcast %65 : vector<2x8x1xf32> to vector<2x8x8xf32>
    %69 = arith.subf %62, %68 : vector<2x8x8xf32>
    %70 = math.exp %69 : vector<2x8x8xf32>
    %71 = arith.mulf %67, %47 : vector<2x8x1xf32>
    %cst_33 = arith.constant dense<0.000000e+00> : vector<2x8xf32>
    %72 = vector.multi_reduction <add>, %70, %cst_33 [2] : vector<2x8x8xf32> to vector<2x8xf32>
    %73 = vector.shape_cast %72 : vector<2x8xf32> to vector<2x8x1xf32>
    %74 = arith.addf %71, %73 : vector<2x8x1xf32>
    %75 = arith.truncf %70 : vector<2x8x8xf32> to vector<2x8x8xbf16>
    %cst_34 = arith.constant dense<0.000000e+00> : vector<2x8x8xf32>
    %76 = tpu.matmul %75, %53, %cst_34 {dimension_numbers = #tpu.dot_dimension_numbers<[2], [1], [1], [2], [0, 0, 0, 1, 1, 2], [0], [0]>} : vector<2x8x8xbf16>, vector<2x8x8xbf16>, vector<2x8x8xf32> -> vector<2x8x8xf32>
    %77 = vector.broadcast %67 : vector<2x8x1xf32> to vector<2x8x8xf32>
    %78 = arith.mulf %77, %48 : vector<2x8x8xf32>
    %79 = arith.addf %78, %76 : vector<2x8x8xf32>
    %80 = tpu.reciprocal %74 {approx = true} : vector<2x8x1xf32> -> vector<2x8x1xf32>
    %81 = vector.broadcast %80 : vector<2x8x1xf32> to vector<2x8x8xf32>
    %82 = arith.mulf %79, %81 : vector<2x8x8xf32>
    %83 = arith.truncf %82 : vector<2x8x8xf32> to vector<2x8x8xbf16>
    %c0_35 = arith.constant 0 : index
    %c0_36 = arith.constant 0 : index
    %c0_37 = arith.constant 0 : index
    %84 = vector.load %arg16[%c0_35, %c0_36, %c0_37] : memref<2x8x32xbf16, #tpu.memory_space<vmem>>, vector<2x8x8xbf16>
    tpu.vector_store %arg16[%c0_35, %c0_36, %c0_37], %83 {strides = array<i32>} : memref<2x8x32xbf16, #tpu.memory_space<vmem>>, vector<2x8x8xbf16>,
    %c0_38 = arith.constant 0 : index
    %c0_39 = arith.constant 0 : index
    %c8 = arith.constant 8 : index
    %85 = vector.load %arg15[%c0_38, %c0_39, %c8] : memref<2x8x96xbf16, #tpu.memory_space<vmem>>, vector<2x8x8xbf16>
    %cst_40 = arith.constant -1.000000e+30 : f32
    %86 = vector.broadcast %cst_40 : f32 to vector<2x8x1xf32>
    %cst_41 = arith.constant 0.000000e+00 : f32
    %87 = vector.broadcast %cst_41 : f32 to vector<2x8x1xf32>
    %cst_42 = arith.constant 0.000000e+00 : f32
    %88 = vector.broadcast %cst_42 : f32 to vector<2x8x8xf32>
    %c0_i32_43 = arith.constant 0 : i32
    %c0_i32_44 = arith.constant 0 : i32
    %89 = arith.minsi %c0_i32_43, %c0_i32_44 : i32
    %c0_45 = arith.constant 0 : index
    %90 = arith.index_cast %89 : i32 to index
    %c40 = arith.constant 40 : index
    %91 = vector.load %arg15[%c0_45, %90, %c40] : memref<2x8x96xbf16, #tpu.memory_space<vmem>>, vector<2x8x8xbf16>
    %c0_46 = arith.constant 0 : index
    %92 = arith.index_cast %89 : i32 to index
    %c72 = arith.constant 72 : index
    %93 = vector.load %arg15[%c0_46, %92, %c72] : memref<2x8x96xbf16, #tpu.memory_space<vmem>>, vector<2x8x8xbf16>
    %cst_47 = arith.constant dense<0.000000e+00> : vector<2x8x8xf32>
    %94 = tpu.matmul %85, %91, %cst_47 {dimension_numbers = #tpu.dot_dimension_numbers<[2], [2], [1], [1], [0, 0, 0, 1, 1, 1], [0], [0]>} : vector<2x8x8xbf16>, vector<2x8x8xbf16>, vector<2x8x8xf32> -> vector<2x8x8xf32>
    %95 = vector.broadcast %89 : i32 to vector<2x8x8xi32>
    %96 = arith.addi %44, %95 : vector<2x8x8xi32>
    %97 = arith.cmpi sle, %96, %43 : vector<2x8x8xi32>
    %c0_i32_48 = arith.constant 0 : i32
    %98 = vector.broadcast %c0_i32_48 : i32 to vector<2x8x8xi32>
    %99 = arith.cmpi sge, %96, %98 : vector<2x8x8xi32>
    %100 = arith.andi %97, %99 : vector<2x8x8xi1>
    %cst_49 = arith.constant -1.000000e+30 : f32
    %101 = vector.broadcast %cst_49 : f32 to vector<2x8x8xf32>
    %102 = arith.select %100, %94, %101 : vector<2x8x8xi1>, vector<2x8x8xf32>
    %cst_50 = arith.constant dense<0xFF800000> : vector<2x8xf32>
    %103 = vector.multi_reduction <maximumf>, %102, %cst_50 [2] : vector<2x8x8xf32> to vector<2x8xf32>
    %104 = vector.shape_cast %103 : vector<2x8xf32> to vector<2x8x1xf32>
    %105 = arith.maximumf %86, %104 : vector<2x8x1xf32>
    %106 = arith.subf %86, %105 : vector<2x8x1xf32>
    %107 = math.exp %106 : vector<2x8x1xf32>
    %108 = vector.broadcast %105 : vector<2x8x1xf32> to vector<2x8x8xf32>
    %109 = arith.subf %102, %108 : vector<2x8x8xf32>
    %110 = math.exp %109 : vector<2x8x8xf32>
    %111 = arith.mulf %107, %87 : vector<2x8x1xf32>
    %cst_51 = arith.constant dense<0.000000e+00> : vector<2x8xf32>
    %112 = vector.multi_reduction <add>, %110, %cst_51 [2] : vector<2x8x8xf32> to vector<2x8xf32>
    %113 = vector.shape_cast %112 : vector<2x8xf32> to vector<2x8x1xf32>
    %114 = arith.addf %111, %113 : vector<2x8x1xf32>
    %115 = arith.truncf %110 : vector<2x8x8xf32> to vector<2x8x8xbf16>
    %cst_52 = arith.constant dense<0.000000e+00> : vector<2x8x8xf32>
    %116 = tpu.matmul %115, %93, %cst_52 {dimension_numbers = #tpu.dot_dimension_numbers<[2], [1], [1], [2], [0, 0, 0, 1, 1, 2], [0], [0]>} : vector<2x8x8xbf16>, vector<2x8x8xbf16>, vector<2x8x8xf32> -> vector<2x8x8xf32>
    %117 = vector.broadcast %107 : vector<2x8x1xf32> to vector<2x8x8xf32>
    %118 = arith.mulf %117, %88 : vector<2x8x8xf32>
    %119 = arith.addf %118, %116 : vector<2x8x8xf32>
    %120 = tpu.reciprocal %114 {approx = true} : vector<2x8x1xf32> -> vector<2x8x1xf32>
    %121 = vector.broadcast %120 : vector<2x8x1xf32> to vector<2x8x8xf32>
    %122 = arith.mulf %119, %121 : vector<2x8x8xf32>
    %123 = arith.truncf %122 : vector<2x8x8xf32> to vector<2x8x8xbf16>
    %c0_53 = arith.constant 0 : index
    %c0_54 = arith.constant 0 : index
    %c8_55 = arith.constant 8 : index
    %124 = vector.load %arg16[%c0_53, %c0_54, %c8_55] : memref<2x8x32xbf16, #tpu.memory_space<vmem>>, vector<2x8x8xbf16>
    tpu.vector_store %arg16[%c0_53, %c0_54, %c8_55], %123 {strides = array<i32>} : memref<2x8x32xbf16, #tpu.memory_space<vmem>>, vector<2x8x8xbf16>,
    %c0_56 = arith.constant 0 : index
    %c0_57 = arith.constant 0 : index
    %c16 = arith.constant 16 : index
    %125 = vector.load %arg15[%c0_56, %c0_57, %c16] : memref<2x8x96xbf16, #tpu.memory_space<vmem>>, vector<2x8x8xbf16>
    %cst_58 = arith.constant -1.000000e+30 : f32
    %126 = vector.broadcast %cst_58 : f32 to vector<2x8x1xf32>
    %cst_59 = arith.constant 0.000000e+00 : f32
    %127 = vector.broadcast %cst_59 : f32 to vector<2x8x1xf32>
    %cst_60 = arith.constant 0.000000e+00 : f32
    %128 = vector.broadcast %cst_60 : f32 to vector<2x8x8xf32>
    %c0_i32_61 = arith.constant 0 : i32
    %c0_i32_62 = arith.constant 0 : i32
    %129 = arith.minsi %c0_i32_61, %c0_i32_62 : i32
    %c0_63 = arith.constant 0 : index
    %130 = arith.index_cast %129 : i32 to index
    %c48 = arith.constant 48 : index
    %131 = vector.load %arg15[%c0_63, %130, %c48] : memref<2x8x96xbf16, #tpu.memory_space<vmem>>, vector<2x8x8xbf16>
    %c0_64 = arith.constant 0 : index
    %132 = arith.index_cast %129 : i32 to index
    %c80 = arith.constant 80 : index
    %133 = vector.load %arg15[%c0_64, %132, %c80] : memref<2x8x96xbf16, #tpu.memory_space<vmem>>, vector<2x8x8xbf16>
    %cst_65 = arith.constant dense<0.000000e+00> : vector<2x8x8xf32>
    %134 = tpu.matmul %125, %131, %cst_65 {dimension_numbers = #tpu.dot_dimension_numbers<[2], [2], [1], [1], [0, 0, 0, 1, 1, 1], [0], [0]>} : vector<2x8x8xbf16>, vector<2x8x8xbf16>, vector<2x8x8xf32> -> vector<2x8x8xf32>
    %135 = vector.broadcast %129 : i32 to vector<2x8x8xi32>
    %136 = arith.addi %44, %135 : vector<2x8x8xi32>
    %137 = arith.cmpi sle, %136, %43 : vector<2x8x8xi32>
    %c0_i32_66 = arith.constant 0 : i32
    %138 = vector.broadcast %c0_i32_66 : i32 to vector<2x8x8xi32>
    %139 = arith.cmpi sge, %136, %138 : vector<2x8x8xi32>
    %140 = arith.andi %137, %139 : vector<2x8x8xi1>
    %cst_67 = arith.constant -1.000000e+30 : f32
    %141 = vector.broadcast %cst_67 : f32 to vector<2x8x8xf32>
    %142 = arith.select %140, %134, %141 : vector<2x8x8xi1>, vector<2x8x8xf32>
    %cst_68 = arith.constant dense<0xFF800000> : vector<2x8xf32>
    %143 = vector.multi_reduction <maximumf>, %142, %cst_68 [2] : vector<2x8x8xf32> to vector<2x8xf32>
    %144 = vector.shape_cast %143 : vector<2x8xf32> to vector<2x8x1xf32>
    %145 = arith.maximumf %126, %144 : vector<2x8x1xf32>
    %146 = arith.subf %126, %145 : vector<2x8x1xf32>
    %147 = math.exp %146 : vector<2x8x1xf32>
    %148 = vector.broadcast %145 : vector<2x8x1xf32> to vector<2x8x8xf32>
    %149 = arith.subf %142, %148 : vector<2x8x8xf32>
    %150 = math.exp %149 : vector<2x8x8xf32>
    %151 = arith.mulf %147, %127 : vector<2x8x1xf32>
    %cst_69 = arith.constant dense<0.000000e+00> : vector<2x8xf32>
    %152 = vector.multi_reduction <add>, %150, %cst_69 [2] : vector<2x8x8xf32> to vector<2x8xf32>
    %153 = vector.shape_cast %152 : vector<2x8xf32> to vector<2x8x1xf32>
    %154 = arith.addf %151, %153 : vector<2x8x1xf32>
    %155 = arith.truncf %150 : vector<2x8x8xf32> to vector<2x8x8xbf16>
    %cst_70 = arith.constant dense<0.000000e+00> : vector<2x8x8xf32>
    %156 = tpu.matmul %155, %133, %cst_70 {dimension_numbers = #tpu.dot_dimension_numbers<[2], [1], [1], [2], [0, 0, 0, 1, 1, 2], [0], [0]>} : vector<2x8x8xbf16>, vector<2x8x8xbf16>, vector<2x8x8xf32> -> vector<2x8x8xf32>
    %157 = vector.broadcast %147 : vector<2x8x1xf32> to vector<2x8x8xf32>
    %158 = arith.mulf %157, %128 : vector<2x8x8xf32>
    %159 = arith.addf %158, %156 : vector<2x8x8xf32>
    %160 = tpu.reciprocal %154 {approx = true} : vector<2x8x1xf32> -> vector<2x8x1xf32>
    %161 = vector.broadcast %160 : vector<2x8x1xf32> to vector<2x8x8xf32>
    %162 = arith.mulf %159, %161 : vector<2x8x8xf32>
    %163 = arith.truncf %162 : vector<2x8x8xf32> to vector<2x8x8xbf16>
    %c0_71 = arith.constant 0 : index
    %c0_72 = arith.constant 0 : index
    %c16_73 = arith.constant 16 : index
    %164 = vector.load %arg16[%c0_71, %c0_72, %c16_73] : memref<2x8x32xbf16, #tpu.memory_space<vmem>>, vector<2x8x8xbf16>
    tpu.vector_store %arg16[%c0_71, %c0_72, %c16_73], %163 {strides = array<i32>} : memref<2x8x32xbf16, #tpu.memory_space<vmem>>, vector<2x8x8xbf16>,
    %c0_74 = arith.constant 0 : index
    %c0_75 = arith.constant 0 : index
    %c24 = arith.constant 24 : index
    %165 = vector.load %arg15[%c0_74, %c0_75, %c24] : memref<2x8x96xbf16, #tpu.memory_space<vmem>>, vector<2x8x8xbf16>
    %cst_76 = arith.constant -1.000000e+30 : f32
    %166 = vector.broadcast %cst_76 : f32 to vector<2x8x1xf32>
    %cst_77 = arith.constant 0.000000e+00 : f32
    %167 = vector.broadcast %cst_77 : f32 to vector<2x8x1xf32>
    %cst_78 = arith.constant 0.000000e+00 : f32
    %168 = vector.broadcast %cst_78 : f32 to vector<2x8x8xf32>
    %c0_i32_79 = arith.constant 0 : i32
    %c0_i32_80 = arith.constant 0 : i32
    %169 = arith.minsi %c0_i32_79, %c0_i32_80 : i32
    %c0_81 = arith.constant 0 : index
    %170 = arith.index_cast %169 : i32 to index
    %c56 = arith.constant 56 : index
    %171 = vector.load %arg15[%c0_81, %170, %c56] : memref<2x8x96xbf16, #tpu.memory_space<vmem>>, vector<2x8x8xbf16>
    %c0_82 = arith.constant 0 : index
    %172 = arith.index_cast %169 : i32 to index
    %c88 = arith.constant 88 : index
    %173 = vector.load %arg15[%c0_82, %172, %c88] : memref<2x8x96xbf16, #tpu.memory_space<vmem>>, vector<2x8x8xbf16>
    %cst_83 = arith.constant dense<0.000000e+00> : vector<2x8x8xf32>
    %174 = tpu.matmul %165, %171, %cst_83 {dimension_numbers = #tpu.dot_dimension_numbers<[2], [2], [1], [1], [0, 0, 0, 1, 1, 1], [0], [0]>} : vector<2x8x8xbf16>, vector<2x8x8xbf16>, vector<2x8x8xf32> -> vector<2x8x8xf32>
    %175 = vector.broadcast %169 : i32 to vector<2x8x8xi32>
    %176 = arith.addi %44, %175 : vector<2x8x8xi32>
    %177 = arith.cmpi sle, %176, %43 : vector<2x8x8xi32>
    %c0_i32_84 = arith.constant 0 : i32
    %178 = vector.broadcast %c0_i32_84 : i32 to vector<2x8x8xi32>
    %179 = arith.cmpi sge, %176, %178 : vector<2x8x8xi32>
    %180 = arith.andi %177, %179 : vector<2x8x8xi1>
    %cst_85 = arith.constant -1.000000e+30 : f32
    %181 = vector.broadcast %cst_85 : f32 to vector<2x8x8xf32>
    %182 = arith.select %180, %174, %181 : vector<2x8x8xi1>, vector<2x8x8xf32>
    %cst_86 = arith.constant dense<0xFF800000> : vector<2x8xf32>
    %183 = vector.multi_reduction <maximumf>, %182, %cst_86 [2] : vector<2x8x8xf32> to vector<2x8xf32>
    %184 = vector.shape_cast %183 : vector<2x8xf32> to vector<2x8x1xf32>
    %185 = arith.maximumf %166, %184 : vector<2x8x1xf32>
    %186 = arith.subf %166, %185 : vector<2x8x1xf32>
    %187 = math.exp %186 : vector<2x8x1xf32>
    %188 = vector.broadcast %185 : vector<2x8x1xf32> to vector<2x8x8xf32>
    %189 = arith.subf %182, %188 : vector<2x8x8xf32>
    %190 = math.exp %189 : vector<2x8x8xf32>
    %191 = arith.mulf %187, %167 : vector<2x8x1xf32>
    %cst_87 = arith.constant dense<0.000000e+00> : vector<2x8xf32>
    %192 = vector.multi_reduction <add>, %190, %cst_87 [2] : vector<2x8x8xf32> to vector<2x8xf32>
    %193 = vector.shape_cast %192 : vector<2x8xf32> to vector<2x8x1xf32>
    %194 = arith.addf %191, %193 : vector<2x8x1xf32>
    %195 = arith.truncf %190 : vector<2x8x8xf32> to vector<2x8x8xbf16>
    %cst_88 = arith.constant dense<0.000000e+00> : vector<2x8x8xf32>
    %196 = tpu.matmul %195, %173, %cst_88 {dimension_numbers = #tpu.dot_dimension_numbers<[2], [1], [1], [2], [0, 0, 0, 1, 1, 2], [0], [0]>} : vector<2x8x8xbf16>, vector<2x8x8xbf16>, vector<2x8x8xf32> -> vector<2x8x8xf32>
    %197 = vector.broadcast %187 : vector<2x8x1xf32> to vector<2x8x8xf32>
    %198 = arith.mulf %197, %168 : vector<2x8x8xf32>
    %199 = arith.addf %198, %196 : vector<2x8x8xf32>
    %200 = tpu.reciprocal %194 {approx = true} : vector<2x8x1xf32> -> vector<2x8x1xf32>
    %201 = vector.broadcast %200 : vector<2x8x1xf32> to vector<2x8x8xf32>
    %202 = arith.mulf %199, %201 : vector<2x8x8xf32>
    %203 = arith.truncf %202 : vector<2x8x8xf32> to vector<2x8x8xbf16>
    %c0_89 = arith.constant 0 : index
    %c0_90 = arith.constant 0 : index
    %c24_91 = arith.constant 24 : index
    %204 = vector.load %arg16[%c0_89, %c0_90, %c24_91] : memref<2x8x32xbf16, #tpu.memory_space<vmem>>, vector<2x8x8xbf16>
    tpu.vector_store %arg16[%c0_89, %c0_90, %c24_91], %203 {strides = array<i32>} : memref<2x8x32xbf16, #tpu.memory_space<vmem>>, vector<2x8x8xbf16>,
    %c0_92 = arith.constant 0 : index
    %c0_93 = arith.constant 0 : index
    %c0_94 = arith.constant 0 : index
    %205 = vector.load %arg16[%c0_92, %c0_93, %c0_94] : memref<2x8x32xbf16, #tpu.memory_space<vmem>>, vector<2x8x32xbf16>
    %206 = vector.shape_cast %205 : vector<2x8x32xbf16> to vector<16x32xbf16>
    %c0_95 = arith.constant 0 : index
    %c0_96 = arith.constant 0 : index
    %207 = vector.load %arg6[%c0_95, %c0_96] : memref<32x32xbf16, #tpu.memory_space<vmem>>, vector<32x32xbf16>
    %cst_97 = arith.constant dense<0.000000e+00> : vector<16x32xf32>
    %208 = tpu.matmul %206, %207, %cst_97 {dimension_numbers = #tpu.dot_dimension_numbers<[1], [0], [0], [1], [0, 0, 1, 1], [], []>} : vector<16x32xbf16>, vector<32x32xbf16>, vector<16x32xf32> -> vector<16x32xf32>
    %c0_98 = arith.constant 0 : index
    %c0_99 = arith.constant 0 : index
    %209 = vector.load %arg7[%c0_98, %c0_99] : memref<1x32xf32, #tpu.memory_space<vmem>>, vector<1x32xf32>
    %210 = vector.broadcast %209 : vector<1x32xf32> to vector<16x32xf32>
    %211 = arith.addf %208, %210 : vector<16x32xf32>
    %212 = arith.addf %1, %211 : vector<16x32xf32>
    %c0_100 = arith.constant 0 : index
    %c0_101 = arith.constant 0 : index
    %213 = vector.load %arg8[%c0_100, %c0_101] : memref<1x32xf32, #tpu.memory_space<vmem>>, vector<1x32xf32>
    %c0_102 = arith.constant 0 : index
    %c0_103 = arith.constant 0 : index
    %214 = vector.load %arg9[%c0_102, %c0_103] : memref<1x32xf32, #tpu.memory_space<vmem>>, vector<1x32xf32>
    %cst_104 = arith.constant dense<0.000000e+00> : vector<16xf32>
    %215 = vector.multi_reduction <add>, %212, %cst_104 [1] : vector<16x32xf32> to vector<16xf32>
    %216 = vector.shape_cast %215 : vector<16xf32> to vector<16x1xf32>
    %cst_105 = arith.constant 3.200000e+01 : f32
    %217 = vector.broadcast %cst_105 : f32 to vector<16x1xf32>
    %218 = arith.divf %216, %217 : vector<16x1xf32>
    %219 = vector.broadcast %218 : vector<16x1xf32> to vector<16x32xf32>
    %220 = arith.subf %212, %219 : vector<16x32xf32>
    %221 = arith.mulf %220, %220 : vector<16x32xf32>
    %cst_106 = arith.constant dense<0.000000e+00> : vector<16xf32>
    %222 = vector.multi_reduction <add>, %221, %cst_106 [1] : vector<16x32xf32> to vector<16xf32>
    %223 = vector.shape_cast %222 : vector<16xf32> to vector<16x1xf32>
    %cst_107 = arith.constant 3.200000e+01 : f32
    %224 = vector.broadcast %cst_107 : f32 to vector<16x1xf32>
    %225 = arith.divf %223, %224 : vector<16x1xf32>
    %226 = vector.broadcast %218 : vector<16x1xf32> to vector<16x32xf32>
    %227 = arith.subf %212, %226 : vector<16x32xf32>
    %cst_108 = arith.constant 9.99999974E-6 : f32
    %228 = vector.broadcast %cst_108 : f32 to vector<16x1xf32>
    %229 = arith.addf %225, %228 : vector<16x1xf32>
    %230 = math.rsqrt %229 : vector<16x1xf32>
    %231 = vector.broadcast %230 : vector<16x1xf32> to vector<16x32xf32>
    %232 = arith.mulf %227, %231 : vector<16x32xf32>
    %233 = vector.broadcast %213 : vector<1x32xf32> to vector<16x32xf32>
    %234 = arith.mulf %232, %233 : vector<16x32xf32>
    %235 = vector.broadcast %214 : vector<1x32xf32> to vector<16x32xf32>
    %236 = arith.addf %234, %235 : vector<16x32xf32>
    %237 = arith.truncf %236 : vector<16x32xf32> to vector<16x32xbf16>
    %c0_109 = arith.constant 0 : index
    %c0_110 = arith.constant 0 : index
    %238 = vector.load %arg13[%c0_109, %c0_110] : memref<1x32xf32, #tpu.memory_space<vmem>>, vector<1x32xf32>
    %239 = vector.shape_cast %238 : vector<1x32xf32> to vector<1x32xf32>
    %240 = vector.broadcast %239 : vector<1x32xf32> to vector<16x32xf32>
    %c0_111 = arith.constant 0 : index
    %c0_112 = arith.constant 0 : index
    %241 = vector.load %arg10[%c0_111, %c0_112] : memref<32x128xbf16, #tpu.memory_space<vmem>>, vector<32x128xbf16>
    %cst_113 = arith.constant dense<0.000000e+00> : vector<16x128xf32>
    %242 = tpu.matmul %237, %241, %cst_113 {dimension_numbers = #tpu.dot_dimension_numbers<[1], [0], [0], [1], [0, 0, 1, 1], [], []>} : vector<16x32xbf16>, vector<32x128xbf16>, vector<16x128xf32> -> vector<16x128xf32>
    %c0_114 = arith.constant 0 : index
    %c0_115 = arith.constant 0 : index
    %243 = vector.load %arg11[%c0_114, %c0_115] : memref<1x128xf32, #tpu.memory_space<vmem>>, vector<1x128xf32>
    %244 = vector.broadcast %243 : vector<1x128xf32> to vector<16x128xf32>
    %245 = arith.addf %242, %244 : vector<16x128xf32>
    %cst_116 = arith.constant 5.000000e-01 : f32
    %246 = vector.broadcast %cst_116 : f32 to vector<16x128xf32>
    %247 = arith.mulf %246, %245 : vector<16x128xf32>
    %cst_117 = arith.constant 4.471500e-02 : f32
    %248 = vector.broadcast %cst_117 : f32 to vector<16x128xf32>
    %249 = arith.mulf %248, %245 : vector<16x128xf32>
    %250 = arith.mulf %249, %245 : vector<16x128xf32>
    %251 = arith.mulf %250, %245 : vector<16x128xf32>
    %252 = arith.addf %245, %251 : vector<16x128xf32>
    %cst_118 = arith.constant 0.797884583 : f32
    %253 = vector.broadcast %cst_118 : f32 to vector<16x128xf32>
    %254 = arith.mulf %253, %252 : vector<16x128xf32>
    %255 = math.tanh %254 : vector<16x128xf32>
    %cst_119 = arith.constant 1.000000e+00 : f32
    %256 = vector.broadcast %cst_119 : f32 to vector<16x128xf32>
    %257 = arith.addf %256, %255 : vector<16x128xf32>
    %258 = arith.mulf %247, %257 : vector<16x128xf32>
    %259 = arith.truncf %258 : vector<16x128xf32> to vector<16x128xbf16>
    %c0_120 = arith.constant 0 : index
    %c0_121 = arith.constant 0 : index
    %260 = vector.load %arg12[%c0_120, %c0_121] : memref<128x32xbf16, #tpu.memory_space<vmem>>, vector<128x32xbf16>
    %cst_122 = arith.constant dense<0.000000e+00> : vector<16x32xf32>
    %261 = tpu.matmul %259, %260, %cst_122 {dimension_numbers = #tpu.dot_dimension_numbers<[1], [0], [0], [1], [0, 0, 1, 1], [], []>} : vector<16x128xbf16>, vector<128x32xbf16>, vector<16x32xf32> -> vector<16x32xf32>
    %262 = arith.addf %240, %261 : vector<16x32xf32>
    %263 = arith.addf %212, %262 : vector<16x32xf32>
    %264 = vector.shape_cast %263 : vector<16x32xf32> to vector<2x8x32xf32>
    %c0_123 = arith.constant 0 : index
    %c0_124 = arith.constant 0 : index
    %c0_125 = arith.constant 0 : index
    %265 = vector.load %arg14[%c0_123, %c0_124, %c0_125] : memref<2x8x32xf32, #tpu.memory_space<vmem>>, vector<2x8x32xf32>
    tpu.vector_store %arg14[%c0_123, %c0_124, %c0_125], %264 {strides = array<i32>} : memref<2x8x32xf32, #tpu.memory_space<vmem>>, vector<2x8x32xf32>,
    return
  }
  func.func @transform_0(%arg0: i32) -> (i32, i32, i32) {
    %c0_i32 = arith.constant 0 : i32
    %c0_i32_0 = arith.constant 0 : i32
    %c0_i32_1 = arith.constant 0 : i32
    return %arg0, %c0_i32, %c0_i32_0 : i32, i32, i32
  }
  func.func @transform_1(%arg0: i32) -> (i32, i32) {
    %c0_i32 = arith.constant 0 : i32
    %c0_i32_0 = arith.constant 0 : i32
    %c0_i32_1 = arith.constant 0 : i32
    return %c0_i32, %c0_i32_0 : i32, i32
  }
  func.func @transform_2(%arg0: i32) -> (i32, i32) {
    %c0_i32 = arith.constant 0 : i32
    %c0_i32_0 = arith.constant 0 : i32
    %c0_i32_1 = arith.constant 0 : i32
    return %c0_i32, %c0_i32_0 : i32, i32
  }
  func.func @transform_3(%arg0: i32) -> (i32, i32) {
    %c0_i32 = arith.constant 0 : i32
    %c0_i32_0 = arith.constant 0 : i32
    %c0_i32_1 = arith.constant 0 : i32
    return %c0_i32, %c0_i32_0 : i32, i32
  }
  func.func @transform_4(%arg0: i32) -> (i32, i32) {
    %c0_i32 = arith.constant 0 : i32
    %c0_i32_0 = arith.constant 0 : i32
    %c0_i32_1 = arith.constant 0 : i32
    return %c0_i32, %c0_i32_0 : i32, i32
  }
  func.func @transform_5(%arg0: i32) -> (i32, i32) {
    %c0_i32 = arith.constant 0 : i32
    %c0_i32_0 = arith.constant 0 : i32
    %c0_i32_1 = arith.constant 0 : i32
    return %c0_i32, %c0_i32_0 : i32, i32
  }
  func.func @transform_6(%arg0: i32) -> (i32, i32) {
    %c0_i32 = arith.constant 0 : i32
    %c0_i32_0 = arith.constant 0 : i32
    %c0_i32_1 = arith.constant 0 : i32
    return %c0_i32, %c0_i32_0 : i32, i32
  }
  func.func @transform_7(%arg0: i32) -> (i32, i32) {
    %c0_i32 = arith.constant 0 : i32
    %c0_i32_0 = arith.constant 0 : i32
    %c0_i32_1 = arith.constant 0 : i32
    return %c0_i32, %c0_i32_0 : i32, i32
  }
  func.func @transform_8(%arg0: i32) -> (i32, i32) {
    %c0_i32 = arith.constant 0 : i32
    %c0_i32_0 = arith.constant 0 : i32
    %c0_i32_1 = arith.constant 0 : i32
    return %c0_i32, %c0_i32_0 : i32, i32
  }
  func.func @transform_9(%arg0: i32) -> (i32, i32) {
    %c0_i32 = arith.constant 0 : i32
    %c0_i32_0 = arith.constant 0 : i32
    %c0_i32_1 = arith.constant 0 : i32
    return %c0_i32, %c0_i32_0 : i32, i32
  }
  func.func @transform_10(%arg0: i32) -> (i32, i32) {
    %c0_i32 = arith.constant 0 : i32
    %c0_i32_0 = arith.constant 0 : i32
    %c0_i32_1 = arith.constant 0 : i32
    return %c0_i32, %c0_i32_0 : i32, i32
  }
  func.func @transform_11(%arg0: i32) -> (i32, i32) {
    %c0_i32 = arith.constant 0 : i32
    %c0_i32_0 = arith.constant 0 : i32
    %c0_i32_1 = arith.constant 0 : i32
    return %c0_i32, %c0_i32_0 : i32, i32
  }
  func.func @transform_12(%arg0: i32) -> (i32, i32) {
    %c0_i32 = arith.constant 0 : i32
    %c0_i32_0 = arith.constant 0 : i32
    %c0_i32_1 = arith.constant 0 : i32
    return %c0_i32, %c0_i32_0 : i32, i32
  }
  func.func @transform_13(%arg0: i32) -> (i32, i32, i32) {
    %c0_i32 = arith.constant 0 : i32
    %c0_i32_0 = arith.constant 0 : i32
    %c0_i32_1 = arith.constant 0 : i32
    return %arg0, %c0_i32, %c0_i32_0 : i32, i32, i32
  }
}

module attributes {stable_mosaic.version = 11 : i64} {
  func.func @kernel(%arg0: i32, %arg1: memref<2x8x32xf32, #tpu.memory_space<vmem>>, %arg2: memref<1x32xf32, #tpu.memory_space<vmem>>, %arg3: memref<1x32xf32, #tpu.memory_space<vmem>>, %arg4: memref<32x96xbf16, #tpu.memory_space<vmem>>, %arg5: memref<1x96xf32, #tpu.memory_space<vmem>>, %arg6: memref<32x32xbf16, #tpu.memory_space<vmem>>, %arg7: memref<1x32xf32, #tpu.memory_space<vmem>>, %arg8: memref<1x32xf32, #tpu.memory_space<vmem>>, %arg9: memref<1x32xf32, #tpu.memory_space<vmem>>, %arg10: memref<32x128xbf16, #tpu.memory_space<vmem>>, %arg11: memref<1x128xf32, #tpu.memory_space<vmem>>, %arg12: memref<128x32xbf16, #tpu.memory_space<vmem>>, %arg13: memref<1x32xf32, #tpu.memory_space<vmem>>, %arg14: memref<2x8x32xf32, #tpu.memory_space<vmem>>, %arg15: memref<2x8x96xbf16, #tpu.memory_space<vmem>>, %arg16: memref<2x8x32xbf16, #tpu.memory_space<vmem>>) attributes {dimension_semantics = [#tpu.dimension_semantics<parallel>], iteration_bounds = array<i64: 1>, scalar_prefetch = 0 : i64, scratch_operands = 2 : i64, tpu.core_type = #tpu.core_type<tc>, window_params = [{transform_indices = @transform_0, window_bounds = array<i64: 2, 8, 32>}, {pipeline_mode = #tpu.pipeline_mode<synchronous>, transform_indices = @transform_1, window_bounds = array<i64: 1, 32>}, {pipeline_mode = #tpu.pipeline_mode<synchronous>, transform_indices = @transform_2, window_bounds = array<i64: 1, 32>}, {pipeline_mode = #tpu.pipeline_mode<synchronous>, transform_indices = @transform_3, window_bounds = array<i64: 32, 96>}, {pipeline_mode = #tpu.pipeline_mode<synchronous>, transform_indices = @transform_4, window_bounds = array<i64: 1, 96>}, {pipeline_mode = #tpu.pipeline_mode<synchronous>, transform_indices = @transform_5, window_bounds = array<i64: 32, 32>}, {pipeline_mode = #tpu.pipeline_mode<synchronous>, transform_indices = @transform_6, window_bounds = array<i64: 1, 32>}, {pipeline_mode = #tpu.pipeline_mode<synchronous>, transform_indices = @transform_7, window_bounds = array<i64: 1, 32>}, {pipeline_mode = #tpu.pipeline_mode<synchronous>, transform_indices = @transform_8, window_bounds = array<i64: 1, 32>}, {pipeline_mode = #tpu.pipeline_mode<synchronous>, transform_indices = @transform_9, window_bounds = array<i64: 32, 128>}, {pipeline_mode = #tpu.pipeline_mode<synchronous>, transform_indices = @transform_10, window_bounds = array<i64: 1, 128>}, {pipeline_mode = #tpu.pipeline_mode<synchronous>, transform_indices = @transform_11, window_bounds = array<i64: 128, 32>}, {pipeline_mode = #tpu.pipeline_mode<synchronous>, transform_indices = @transform_12, window_bounds = array<i64: 1, 32>}, {transform_indices = @transform_13, window_bounds = array<i64: 2, 8, 32>}]} {
    %c0 = arith.constant 0 : index
    %c0_0 = arith.constant 0 : index
    %c0_1 = arith.constant 0 : index
    %0 = vector.load %arg1[%c0, %c0_0, %c0_1] : memref<2x8x32xf32, #tpu.memory_space<vmem>>, vector<2x8x32xf32>
    %1 = vector.shape_cast %0 : vector<2x8x32xf32> to vector<16x32xf32>
    %c0_2 = arith.constant 0 : index
    %c0_3 = arith.constant 0 : index
    %2 = vector.load %arg2[%c0_2, %c0_3] : memref<1x32xf32, #tpu.memory_space<vmem>>, vector<1x32xf32>
    %c0_4 = arith.constant 0 : index
    %c0_5 = arith.constant 0 : index
    %3 = vector.load %arg3[%c0_4, %c0_5] : memref<1x32xf32, #tpu.memory_space<vmem>>, vector<1x32xf32>
    %cst = arith.constant dense<0.000000e+00> : vector<16xf32>
    %4 = vector.multi_reduction <add>, %1, %cst [1] : vector<16x32xf32> to vector<16xf32>
    %5 = vector.shape_cast %4 : vector<16xf32> to vector<16x1xf32>
    %cst_6 = arith.constant 3.200000e+01 : f32
    %6 = vector.broadcast %cst_6 : f32 to vector<16x1xf32>
    %7 = arith.divf %5, %6 : vector<16x1xf32>
    %8 = vector.broadcast %7 : vector<16x1xf32> to vector<16x32xf32>
    %9 = arith.subf %1, %8 : vector<16x32xf32>
    %10 = arith.mulf %9, %9 : vector<16x32xf32>
    %cst_7 = arith.constant dense<0.000000e+00> : vector<16xf32>
    %11 = vector.multi_reduction <add>, %10, %cst_7 [1] : vector<16x32xf32> to vector<16xf32>
    %12 = vector.shape_cast %11 : vector<16xf32> to vector<16x1xf32>
    %cst_8 = arith.constant 3.200000e+01 : f32
    %13 = vector.broadcast %cst_8 : f32 to vector<16x1xf32>
    %14 = arith.divf %12, %13 : vector<16x1xf32>
    %15 = vector.broadcast %7 : vector<16x1xf32> to vector<16x32xf32>
    %16 = arith.subf %1, %15 : vector<16x32xf32>
    %cst_9 = arith.constant 9.99999974E-6 : f32
    %17 = vector.broadcast %cst_9 : f32 to vector<16x1xf32>
    %18 = arith.addf %14, %17 : vector<16x1xf32>
    %19 = math.rsqrt %18 : vector<16x1xf32>
    %20 = vector.broadcast %19 : vector<16x1xf32> to vector<16x32xf32>
    %21 = arith.mulf %16, %20 : vector<16x32xf32>
    %22 = vector.broadcast %2 : vector<1x32xf32> to vector<16x32xf32>
    %23 = arith.mulf %21, %22 : vector<16x32xf32>
    %24 = vector.broadcast %3 : vector<1x32xf32> to vector<16x32xf32>
    %25 = arith.addf %23, %24 : vector<16x32xf32>
    %26 = arith.truncf %25 : vector<16x32xf32> to vector<16x32xbf16>
    %c0_10 = arith.constant 0 : index
    %c0_11 = arith.constant 0 : index
    %27 = vector.load %arg4[%c0_10, %c0_11] : memref<32x96xbf16, #tpu.memory_space<vmem>>, vector<32x96xbf16>
    %cst_12 = arith.constant dense<0.000000e+00> : vector<16x96xf32>
    %28 = tpu.matmul %26, %27, %cst_12 {dimension_numbers = #tpu.dot_dimension_numbers<[1], [0], [0], [1], [0, 0, 1, 1], [], []>} : vector<16x32xbf16>, vector<32x96xbf16>, vector<16x96xf32> -> vector<16x96xf32>
    %c0_13 = arith.constant 0 : index
    %c0_14 = arith.constant 0 : index
    %29 = vector.load %arg5[%c0_13, %c0_14] : memref<1x96xf32, #tpu.memory_space<vmem>>, vector<1x96xf32>
    %30 = vector.broadcast %29 : vector<1x96xf32> to vector<16x96xf32>
    %31 = arith.addf %28, %30 : vector<16x96xf32>
    %32 = tpu.iota {dimensions = array<i32: 1>} : vector<1x96xi32>
    %c32_i32 = arith.constant 32 : i32
    %33 = vector.broadcast %c32_i32 : i32 to vector<1x96xi32>
    %34 = arith.cmpi slt, %32, %33 : vector<1x96xi32>
    %cst_15 = arith.constant 0.353553385 : f32
    %cst_16 = arith.constant 1.000000e+00 : f32
    %35 = vector.broadcast %cst_15 : f32 to vector<1x96xf32>
    %36 = vector.broadcast %cst_16 : f32 to vector<1x96xf32>
    %37 = arith.select %34, %35, %36 : vector<1x96xi1>, vector<1x96xf32>
    %38 = vector.broadcast %37 : vector<1x96xf32> to vector<16x96xf32>
    %39 = arith.mulf %31, %38 : vector<16x96xf32>
    %40 = arith.truncf %39 : vector<16x96xf32> to vector<16x96xbf16>
    %41 = vector.shape_cast %40 : vector<16x96xbf16> to vector<2x8x96xbf16>
    %c0_17 = arith.constant 0 : index
    %c0_18 = arith.constant 0 : index
    %c0_19 = arith.constant 0 : index
    %42 = vector.load %arg15[%c0_17, %c0_18, %c0_19] : memref<2x8x96xbf16, #tpu.memory_space<vmem>>, vector<2x8x96xbf16>
    tpu.vector_store %arg15[%c0_17, %c0_18, %c0_19], %41 {strides = array<i32>} : memref<2x8x96xbf16, #tpu.memory_space<vmem>>, vector<2x8x96xbf16>,
    %43 = tpu.iota {dimensions = array<i32: 1>} : vector<2x8x8xi32>
    %44 = tpu.iota {dimensions = array<i32: 2>} : vector<2x8x8xi32>
    %c0_20 = arith.constant 0 : index
    %c0_21 = arith.constant 0 : index
    %c0_22 = arith.constant 0 : index
    %45 = vector.load %arg15[%c0_20, %c0_21, %c0_22] : memref<2x8x96xbf16, #tpu.memory_space<vmem>>, vector<2x8x8xbf16>
    %cst_23 = arith.constant -1.000000e+30 : f32
    %46 = vector.broadcast %cst_23 : f32 to vector<2x8x1xf32>
    %cst_24 = arith.constant 0.000000e+00 : f32
    %47 = vector.broadcast %cst_24 : f32 to vector<2x8x1xf32>
    %cst_25 = arith.constant 0.000000e+00 : f32
    %48 = vector.broadcast %cst_25 : f32 to vector<2x8x8xf32>
    %c0_i32 = arith.constant 0 : i32
    %c0_i32_26 = arith.constant 0 : i32
    %49 = arith.minsi %c0_i32, %c0_i32_26 : i32
    %c0_27 = arith.constant 0 : index
    %50 = arith.index_cast %49 : i32 to index
    %c32 = arith.constant 32 : index
    %51 = vector.load %arg15[%c0_27, %50, %c32] : memref<2x8x96xbf16, #tpu.memory_space<vmem>>, vector<2x8x8xbf16>
    %c0_28 = arith.constant 0 : index
    %52 = arith.index_cast %49 : i32 to index
    %c64 = arith.constant 64 : index
    %53 = vector.load %arg15[%c0_28, %52, %c64] : memref<2x8x96xbf16, #tpu.memory_space<vmem>>, vector<2x8x8xbf16>
    %cst_29 = arith.constant dense<0.000000e+00> : vector<2x8x8xf32>
    %54 = tpu.matmul %45, %51, %cst_29 {dimension_numbers = #tpu.dot_dimension_numbers<[2], [2], [1], [1], [0, 0, 0, 1, 1, 1], [0], [0]>} : vector<2x8x8xbf16>, vector<2x8x8xbf16>, vector<2x8x8xf32> -> vector<2x8x8xf32>
    %55 = vector.broadcast %49 : i32 to vector<2x8x8xi32>
    %56 = arith.addi %44, %55 : vector<2x8x8xi32>
    %57 = arith.cmpi sle, %56, %43 : vector<2x8x8xi32>
    %c0_i32_30 = arith.constant 0 : i32
    %58 = vector.broadcast %c0_i32_30 : i32 to vector<2x8x8xi32>
    %59 = arith.cmpi sge, %56, %58 : vector<2x8x8xi32>
    %60 = arith.andi %57, %59 : vector<2x8x8xi1>
    %cst_31 = arith.constant -1.000000e+30 : f32
    %61 = vector.broadcast %cst_31 : f32 to vector<2x8x8xf32>
    %62 = arith.select %60, %54, %61 : vector<2x8x8xi1>, vector<2x8x8xf32>
    %cst_32 = arith.constant dense<0xFF800000> : vector<2x8xf32>
    %63 = vector.multi_reduction <maximumf>, %62, %cst_32 [2] : vector<2x8x8xf32> to vector<2x8xf32>
    %64 = vector.shape_cast %63 : vector<2x8xf32> to vector<2x8x1xf32>
    %65 = arith.maximumf %46, %64 : vector<2x8x1xf32>
    %66 = arith.subf %46, %65 : vector<2x8x1xf32>
    %67 = math.exp %66 : vector<2x8x1xf32>
    %68 = vector.broadcast %65 : vector<2x8x1xf32> to vector<2x8x8xf32>
    %69 = arith.subf %62, %68 : vector<2x8x8xf32>
    %70 = math.exp %69 : vector<2x8x8xf32>
    %71 = arith.mulf %67, %47 : vector<2x8x1xf32>
    %cst_33 = arith.constant dense<0.000000e+00> : vector<2x8xf32>
    %72 = vector.multi_reduction <add>, %70, %cst_33 [2] : vector<2x8x8xf32> to vector<2x8xf32>
    %73 = vector.shape_cast %72 : vector<2x8xf32> to vector<2x8x1xf32>
    %74 = arith.addf %71, %73 : vector<2x8x1xf32>
    %75 = arith.truncf %70 : vector<2x8x8xf32> to vector<2x8x8xbf16>
    %cst_34 = arith.constant dense<0.000000e+00> : vector<2x8x8xf32>
    %76 = tpu.matmul %75, %53, %cst_34 {dimension_numbers = #tpu.dot_dimension_numbers<[2], [1], [1], [2], [0, 0, 0, 1, 1, 2], [0], [0]>} : vector<2x8x8xbf16>, vector<2x8x8xbf16>, vector<2x8x8xf32> -> vector<2x8x8xf32>
    %77 = vector.broadcast %67 : vector<2x8x1xf32> to vector<2x8x8xf32>
    %78 = arith.mulf %77, %48 : vector<2x8x8xf32>
    %79 = arith.addf %78, %76 : vector<2x8x8xf32>
    %80 = tpu.reciprocal %74 {approx = true} : vector<2x8x1xf32> -> vector<2x8x1xf32>
    %81 = vector.broadcast %80 : vector<2x8x1xf32> to vector<2x8x8xf32>
    %82 = arith.mulf %79, %81 : vector<2x8x8xf32>
    %83 = arith.truncf %82 : vector<2x8x8xf32> to vector<2x8x8xbf16>
    %c0_35 = arith.constant 0 : index
    %c0_36 = arith.constant 0 : index
    %c0_37 = arith.constant 0 : index
    %84 = vector.load %arg16[%c0_35, %c0_36, %c0_37] : memref<2x8x32xbf16, #tpu.memory_space<vmem>>, vector<2x8x8xbf16>
    tpu.vector_store %arg16[%c0_35, %c0_36, %c0_37], %83 {strides = array<i32>} : memref<2x8x32xbf16, #tpu.memory_space<vmem>>, vector<2x8x8xbf16>,
    %c0_38 = arith.constant 0 : index
    %c0_39 = arith.constant 0 : index
    %c8 = arith.constant 8 : index
    %85 = vector.load %arg15[%c0_38, %c0_39, %c8] : memref<2x8x96xbf16, #tpu.memory_space<vmem>>, vector<2x8x8xbf16>
    %cst_40 = arith.constant -1.000000e+30 : f32
    %86 = vector.broadcast %cst_40 : f32 to vector<2x8x1xf32>
    %cst_41 = arith.constant 0.000000e+00 : f32
    %87 = vector.broadcast %cst_41 : f32 to vector<2x8x1xf32>
    %cst_42 = arith.constant 0.000000e+00 : f32
    %88 = vector.broadcast %cst_42 : f32 to vector<2x8x8xf32>
    %c0_i32_43 = arith.constant 0 : i32
    %c0_i32_44 = arith.constant 0 : i32
    %89 = arith.minsi %c0_i32_43, %c0_i32_44 : i32
    %c0_45 = arith.constant 0 : index
    %90 = arith.index_cast %89 : i32 to index
    %c40 = arith.constant 40 : index
    %91 = vector.load %arg15[%c0_45, %90, %c40] : memref<2x8x96xbf16, #tpu.memory_space<vmem>>, vector<2x8x8xbf16>
    %c0_46 = arith.constant 0 : index
    %92 = arith.index_cast %89 : i32 to index
    %c72 = arith.constant 72 : index
    %93 = vector.load %arg15[%c0_46, %92, %c72] : memref<2x8x96xbf16, #tpu.memory_space<vmem>>, vector<2x8x8xbf16>
    %cst_47 = arith.constant dense<0.000000e+00> : vector<2x8x8xf32>
    %94 = tpu.matmul %85, %91, %cst_47 {dimension_numbers = #tpu.dot_dimension_numbers<[2], [2], [1], [1], [0, 0, 0, 1, 1, 1], [0], [0]>} : vector<2x8x8xbf16>, vector<2x8x8xbf16>, vector<2x8x8xf32> -> vector<2x8x8xf32>
    %95 = vector.broadcast %89 : i32 to vector<2x8x8xi32>
    %96 = arith.addi %44, %95 : vector<2x8x8xi32>
    %97 = arith.cmpi sle, %96, %43 : vector<2x8x8xi32>
    %c0_i32_48 = arith.constant 0 : i32
    %98 = vector.broadcast %c0_i32_48 : i32 to vector<2x8x8xi32>
    %99 = arith.cmpi sge, %96, %98 : vector<2x8x8xi32>
    %100 = arith.andi %97, %99 : vector<2x8x8xi1>
    %cst_49 = arith.constant -1.000000e+30 : f32
    %101 = vector.broadcast %cst_49 : f32 to vector<2x8x8xf32>
    %102 = arith.select %100, %94, %101 : vector<2x8x8xi1>, vector<2x8x8xf32>
    %cst_50 = arith.constant dense<0xFF800000> : vector<2x8xf32>
    %103 = vector.multi_reduction <maximumf>, %102, %cst_50 [2] : vector<2x8x8xf32> to vector<2x8xf32>
    %104 = vector.shape_cast %103 : vector<2x8xf32> to vector<2x8x1xf32>
    %105 = arith.maximumf %86, %104 : vector<2x8x1xf32>
    %106 = arith.subf %86, %105 : vector<2x8x1xf32>
    %107 = math.exp %106 : vector<2x8x1xf32>
    %108 = vector.broadcast %105 : vector<2x8x1xf32> to vector<2x8x8xf32>
    %109 = arith.subf %102, %108 : vector<2x8x8xf32>
    %110 = math.exp %109 : vector<2x8x8xf32>
    %111 = arith.mulf %107, %87 : vector<2x8x1xf32>
    %cst_51 = arith.constant dense<0.000000e+00> : vector<2x8xf32>
    %112 = vector.multi_reduction <add>, %110, %cst_51 [2] : vector<2x8x8xf32> to vector<2x8xf32>
    %113 = vector.shape_cast %112 : vector<2x8xf32> to vector<2x8x1xf32>
    %114 = arith.addf %111, %113 : vector<2x8x1xf32>
    %115 = arith.truncf %110 : vector<2x8x8xf32> to vector<2x8x8xbf16>
    %cst_52 = arith.constant dense<0.000000e+00> : vector<2x8x8xf32>
    %116 = tpu.matmul %115, %93, %cst_52 {dimension_numbers = #tpu.dot_dimension_numbers<[2], [1], [1], [2], [0, 0, 0, 1, 1, 2], [0], [0]>} : vector<2x8x8xbf16>, vector<2x8x8xbf16>, vector<2x8x8xf32> -> vector<2x8x8xf32>
    %117 = vector.broadcast %107 : vector<2x8x1xf32> to vector<2x8x8xf32>
    %118 = arith.mulf %117, %88 : vector<2x8x8xf32>
    %119 = arith.addf %118, %116 : vector<2x8x8xf32>
    %120 = tpu.reciprocal %114 {approx = true} : vector<2x8x1xf32> -> vector<2x8x1xf32>
    %121 = vector.broadcast %120 : vector<2x8x1xf32> to vector<2x8x8xf32>
    %122 = arith.mulf %119, %121 : vector<2x8x8xf32>
    %123 = arith.truncf %122 : vector<2x8x8xf32> to vector<2x8x8xbf16>
    %c0_53 = arith.constant 0 : index
    %c0_54 = arith.constant 0 : index
    %c8_55 = arith.constant 8 : index
    %124 = vector.load %arg16[%c0_53, %c0_54, %c8_55] : memref<2x8x32xbf16, #tpu.memory_space<vmem>>, vector<2x8x8xbf16>
    tpu.vector_store %arg16[%c0_53, %c0_54, %c8_55], %123 {strides = array<i32>} : memref<2x8x32xbf16, #tpu.memory_space<vmem>>, vector<2x8x8xbf16>,
    %c0_56 = arith.constant 0 : index
    %c0_57 = arith.constant 0 : index
    %c16 = arith.constant 16 : index
    %125 = vector.load %arg15[%c0_56, %c0_57, %c16] : memref<2x8x96xbf16, #tpu.memory_space<vmem>>, vector<2x8x8xbf16>
    %cst_58 = arith.constant -1.000000e+30 : f32
    %126 = vector.broadcast %cst_58 : f32 to vector<2x8x1xf32>
    %cst_59 = arith.constant 0.000000e+00 : f32
    %127 = vector.broadcast %cst_59 : f32 to vector<2x8x1xf32>
    %cst_60 = arith.constant 0.000000e+00 : f32
    %128 = vector.broadcast %cst_60 : f32 to vector<2x8x8xf32>
    %c0_i32_61 = arith.constant 0 : i32
    %c0_i32_62 = arith.constant 0 : i32
    %129 = arith.minsi %c0_i32_61, %c0_i32_62 : i32
    %c0_63 = arith.constant 0 : index
    %130 = arith.index_cast %129 : i32 to index
    %c48 = arith.constant 48 : index
    %131 = vector.load %arg15[%c0_63, %130, %c48] : memref<2x8x96xbf16, #tpu.memory_space<vmem>>, vector<2x8x8xbf16>
    %c0_64 = arith.constant 0 : index
    %132 = arith.index_cast %129 : i32 to index
    %c80 = arith.constant 80 : index
    %133 = vector.load %arg15[%c0_64, %132, %c80] : memref<2x8x96xbf16, #tpu.memory_space<vmem>>, vector<2x8x8xbf16>
    %cst_65 = arith.constant dense<0.000000e+00> : vector<2x8x8xf32>
    %134 = tpu.matmul %125, %131, %cst_65 {dimension_numbers = #tpu.dot_dimension_numbers<[2], [2], [1], [1], [0, 0, 0, 1, 1, 1], [0], [0]>} : vector<2x8x8xbf16>, vector<2x8x8xbf16>, vector<2x8x8xf32> -> vector<2x8x8xf32>
    %135 = vector.broadcast %129 : i32 to vector<2x8x8xi32>
    %136 = arith.addi %44, %135 : vector<2x8x8xi32>
    %137 = arith.cmpi sle, %136, %43 : vector<2x8x8xi32>
    %c0_i32_66 = arith.constant 0 : i32
    %138 = vector.broadcast %c0_i32_66 : i32 to vector<2x8x8xi32>
    %139 = arith.cmpi sge, %136, %138 : vector<2x8x8xi32>
    %140 = arith.andi %137, %139 : vector<2x8x8xi1>
    %cst_67 = arith.constant -1.000000e+30 : f32
    %141 = vector.broadcast %cst_67 : f32 to vector<2x8x8xf32>
    %142 = arith.select %140, %134, %141 : vector<2x8x8xi1>, vector<2x8x8xf32>
    %cst_68 = arith.constant dense<0xFF800000> : vector<2x8xf32>
    %143 = vector.multi_reduction <maximumf>, %142, %cst_68 [2] : vector<2x8x8xf32> to vector<2x8xf32>
    %144 = vector.shape_cast %143 : vector<2x8xf32> to vector<2x8x1xf32>
    %145 = arith.maximumf %126, %144 : vector<2x8x1xf32>
    %146 = arith.subf %126, %145 : vector<2x8x1xf32>
    %147 = math.exp %146 : vector<2x8x1xf32>
    %148 = vector.broadcast %145 : vector<2x8x1xf32> to vector<2x8x8xf32>
    %149 = arith.subf %142, %148 : vector<2x8x8xf32>
    %150 = math.exp %149 : vector<2x8x8xf32>
    %151 = arith.mulf %147, %127 : vector<2x8x1xf32>
    %cst_69 = arith.constant dense<0.000000e+00> : vector<2x8xf32>
    %152 = vector.multi_reduction <add>, %150, %cst_69 [2] : vector<2x8x8xf32> to vector<2x8xf32>
    %153 = vector.shape_cast %152 : vector<2x8xf32> to vector<2x8x1xf32>
    %154 = arith.addf %151, %153 : vector<2x8x1xf32>
    %155 = arith.truncf %150 : vector<2x8x8xf32> to vector<2x8x8xbf16>
    %cst_70 = arith.constant dense<0.000000e+00> : vector<2x8x8xf32>
    %156 = tpu.matmul %155, %133, %cst_70 {dimension_numbers = #tpu.dot_dimension_numbers<[2], [1], [1], [2], [0, 0, 0, 1, 1, 2], [0], [0]>} : vector<2x8x8xbf16>, vector<2x8x8xbf16>, vector<2x8x8xf32> -> vector<2x8x8xf32>
    %157 = vector.broadcast %147 : vector<2x8x1xf32> to vector<2x8x8xf32>
    %158 = arith.mulf %157, %128 : vector<2x8x8xf32>
    %159 = arith.addf %158, %156 : vector<2x8x8xf32>
    %160 = tpu.reciprocal %154 {approx = true} : vector<2x8x1xf32> -> vector<2x8x1xf32>
    %161 = vector.broadcast %160 : vector<2x8x1xf32> to vector<2x8x8xf32>
    %162 = arith.mulf %159, %161 : vector<2x8x8xf32>
    %163 = arith.truncf %162 : vector<2x8x8xf32> to vector<2x8x8xbf16>
    %c0_71 = arith.constant 0 : index
    %c0_72 = arith.constant 0 : index
    %c16_73 = arith.constant 16 : index
    %164 = vector.load %arg16[%c0_71, %c0_72, %c16_73] : memref<2x8x32xbf16, #tpu.memory_space<vmem>>, vector<2x8x8xbf16>
    tpu.vector_store %arg16[%c0_71, %c0_72, %c16_73], %163 {strides = array<i32>} : memref<2x8x32xbf16, #tpu.memory_space<vmem>>, vector<2x8x8xbf16>,
    %c0_74 = arith.constant 0 : index
    %c0_75 = arith.constant 0 : index
    %c24 = arith.constant 24 : index
    %165 = vector.load %arg15[%c0_74, %c0_75, %c24] : memref<2x8x96xbf16, #tpu.memory_space<vmem>>, vector<2x8x8xbf16>
    %cst_76 = arith.constant -1.000000e+30 : f32
    %166 = vector.broadcast %cst_76 : f32 to vector<2x8x1xf32>
    %cst_77 = arith.constant 0.000000e+00 : f32
    %167 = vector.broadcast %cst_77 : f32 to vector<2x8x1xf32>
    %cst_78 = arith.constant 0.000000e+00 : f32
    %168 = vector.broadcast %cst_78 : f32 to vector<2x8x8xf32>
    %c0_i32_79 = arith.constant 0 : i32
    %c0_i32_80 = arith.constant 0 : i32
    %169 = arith.minsi %c0_i32_79, %c0_i32_80 : i32
    %c0_81 = arith.constant 0 : index
    %170 = arith.index_cast %169 : i32 to index
    %c56 = arith.constant 56 : index
    %171 = vector.load %arg15[%c0_81, %170, %c56] : memref<2x8x96xbf16, #tpu.memory_space<vmem>>, vector<2x8x8xbf16>
    %c0_82 = arith.constant 0 : index
    %172 = arith.index_cast %169 : i32 to index
    %c88 = arith.constant 88 : index
    %173 = vector.load %arg15[%c0_82, %172, %c88] : memref<2x8x96xbf16, #tpu.memory_space<vmem>>, vector<2x8x8xbf16>
    %cst_83 = arith.constant dense<0.000000e+00> : vector<2x8x8xf32>
    %174 = tpu.matmul %165, %171, %cst_83 {dimension_numbers = #tpu.dot_dimension_numbers<[2], [2], [1], [1], [0, 0, 0, 1, 1, 1], [0], [0]>} : vector<2x8x8xbf16>, vector<2x8x8xbf16>, vector<2x8x8xf32> -> vector<2x8x8xf32>
    %175 = vector.broadcast %169 : i32 to vector<2x8x8xi32>
    %176 = arith.addi %44, %175 : vector<2x8x8xi32>
    %177 = arith.cmpi sle, %176, %43 : vector<2x8x8xi32>
    %c0_i32_84 = arith.constant 0 : i32
    %178 = vector.broadcast %c0_i32_84 : i32 to vector<2x8x8xi32>
    %179 = arith.cmpi sge, %176, %178 : vector<2x8x8xi32>
    %180 = arith.andi %177, %179 : vector<2x8x8xi1>
    %cst_85 = arith.constant -1.000000e+30 : f32
    %181 = vector.broadcast %cst_85 : f32 to vector<2x8x8xf32>
    %182 = arith.select %180, %174, %181 : vector<2x8x8xi1>, vector<2x8x8xf32>
    %cst_86 = arith.constant dense<0xFF800000> : vector<2x8xf32>
    %183 = vector.multi_reduction <maximumf>, %182, %cst_86 [2] : vector<2x8x8xf32> to vector<2x8xf32>
    %184 = vector.shape_cast %183 : vector<2x8xf32> to vector<2x8x1xf32>
    %185 = arith.maximumf %166, %184 : vector<2x8x1xf32>
    %186 = arith.subf %166, %185 : vector<2x8x1xf32>
    %187 = math.exp %186 : vector<2x8x1xf32>
    %188 = vector.broadcast %185 : vector<2x8x1xf32> to vector<2x8x8xf32>
    %189 = arith.subf %182, %188 : vector<2x8x8xf32>
    %190 = math.exp %189 : vector<2x8x8xf32>
    %191 = arith.mulf %187, %167 : vector<2x8x1xf32>
    %cst_87 = arith.constant dense<0.000000e+00> : vector<2x8xf32>
    %192 = vector.multi_reduction <add>, %190, %cst_87 [2] : vector<2x8x8xf32> to vector<2x8xf32>
    %193 = vector.shape_cast %192 : vector<2x8xf32> to vector<2x8x1xf32>
    %194 = arith.addf %191, %193 : vector<2x8x1xf32>
    %195 = arith.truncf %190 : vector<2x8x8xf32> to vector<2x8x8xbf16>
    %cst_88 = arith.constant dense<0.000000e+00> : vector<2x8x8xf32>
    %196 = tpu.matmul %195, %173, %cst_88 {dimension_numbers = #tpu.dot_dimension_numbers<[2], [1], [1], [2], [0, 0, 0, 1, 1, 2], [0], [0]>} : vector<2x8x8xbf16>, vector<2x8x8xbf16>, vector<2x8x8xf32> -> vector<2x8x8xf32>
    %197 = vector.broadcast %187 : vector<2x8x1xf32> to vector<2x8x8xf32>
    %198 = arith.mulf %197, %168 : vector<2x8x8xf32>
    %199 = arith.addf %198, %196 : vector<2x8x8xf32>
    %200 = tpu.reciprocal %194 {approx = true} : vector<2x8x1xf32> -> vector<2x8x1xf32>
    %201 = vector.broadcast %200 : vector<2x8x1xf32> to vector<2x8x8xf32>
    %202 = arith.mulf %199, %201 : vector<2x8x8xf32>
    %203 = arith.truncf %202 : vector<2x8x8xf32> to vector<2x8x8xbf16>
    %c0_89 = arith.constant 0 : index
    %c0_90 = arith.constant 0 : index
    %c24_91 = arith.constant 24 : index
    %204 = vector.load %arg16[%c0_89, %c0_90, %c24_91] : memref<2x8x32xbf16, #tpu.memory_space<vmem>>, vector<2x8x8xbf16>
    tpu.vector_store %arg16[%c0_89, %c0_90, %c24_91], %203 {strides = array<i32>} : memref<2x8x32xbf16, #tpu.memory_space<vmem>>, vector<2x8x8xbf16>,
    %c0_92 = arith.constant 0 : index
    %c0_93 = arith.constant 0 : index
    %c0_94 = arith.constant 0 : index
    %205 = vector.load %arg16[%c0_92, %c0_93, %c0_94] : memref<2x8x32xbf16, #tpu.memory_space<vmem>>, vector<2x8x32xbf16>
    %206 = vector.shape_cast %205 : vector<2x8x32xbf16> to vector<16x32xbf16>
    %c0_95 = arith.constant 0 : index
    %c0_96 = arith.constant 0 : index
    %207 = vector.load %arg6[%c0_95, %c0_96] : memref<32x32xbf16, #tpu.memory_space<vmem>>, vector<32x32xbf16>
    %cst_97 = arith.constant dense<0.000000e+00> : vector<16x32xf32>
    %208 = tpu.matmul %206, %207, %cst_97 {dimension_numbers = #tpu.dot_dimension_numbers<[1], [0], [0], [1], [0, 0, 1, 1], [], []>} : vector<16x32xbf16>, vector<32x32xbf16>, vector<16x32xf32> -> vector<16x32xf32>
    %c0_98 = arith.constant 0 : index
    %c0_99 = arith.constant 0 : index
    %209 = vector.load %arg7[%c0_98, %c0_99] : memref<1x32xf32, #tpu.memory_space<vmem>>, vector<1x32xf32>
    %210 = vector.broadcast %209 : vector<1x32xf32> to vector<16x32xf32>
    %211 = arith.addf %208, %210 : vector<16x32xf32>
    %212 = arith.addf %1, %211 : vector<16x32xf32>
    %c0_100 = arith.constant 0 : index
    %c0_101 = arith.constant 0 : index
    %213 = vector.load %arg8[%c0_100, %c0_101] : memref<1x32xf32, #tpu.memory_space<vmem>>, vector<1x32xf32>
    %c0_102 = arith.constant 0 : index
    %c0_103 = arith.constant 0 : index
    %214 = vector.load %arg9[%c0_102, %c0_103] : memref<1x32xf32, #tpu.memory_space<vmem>>, vector<1x32xf32>
    %cst_104 = arith.constant dense<0.000000e+00> : vector<16xf32>
    %215 = vector.multi_reduction <add>, %212, %cst_104 [1] : vector<16x32xf32> to vector<16xf32>
    %216 = vector.shape_cast %215 : vector<16xf32> to vector<16x1xf32>
    %cst_105 = arith.constant 3.200000e+01 : f32
    %217 = vector.broadcast %cst_105 : f32 to vector<16x1xf32>
    %218 = arith.divf %216, %217 : vector<16x1xf32>
    %219 = vector.broadcast %218 : vector<16x1xf32> to vector<16x32xf32>
    %220 = arith.subf %212, %219 : vector<16x32xf32>
    %221 = arith.mulf %220, %220 : vector<16x32xf32>
    %cst_106 = arith.constant dense<0.000000e+00> : vector<16xf32>
    %222 = vector.multi_reduction <add>, %221, %cst_106 [1] : vector<16x32xf32> to vector<16xf32>
    %223 = vector.shape_cast %222 : vector<16xf32> to vector<16x1xf32>
    %cst_107 = arith.constant 3.200000e+01 : f32
    %224 = vector.broadcast %cst_107 : f32 to vector<16x1xf32>
    %225 = arith.divf %223, %224 : vector<16x1xf32>
    %226 = vector.broadcast %218 : vector<16x1xf32> to vector<16x32xf32>
    %227 = arith.subf %212, %226 : vector<16x32xf32>
    %cst_108 = arith.constant 9.99999974E-6 : f32
    %228 = vector.broadcast %cst_108 : f32 to vector<16x1xf32>
    %229 = arith.addf %225, %228 : vector<16x1xf32>
    %230 = math.rsqrt %229 : vector<16x1xf32>
    %231 = vector.broadcast %230 : vector<16x1xf32> to vector<16x32xf32>
    %232 = arith.mulf %227, %231 : vector<16x32xf32>
    %233 = vector.broadcast %213 : vector<1x32xf32> to vector<16x32xf32>
    %234 = arith.mulf %232, %233 : vector<16x32xf32>
    %235 = vector.broadcast %214 : vector<1x32xf32> to vector<16x32xf32>
    %236 = arith.addf %234, %235 : vector<16x32xf32>
    %237 = arith.truncf %236 : vector<16x32xf32> to vector<16x32xbf16>
    %c0_109 = arith.constant 0 : index
    %c0_110 = arith.constant 0 : index
    %238 = vector.load %arg13[%c0_109, %c0_110] : memref<1x32xf32, #tpu.memory_space<vmem>>, vector<1x32xf32>
    %239 = vector.shape_cast %238 : vector<1x32xf32> to vector<1x32xf32>
    %240 = vector.broadcast %239 : vector<1x32xf32> to vector<16x32xf32>
    %c0_111 = arith.constant 0 : index
    %c0_112 = arith.constant 0 : index
    %241 = vector.load %arg10[%c0_111, %c0_112] : memref<32x128xbf16, #tpu.memory_space<vmem>>, vector<32x128xbf16>
    %cst_113 = arith.constant dense<0.000000e+00> : vector<16x128xf32>
    %242 = tpu.matmul %237, %241, %cst_113 {dimension_numbers = #tpu.dot_dimension_numbers<[1], [0], [0], [1], [0, 0, 1, 1], [], []>} : vector<16x32xbf16>, vector<32x128xbf16>, vector<16x128xf32> -> vector<16x128xf32>
    %c0_114 = arith.constant 0 : index
    %c0_115 = arith.constant 0 : index
    %243 = vector.load %arg11[%c0_114, %c0_115] : memref<1x128xf32, #tpu.memory_space<vmem>>, vector<1x128xf32>
    %244 = vector.broadcast %243 : vector<1x128xf32> to vector<16x128xf32>
    %245 = arith.addf %242, %244 : vector<16x128xf32>
    %cst_116 = arith.constant 5.000000e-01 : f32
    %246 = vector.broadcast %cst_116 : f32 to vector<16x128xf32>
    %247 = arith.mulf %246, %245 : vector<16x128xf32>
    %cst_117 = arith.constant 4.471500e-02 : f32
    %248 = vector.broadcast %cst_117 : f32 to vector<16x128xf32>
    %249 = arith.mulf %248, %245 : vector<16x128xf32>
    %250 = arith.mulf %249, %245 : vector<16x128xf32>
    %251 = arith.mulf %250, %245 : vector<16x128xf32>
    %252 = arith.addf %245, %251 : vector<16x128xf32>
    %cst_118 = arith.constant 0.797884583 : f32
    %253 = vector.broadcast %cst_118 : f32 to vector<16x128xf32>
    %254 = arith.mulf %253, %252 : vector<16x128xf32>
    %255 = math.tanh %254 : vector<16x128xf32>
    %cst_119 = arith.constant 1.000000e+00 : f32
    %256 = vector.broadcast %cst_119 : f32 to vector<16x128xf32>
    %257 = arith.addf %256, %255 : vector<16x128xf32>
    %258 = arith.mulf %247, %257 : vector<16x128xf32>
    %259 = arith.truncf %258 : vector<16x128xf32> to vector<16x128xbf16>
    %c0_120 = arith.constant 0 : index
    %c0_121 = arith.constant 0 : index
    %260 = vector.load %arg12[%c0_120, %c0_121] : memref<128x32xbf16, #tpu.memory_space<vmem>>, vector<128x32xbf16>
    %cst_122 = arith.constant dense<0.000000e+00> : vector<16x32xf32>
    %261 = tpu.matmul %259, %260, %cst_122 {dimension_numbers = #tpu.dot_dimension_numbers<[1], [0], [0], [1], [0, 0, 1, 1], [], []>} : vector<16x128xbf16>, vector<128x32xbf16>, vector<16x32xf32> -> vector<16x32xf32>
    %262 = arith.addf %240, %261 : vector<16x32xf32>
    %263 = arith.addf %212, %262 : vector<16x32xf32>
    %264 = vector.shape_cast %263 : vector<16x32xf32> to vector<2x8x32xf32>
    %c0_123 = arith.constant 0 : index
    %c0_124 = arith.constant 0 : index
    %c0_125 = arith.constant 0 : index
    %265 = vector.load %arg14[%c0_123, %c0_124, %c0_125] : memref<2x8x32xf32, #tpu.memory_space<vmem>>, vector<2x8x32xf32>
    tpu.vector_store %arg14[%c0_123, %c0_124, %c0_125], %264 {strides = array<i32>} : memref<2x8x32xf32, #tpu.memory_space<vmem>>, vector<2x8x32xf32>,
    return
  }
  func.func @transform_0(%arg0: i32) -> (i32, i32, i32) {
    %c0_i32 = arith.constant 0 : i32
    %c0_i32_0 = arith.constant 0 : i32
    %c0_i32_1 = arith.constant 0 : i32
    return %arg0, %c0_i32, %c0_i32_0 : i32, i32, i32
  }
  func.func @transform_1(%arg0: i32) -> (i32, i32) {
    %c0_i32 = arith.constant 0 : i32
    %c0_i32_0 = arith.constant 0 : i32
    %c0_i32_1 = arith.constant 0 : i32
    return %c0_i32, %c0_i32_0 : i32, i32
  }
  func.func @transform_2(%arg0: i32) -> (i32, i32) {
    %c0_i32 = arith.constant 0 : i32
    %c0_i32_0 = arith.constant 0 : i32
    %c0_i32_1 = arith.constant 0 : i32
    return %c0_i32, %c0_i32_0 : i32, i32
  }
  func.func @transform_3(%arg0: i32) -> (i32, i32) {
    %c0_i32 = arith.constant 0 : i32
    %c0_i32_0 = arith.constant 0 : i32
    %c0_i32_1 = arith.constant 0 : i32
    return %c0_i32, %c0_i32_0 : i32, i32
  }
  func.func @transform_4(%arg0: i32) -> (i32, i32) {
    %c0_i32 = arith.constant 0 : i32
    %c0_i32_0 = arith.constant 0 : i32
    %c0_i32_1 = arith.constant 0 : i32
    return %c0_i32, %c0_i32_0 : i32, i32
  }
  func.func @transform_5(%arg0: i32) -> (i32, i32) {
    %c0_i32 = arith.constant 0 : i32
    %c0_i32_0 = arith.constant 0 : i32
    %c0_i32_1 = arith.constant 0 : i32
    return %c0_i32, %c0_i32_0 : i32, i32
  }
  func.func @transform_6(%arg0: i32) -> (i32, i32) {
    %c0_i32 = arith.constant 0 : i32
    %c0_i32_0 = arith.constant 0 : i32
    %c0_i32_1 = arith.constant 0 : i32
    return %c0_i32, %c0_i32_0 : i32, i32
  }
  func.func @transform_7(%arg0: i32) -> (i32, i32) {
    %c0_i32 = arith.constant 0 : i32
    %c0_i32_0 = arith.constant 0 : i32
    %c0_i32_1 = arith.constant 0 : i32
    return %c0_i32, %c0_i32_0 : i32, i32
  }
  func.func @transform_8(%arg0: i32) -> (i32, i32) {
    %c0_i32 = arith.constant 0 : i32
    %c0_i32_0 = arith.constant 0 : i32
    %c0_i32_1 = arith.constant 0 : i32
    return %c0_i32, %c0_i32_0 : i32, i32
  }
  func.func @transform_9(%arg0: i32) -> (i32, i32) {
    %c0_i32 = arith.constant 0 : i32
    %c0_i32_0 = arith.constant 0 : i32
    %c0_i32_1 = arith.constant 0 : i32
    return %c0_i32, %c0_i32_0 : i32, i32
  }
  func.func @transform_10(%arg0: i32) -> (i32, i32) {
    %c0_i32 = arith.constant 0 : i32
    %c0_i32_0 = arith.constant 0 : i32
    %c0_i32_1 = arith.constant 0 : i32
    return %c0_i32, %c0_i32_0 : i32, i32
  }
  func.func @transform_11(%arg0: i32) -> (i32, i32) {
    %c0_i32 = arith.constant 0 : i32
    %c0_i32_0 = arith.constant 0 : i32
    %c0_i32_1 = arith.constant 0 : i32
    return %c0_i32, %c0_i32_0 : i32, i32
  }
  func.func @transform_12(%arg0: i32) -> (i32, i32) {
    %c0_i32 = arith.constant 0 : i32
    %c0_i32_0 = arith.constant 0 : i32
    %c0_i32_1 = arith.constant 0 : i32
    return %c0_i32, %c0_i32_0 : i32, i32
  }
  func.func @transform_13(%arg0: i32) -> (i32, i32, i32) {
    %c0_i32 = arith.constant 0 : i32
    %c0_i32_0 = arith.constant 0 : i32
    %c0_i32_1 = arith.constant 0 : i32
    return %arg0, %c0_i32, %c0_i32_0 : i32, i32, i32
  }
}

</mosaic_0001>

<bundles_post_ra>
// kernel: tpu_custom_call.1
= control target key start
LH: loop header
LB: loop body
LE: loop exit
PB: predicated region body
PF: predicated region fallthrough
CT: control target
= control target key end

     0   :  { %vm50_vm0 = vcmask 261120   ;;  %s2371_s0 = inlined_call_operand.vmem [shape: f32[2,8,32], index: 0, kind: input, shape index: {}]   ;;  %s2372_s1 = inlined_call_operand.vmem [shape: f32[1,32], index: 1, kind: input, shape index: {}]   ;;  %s2373_s2 = inlined_call_operand.vmem [shape: f32[1,32], index: 2, kind: input, shape index: {}]   ;;  %s2374_s3 = inlined_call_operand.vmem [shape: bf16[32,96], index: 3, kind: input, shape index: {}]   ;;  %s2375_s4 = inlined_call_operand.vmem [shape: f32[1,96], index: 4, kind: input, shape index: {}]   ;;  %s2376_s5 = inlined_call_operand.vmem [shape: bf16[32,32], index: 5, kind: input, shape index: {}]   ;;  %s2377_s6 = inlined_call_operand.vmem [shape: f32[1,32], index: 6, kind: input, shape index: {}]   ;;  %s2378_s7 = inlined_call_operand.vmem [shape: f32[1,32], index: 7, kind: input, shape index: {}]   ;;  %s2379_s8 = inlined_call_operand.vmem [shape: f32[1,32], index: 8, kind: input, shape index: {}]   ;;  %s2380_s9 = inlined_call_operand.vmem [shape: bf16[32,128], index: 9, kind: input, shape index: {}]   ;;  %s2381_s10 = inlined_call_operand.vmem [shape: f32[1,128], index: 10, kind: input, shape index: {}]   ;;  %s2382_s11 = inlined_call_operand.vmem [shape: bf16[128,32], index: 11, kind: input, shape index: {}]   ;;  %s2383_s12 = inlined_call_operand.vmem [shape: f32[1,32], index: 12, kind: input, shape index: {}]   ;;  %s2384_s13 = inlined_call_operand.hbm [shape: f32[2,8,32], index: 13, kind: output, shape index: {}]  }
   0x1   :  { %v46_v0 = vld [vmem:[%s2371_s0] sm:$0xff]  ;;  %v47_v1 = vld [vmem:[%s2371_s0 + $0x8] sm:$0xff] }
   0x2   :  { %v51_v2 = vsel %vm50_vm0, %v46_v0, 0.0  ;;  %v54_v3 = vsel %vm50_vm0, %v47_v1, 0.0 }
   0x3   :  { %52 = vadd.xlane.f32.xlu0 %v51_v2 }
   0x7   :  { %55 = vadd.xlane.f32.xlu0 %v54_v3 }
   0x8   :  { %18 = vsyncpa [#allocation5], 0  ;;  %v1830_v14 = vld [vmem:[%s2374_s3 + $0x8] sm:$0xff]   ;;  %v1937_v15 = vmov 0.0   ;;  %vm1938_vm1 = vmmov 0   ;;  %v1831_v16 = vld [vmem:[%s2374_s3] sm:$0xff]   ;;  %v162_v34 = vlaneseq }
   0x9   :  { %1671 = vmatprep.subr.bf16.mxu0 %v1937_v15  ;;  %1675 = vmatprep.mubr.msk.bf16.mxu0 %vm1938_vm1, %v1937_v15  ;;  %v1555_v25 = vld [vmem:[%s2372_s1] ss:$0 sm:$0xff]  ;;  %v1939_v40 = vmov 1.0   ;;  %vm176_vm4 = vcmask 781312   ;;  %vm188_vm5 = vcmask 64512   ;;  %s1942_s20 = smov 88  }
   0xa   :  { %1672 = vmatpush3.bf16.msra.mxu0 %v1830_v14  ;;  %1691 = vmatprep.subr.bf16.mxu1 %v1937_v15  ;;  %v1556_v29 = vld [vmem:[%s2373_s2] ss:$0 sm:$0xff]  ;;  %v163_v35 = vand.u32 127, %v162_v34  ;;  %v180_v36 = vshrl.u32 %v162_v34, 7  ;;  %s1940_s2 = smov 96   ;;  %s1943_s21 = smov 120  }
   0xb   :  { %1673 = vmatprep.subr.bf16.mxu0 %v1937_v15  ;;  %1693 = vmatprep.mubr.msk.bf16.mxu1 %vm1938_vm1, %v1937_v15  ;;  %v1557_v38 = vld [vmem:[%s2375_s4] ss:$0 sm:$0xff]  ;;  %s1941_s4 = smov 64   ;;  %s1944_s22 = smov 56   ;;  %vm328_vm6 = vcmask 1043456   ;;  %vm428_vm7 = vcmask 60416  }
   0xc   :  { %vm2059_vm2 = vcmp.le.s32.totalorder %v163_v35, %v180_v36  ;;  %vm164_vm3 = vcmp.lt.s32.totalorder %v163_v35, 32  ;;  %s1945_s23 = smov 80   ;;  %s1946_s24 = smov 112   ;;  %vm689_vm8 = vcmask 126016   ;;  %vm950_vm9 = vcmask 191616  }
   0xd   :  { %v165_v41 = vsel %vm164_vm3, 0.35355338, %v1939_v40  ;;  %s1947_s25 = smov 48   ;;  %s1948_s26 = smov 72   ;;  %vm1211_vm10 = vcmask 257216  }
   0xe   :  { %1674 = vmatpush3.bf16.msra.mxu0 %v1831_v16  ;;  %s1949_s27 = smov 104   ;;  %s1950_s28 = smov 40  }
   0xf   :  { %1679 = vmatprep.subr.bf16.mxu0 %v1937_v15  ;;  %s1951_s29 = smov 8   ;;  %s1952_s30 = smov 16  }
  0x10   :  { %s1953_s17 = smov 24  }
  0x8c   :  { %v53_v4 = vpop.xlane.xlu0 %52 }
  0x8d   :  { %v58_v5 = vmul.f32 0.03125, %v53_v4 }
  0x8f   :  { %v60_v6 = vsub.f32 %v46_v0, %v58_v5 }
  0x90   :  { %v56_v7 = vpop.xlane.xlu0 %55 }
  0x91   :  { %v59_v8 = vmul.f32 0.03125, %v56_v7  ;;  %v62_v9 = vmul.f32 %v60_v6, %v60_v6 }
  0x93   :  { %v61_v10 = vsub.f32 %v47_v1, %v59_v8  ;;  %v64_v11 = vsel %vm50_vm0, %v62_v9, 0.0 }
  0x94   :  { %65 = vadd.xlane.f32.xlu1 %v64_v11 }
  0x95   :  { %v63_v12 = vmul.f32 %v61_v10, %v61_v10 }
  0x97   :  { %v67_v13 = vsel %vm50_vm0, %v63_v12, 0.0 }
  0x98   :  { %68 = vadd.xlane.f32.xlu1 %v67_v13 }
 0x11d   :  { %v66_v17 = vpop.xlane.xlu1 %65 }
 0x11e   :  { %v70_v18 = vmul.f32 0.03125, %v66_v17 }
 0x120   :  { %v72_v19 = vadd.f32 1e-05, %v70_v18 }
 0x121   :  { %v69_v20 = vpop.xlane.xlu1 %68 }
 0x122   :  { %1853 = vrsqrt.f32 %v72_v19  ;;  %v71_v21 = vmul.f32 0.03125, %v69_v20 }
 0x124   :  { %v73_v22 = vadd.f32 1e-05, %v71_v21 }
 0x126   :  { %1855 = vrsqrt.f32 %v73_v22 }
 0x12f   :  { %v1854_v23 = vpop.eup %1853 }
 0x130   :  { %v76_v24 = vmul.f32 %v1854_v23, %v60_v6 }
 0x132   :  { %v84_v28 = vmul.f32 %v1555_v25, %v76_v24 }
 0x133   :  { %v1856_v26 = vpop.eup %1855 }
 0x134   :  { %v77_v27 = vmul.f32 %v1856_v26, %v61_v10  ;;  %v92_v31 = vadd.f32 %v1556_v29, %v84_v28 }
 0x136   :  { %v85_v30 = vmul.f32 %v1555_v25, %v77_v27 }
 0x138   :  { %v93_v32 = vadd.f32 %v1556_v29, %v85_v30 }
 0x13a   :  { %v94_v33 = vpack.c.bf16 %v93_v32, %v92_v31 }
 0x13c   :  { %1676 = vmatmul.mubr.msk.bf16.vlgmr.msra.gmra.mxu0 %vm50_vm0, %v94_v33 }
 0x13d   :  { %1681 = vmatprep.mubr.msk.bf16.mxu0 %vm1938_vm1, %v1937_v15 }
 0x1fc   :  { %v155_v39 = vpop.f32.mrf.mxu0 }
 0x1fd   :  { %v156_v42 = vadd.f32 %v1557_v38, %v155_v39 }
 0x1fe   :  { %v1677_v43 = vpop.f32.mrf.mxu0 }
 0x1ff   :  { %v166_v44 = vmul.f32 %v165_v41, %v156_v42 }
 0x200   :  { %v158_v45 = vpop.f32.mrf.mxu0 }
 0x201   :  { %v1613_v46 = vpack.c.bf16 %v166_v44, %v166_v44  ;;  %v159_v47 = vadd.f32 %v1557_v38, %v158_v45 }
 0x202   :  { %v1678_v48 = vpop.f32.mrf.mxu0 }
 0x203   :  { %177 = vst.msk [vmem:[#allocation2] sm:$0xf] %vm176_vm4, %v1613_v46  ;;  %v167_v49 = vmul.f32 %v165_v41, %v159_v47 }
 0x205   :  { %v1614_v50 = vpack.c.bf16 %v167_v49, %v167_v49 }
 0x207   :  { %178 = vst.msk [vmem:[#allocation2 + $0x4] sm:$0xf] %vm176_vm4, %v1614_v50 }
 0x20a   :  { %v181_v51 = vld [vmem:[#allocation2] sm:$0xf] }
 0x20b   :  { %v1563_v52 = vcombine.low %v181_v51, %v181_v51  ;;  %v2082_v7 = vld [vmem:[#allocation2] ss:$0 sps:$4 sm:$0xff]  }
 0x20d   :  { %186 = vrot.lane.b32.xlu0 %v1563_v52, %s1940_s2 }
 0x20e   :  { %v182_v53 = vld [vmem:[#allocation2 + $0x4] sm:$0xf] }
 0x20f   :  { %v1565_v54 = vcombine.low %v182_v53, %v182_v53  ;;  %v1835_v8 = vld [vmem:[#allocation2 + $0x4] ss:$0 sps:$4 sm:$0xff]  }
 0x211   :  { %238 = vrot.lane.b32.xlu1 %v1565_v54, %s1940_s2 }
 0x27f   :  { %v187_v55 = vpop.permute.xlu0 %186 }
 0x280   :  { %v193_v56 = vsel %vm188_vm5, %v187_v55, 0 }
 0x281   :  { %1680 = vmatpush3.bf16.xpose.msra.mxu0 %v193_v56 }
 0x282   :  { %1685 = vmatprep.subr.bf16.mxu0 %v1937_v15 }
 0x283   :  { %v239_v57 = vpop.permute.xlu1 %238 }
 0x284   :  { %v244_v58 = vsel %vm188_vm5, %v239_v57, 0 }
 0x288   :  { %1682 = vmatmul.mubr.msk.bf16.vlgmr.msra.gmra.mxu0 %vm188_vm5, %v181_v51 }
 0x289   :  { %1686 = vmatpush3.bf16.xpose.msra.mxu0 %v244_v58  ;;  %1687 = vmatprep.mubr.msk.bf16.mxu0 %vm1938_vm1, %v1937_v15 }
 0x28a   :  { %1697 = vmatprep.subr.bf16.mxu0 %v1937_v15 }
 0x290   :  { %1688 = vmatmul.mubr.msk.bf16.vlgmr.msra.gmra.mxu0 %vm188_vm5, %v182_v53 }
 0x291   :  { %1699 = vmatprep.mubr.msk.bf16.mxu0 %vm1938_vm1, %v1937_v15 }
 0x348   :  { %v229_v59 = vpop.f32.mrf.mxu0 }
 0x349   :  { %v289_v60 = vsel %vm2059_vm2, %v229_v59, -1e+30 }
 0x34a   :  { %v1683_v61 = vpop.f32.mrf.mxu0  ;;  %v291_v62 = vsel %vm188_vm5, %v289_v60, -inf }
 0x34b   :  { %292 = vmax.xlane.f32.xlu1 %v291_v62 }
 0x34c   :  { %v232_v63 = vpop.f32.mrf.mxu0 }
 0x34e   :  { %v1684_v0 = vpop.f32.mrf.mxu0 }
 0x350   :  { %v280_v1 = vpop.f32.mrf.mxu0 }
 0x351   :  { %v290_v2 = vsel %vm2059_vm2, %v280_v1, -1e+30  ;;  %v1836_v1 = vld [vmem:[#allocation2 + $0x4] ss:$0 sps:$4 sm:$0xff]  }
 0x352   :  { %v1689_v3 = vpop.f32.mrf.mxu0  ;;  %v294_v4 = vsel %vm188_vm5, %v290_v2, -inf }
 0x353   :  { %295 = vmax.xlane.f32.xlu0 %v294_v4 }
 0x354   :  { %v283_v5 = vpop.f32.mrf.mxu0 }
 0x356   :  { %v1690_v6 = vpop.f32.mrf.mxu0 }
 0x35c   :  { %372 = vrot.lane.b32.xlu1 %v1565_v54, %s1941_s4 }
 0x360   :  { %438 = vrot.lane.b32.xlu1 %v2082_v7, %s1942_s20 }
 0x364   :  { %491 = vrot.lane.b32.xlu1 %v1835_v8, %s1942_s20 }
 0x368   :  { %489 = vrot.lane.b32.xlu1 %v1835_v8, %s1943_s21 }
 0x369   :  { %323 = vrot.lane.b32.xlu0 %v1563_v52, %s1941_s4 }
 0x36c   :  { %621 = vrot.lane.b32.xlu1 %v1835_v8, %s1944_s22 }
 0x36d   :  { %436 = vrot.lane.b32.xlu0 %v2082_v7, %s1943_s21 }
 0x3d4   :  { %v293_v9 = vpop.xlane.xlu1 %292 }
 0x3d5   :  { %v297_v10 = vmax.f32 %v293_v9, -1e+30 }
 0x3d7   :  { %v305_v11 = vsub.f32 %v289_v60, %v297_v10  ;;  %v299_v34 = vsub.f32 -1e+30, %v297_v10 }
 0x3d8   :  { %v373_v12 = vpop.permute.xlu1 %372 }
 0x3d9   :  { %v307_v13 = vmul.f32 1.442695, %v305_v11  ;;  %v378_v14 = vsel %vm328_vm6, %v373_v12, 0  ;;  %v301_v35 = vmul.f32 1.442695, %v299_v34 }
 0x3da   :  { %1698 = vmatpush3.bf16.msra.mxu0 %v378_v14 }
 0x3db   :  { %1709 = vmatprep.subr.bf16.mxu0 %v1937_v15  ;;  %1857 = vpow2.f32 %v307_v13 }
 0x3dc   :  { %v296_v16 = vpop.xlane.xlu0 %295  ;;  %v439_v22 = vpop.permute.xlu1 %438 }
 0x3dd   :  { %v298_v17 = vmax.f32 %v296_v16, -1e+30  ;;  %v444_v25 = vsel %vm188_vm5, %v439_v22, 0 }
 0x3df   :  { %v306_v18 = vsub.f32 %v290_v2, %v298_v17  ;;  %v300_v36 = vsub.f32 -1e+30, %v298_v17  ;;  %v2135_v2 = vld [vmem:[#allocation2] ss:$0 sps:$4 sm:$0xff]  }
 0x3e0   :  { %v324_v19 = vpop.permute.xlu0 %323  ;;  %v492_v26 = vpop.permute.xlu1 %491 }
 0x3e1   :  { %v309_v20 = vmul.f32 1.442695, %v306_v18  ;;  %v330_v21 = vsel %vm328_vm6, %v324_v19, 0  ;;  %v497_v31 = vsel %vm188_vm5, %v492_v26, 0  ;;  %v303_v38 = vmul.f32 1.442695, %v300_v36 }
 0x3e2   :  { %1692 = vmatpush3.bf16.msra.mxu1 %v330_v21 }
 0x3e3   :  { %1703 = vmatprep.subr.bf16.mxu1 %v1937_v15  ;;  %1859 = vpow2.f32 %v309_v20 }
 0x3e4   :  { %v490_v29 = vpop.permute.xlu1 %489  ;;  %v437_v30 = vpop.permute.xlu0 %436  ;;  %1861 = vpow2.f32 %v301_v35 }
 0x3e5   :  { %1863 = vpow2.f32 %v303_v38 }
 0x3e8   :  { %v2091_v23 = vpop.eup %1857  ;;  %v622_v32 = vpop.permute.xlu1 %621 }
 0x3e9   :  { %v321_v24 = vpack.c.bf16 %v2091_v23, %v2091_v23  ;;  %v627_v33 = vsel %vm328_vm6, %v622_v32, 0 }
 0x3eb   :  { %1694 = vmatmul.mubr.msk.bf16.vlgmr.msra.gmra.mxu1 %vm188_vm5, %v321_v24 }
 0x3ec   :  { %1704 = vmatpush3.bf16.xpose.msra.mxu1 %v444_v25  ;;  %1705 = vmatprep.mubr.msk.bf16.mxu1 %vm1938_vm1, %v1937_v15 }
 0x3ed   :  { %1715 = vmatprep.subr.bf16.mxu1 %v1937_v15 }
 0x3f0   :  { %v2100_v27 = vpop.eup %1859 }
 0x3f1   :  { %v322_v28 = vpack.c.bf16 %v2100_v27, %v2100_v27  ;;  %v1862_v39 = vpop.eup %1861 }
 0x3f2   :  { %v2117_v40 = vmul.f32 0.0, %v1862_v39  ;;  %v1864_v44 = vpop.eup %1863 }
 0x3f3   :  { %1700 = vmatmul.mubr.msk.bf16.vlgmr.msra.gmra.mxu0 %vm188_vm5, %v322_v28  ;;  %1706 = vmatmul.mubr.msk.bf16.vlgmr.msra.gmra.mxu1 %vm188_vm5, %v437_v30  ;;  %v2122_v47 = vmul.f32 0.0, %v1864_v44 }
 0x3f4   :  { %1710 = vmatpush3.bf16.xpose.msra.mxu0 %v497_v31  ;;  %1711 = vmatprep.mubr.msk.bf16.mxu0 %vm1938_vm1, %v1937_v15 }
 0x3f5   :  { %1721 = vmatprep.subr.bf16.mxu0 %v1937_v15  ;;  %1717 = vmatprep.mubr.msk.bf16.mxu1 %vm1938_vm1, %v1937_v15 }
 0x3fb   :  { %1712 = vmatmul.mubr.msk.bf16.vlgmr.msra.gmra.mxu0 %vm188_vm5, %v490_v29 }
 0x3fc   :  { %1722 = vmatpush3.bf16.msra.mxu0 %v627_v33  ;;  %1723 = vmatprep.mubr.msk.bf16.mxu0 %vm1938_vm1, %v1937_v15 }
 0x3fd   :  { %1733 = vmatprep.subr.bf16.mxu0 %v1937_v15 }
 0x4ab   :  { %v366_v41 = vpop.f32.mrf.mxu1 }
 0x4ac   :  { %v2120_v42 = vadd.f32 %v366_v41, %v2117_v40 }
 0x4ad   :  { %v1695_v43 = vpop.f32.mrf.mxu1 }
 0x4af   :  { %v369_v45 = vpop.f32.mrf.mxu1 }
 0x4b1   :  { %v1696_v46 = vpop.f32.mrf.mxu1 }
 0x4b3   :  { %v414_v48 = vpop.f32.mrf.mxu0  ;;  %v480_v49 = vpop.f32.mrf.mxu1 }
 0x4b4   :  { %v2125_v50 = vadd.f32 %v414_v48, %v2122_v47  ;;  %v539_v51 = vsel %vm2059_vm2, %v480_v49, -1e+30 }
 0x4b5   :  { %v1701_v52 = vpop.f32.mrf.mxu0  ;;  %v1707_v53 = vpop.f32.mrf.mxu1  ;;  %v541_v54 = vsel %vm188_vm5, %v539_v51, -inf }
 0x4b6   :  { %542 = vmax.xlane.f32.xlu0 %v541_v54 }
 0x4b7   :  { %v417_v55 = vpop.f32.mrf.mxu0  ;;  %v483_v56 = vpop.f32.mrf.mxu1 }
 0x4b9   :  { %v1702_v57 = vpop.f32.mrf.mxu0  ;;  %v1708_v58 = vpop.f32.mrf.mxu1 }
 0x4bb   :  { %v533_v59 = vpop.f32.mrf.mxu0 }
 0x4bc   :  { %v540_v60 = vsel %vm2059_vm2, %v533_v59, -1e+30 }
 0x4bd   :  { %v1713_v61 = vpop.f32.mrf.mxu0  ;;  %v544_v62 = vsel %vm188_vm5, %v540_v60, -inf }
 0x4be   :  { %545 = vmax.xlane.f32.xlu1 %v544_v62 }
 0x4bf   :  { %v536_v63 = vpop.f32.mrf.mxu0 }
 0x4c0   :  { %v2186_v63 = vld [vmem:[#allocation2 + $0x4] ss:$0 sps:$4 sm:$0xff]  }
 0x4c1   :  { %v1714_v0 = vpop.f32.mrf.mxu0 }
 0x4c2   :  { %v2188_v0 = vld [vmem:[#allocation2] ss:$0 sps:$4 sm:$0xff]  }
 0x4cc   :  { %573 = vrot.lane.b32.xlu0 %v2082_v7, %s1944_s22 }
 0x4cf   :  { %752 = vrot.lane.b32.xlu1 %v1836_v1, %s1945_s23 }
 0x4d0   :  { %699 = vrot.lane.b32.xlu0 %v2135_v2, %s1945_s23 }
 0x4d3   :  { %750 = vrot.lane.b32.xlu1 %v1836_v1, %s1946_s24 }
 0x4d4   :  { %697 = vrot.lane.b32.xlu0 %v2135_v2, %s1946_s24 }
 0x4d7   :  { %882 = vrot.lane.b32.xlu1 %v1836_v1, %s1947_s25 }
 0x53f   :  { %v543_v3 = vpop.xlane.xlu0 %542 }
 0x540   :  { %v547_v4 = vmax.f32 %v543_v3, -1e+30 }
 0x542   :  { %v555_v5 = vsub.f32 %v539_v51, %v547_v4  ;;  %v549_v28 = vsub.f32 -1e+30, %v547_v4 }
 0x543   :  { %v574_v6 = vpop.permute.xlu0 %573 }
 0x544   :  { %v557_v8 = vmul.f32 1.442695, %v555_v5  ;;  %v579_v7 = vsel %vm328_vm6, %v574_v6, 0  ;;  %v551_v29 = vmul.f32 1.442695, %v549_v28 }
 0x545   :  { %1716 = vmatpush3.bf16.msra.mxu1 %v579_v7 }
 0x546   :  { %1727 = vmatprep.subr.bf16.mxu1 %v1937_v15  ;;  %1865 = vpow2.f32 %v557_v8 }
 0x547   :  { %v546_v9 = vpop.xlane.xlu1 %545  ;;  %v700_v14 = vpop.permute.xlu0 %699 }
 0x548   :  { %v548_v10 = vmax.f32 %v546_v9, -1e+30  ;;  %v705_v17 = vsel %vm188_vm5, %v700_v14, 0 }
 0x54a   :  { %v556_v11 = vsub.f32 %v540_v60, %v548_v10  ;;  %v550_v30 = vsub.f32 -1e+30, %v548_v10 }
 0x54b   :  { %v753_v18 = vpop.permute.xlu1 %752  ;;  %v698_v21 = vpop.permute.xlu0 %697 }
 0x54c   :  { %v559_v12 = vmul.f32 1.442695, %v556_v11  ;;  %v758_v24 = vsel %vm188_vm5, %v753_v18, 0  ;;  %v553_v31 = vmul.f32 1.442695, %v550_v30 }
 0x54e   :  { %1867 = vpow2.f32 %v559_v12 }
 0x54f   :  { %v751_v22 = vpop.permute.xlu1 %750  ;;  %1869 = vpow2.f32 %v551_v29 }
 0x550   :  { %1871 = vpow2.f32 %v553_v31 }
 0x553   :  { %v2142_v13 = vpop.eup %1865  ;;  %v883_v25 = vpop.permute.xlu1 %882 }
 0x554   :  { %v571_v16 = vpack.c.bf16 %v2142_v13, %v2142_v13  ;;  %v888_v26 = vsel %vm328_vm6, %v883_v25, 0 }
 0x556   :  { %1718 = vmatmul.mubr.msk.bf16.vlgmr.msra.gmra.mxu1 %vm188_vm5, %v571_v16 }
 0x557   :  { %1728 = vmatpush3.bf16.xpose.msra.mxu1 %v705_v17  ;;  %1729 = vmatprep.mubr.msk.bf16.mxu1 %vm1938_vm1, %v1937_v15 }
 0x558   :  { %1739 = vmatprep.subr.bf16.mxu1 %v1937_v15 }
 0x55b   :  { %v2151_v19 = vpop.eup %1867 }
 0x55c   :  { %v572_v20 = vpack.c.bf16 %v2151_v19, %v2151_v19  ;;  %v1870_v32 = vpop.eup %1869 }
 0x55d   :  { %v2168_v33 = vmul.f32 0.0, %v1870_v32  ;;  %v1872_v38 = vpop.eup %1871 }
 0x55e   :  { %1724 = vmatmul.mubr.msk.bf16.vlgmr.msra.gmra.mxu0 %vm188_vm5, %v572_v20  ;;  %1730 = vmatmul.mubr.msk.bf16.vlgmr.msra.gmra.mxu1 %vm188_vm5, %v698_v21  ;;  %v2173_v43 = vmul.f32 0.0, %v1872_v38 }
 0x55f   :  { %1734 = vmatpush3.bf16.xpose.msra.mxu0 %v758_v24  ;;  %1735 = vmatprep.mubr.msk.bf16.mxu0 %vm1938_vm1, %v1937_v15 }
 0x560   :  { %1745 = vmatprep.subr.bf16.mxu0 %v1937_v15  ;;  %1741 = vmatprep.mubr.msk.bf16.mxu1 %vm1938_vm1, %v1937_v15 }
 0x566   :  { %1736 = vmatmul.mubr.msk.bf16.vlgmr.msra.gmra.mxu0 %vm188_vm5, %v751_v22 }
 0x567   :  { %1746 = vmatpush3.bf16.msra.mxu0 %v888_v26  ;;  %1747 = vmatprep.mubr.msk.bf16.mxu0 %vm1938_vm1, %v1937_v15 }
 0x568   :  { %1757 = vmatprep.subr.bf16.mxu0 %v1937_v15 }
 0x616   :  { %v615_v34 = vpop.f32.mrf.mxu1 }
 0x617   :  { %v2171_v35 = vadd.f32 %v615_v34, %v2168_v33 }
 0x618   :  { %v1719_v36 = vpop.f32.mrf.mxu1 }
 0x61a   :  { %v618_v39 = vpop.f32.mrf.mxu1 }
 0x61c   :  { %v1720_v41 = vpop.f32.mrf.mxu1 }
 0x61e   :  { %v663_v44 = vpop.f32.mrf.mxu0  ;;  %v741_v45 = vpop.f32.mrf.mxu1 }
 0x61f   :  { %v2176_v46 = vadd.f32 %v663_v44, %v2173_v43  ;;  %v800_v48 = vsel %vm2059_vm2, %v741_v45, -1e+30 }
 0x620   :  { %v1725_v49 = vpop.f32.mrf.mxu0  ;;  %v1731_v51 = vpop.f32.mrf.mxu1  ;;  %v802_v52 = vsel %vm188_vm5, %v800_v48, -inf }
 0x621   :  { %803 = vmax.xlane.f32.xlu0 %v802_v52 }
 0x622   :  { %v666_v53 = vpop.f32.mrf.mxu0  ;;  %v744_v54 = vpop.f32.mrf.mxu1 }
 0x624   :  { %v1726_v55 = vpop.f32.mrf.mxu0  ;;  %v1732_v56 = vpop.f32.mrf.mxu1 }
 0x626   :  { %v794_v57 = vpop.f32.mrf.mxu0 }
 0x627   :  { %v801_v58 = vsel %vm2059_vm2, %v794_v57, -1e+30 }
 0x628   :  { %v1737_v59 = vpop.f32.mrf.mxu0  ;;  %v805_v60 = vsel %vm188_vm5, %v801_v58, -inf }
 0x629   :  { %806 = vmax.xlane.f32.xlu1 %v805_v60 }
 0x62a   :  { %v797_v61 = vpop.f32.mrf.mxu0 }
 0x62c   :  { %v1738_v62 = vpop.f32.mrf.mxu0 }
 0x637   :  { %834 = vrot.lane.b32.xlu0 %v2135_v2, %s1947_s25 }
 0x63a   :  { %1013 = vrot.lane.b32.xlu1 %v2186_v63, %s1948_s26 }
 0x63b   :  { %960 = vrot.lane.b32.xlu0 %v2188_v0, %s1948_s26 }
 0x63e   :  { %1011 = vrot.lane.b32.xlu1 %v2186_v63, %s1949_s27 }
 0x63f   :  { %958 = vrot.lane.b32.xlu0 %v2188_v0, %s1949_s27 }
 0x6aa   :  { %v804_v1 = vpop.xlane.xlu0 %803 }
 0x6ab   :  { %v808_v3 = vmax.f32 %v804_v1, -1e+30 }
 0x6ad   :  { %v816_v4 = vsub.f32 %v800_v48, %v808_v3  ;;  %v810_v25 = vsub.f32 -1e+30, %v808_v3 }
 0x6ae   :  { %v835_v5 = vpop.permute.xlu0 %834 }
 0x6af   :  { %v818_v6 = vmul.f32 1.442695, %v816_v4  ;;  %v840_v2 = vsel %vm328_vm6, %v835_v5, 0  ;;  %v812_v26 = vmul.f32 1.442695, %v810_v25  ;;  %v563_v4 = vsel %vm188_vm5, %v2142_v13, 0.0 }
 0x6b0   :  { %1740 = vmatpush3.bf16.msra.mxu1 %v840_v2  ;;  %v316_v25 = vsel %vm188_vm5, %v2100_v27, 0.0 }
 0x6b1   :  { %1751 = vmatprep.subr.bf16.mxu1 %v1937_v15  ;;  %1873 = vpow2.f32 %v818_v6  ;;  %v566_v6 = vsel %vm188_vm5, %v2151_v19, 0.0 }
 0x6b2   :  { %v807_v8 = vpop.xlane.xlu1 %806  ;;  %v961_v12 = vpop.permute.xlu0 %960 }
 0x6b3   :  { %v809_v7 = vmax.f32 %v807_v8, -1e+30  ;;  %v966_v16 = vsel %vm188_vm5, %v961_v12, 0 }
 0x6b5   :  { %v817_v9 = vsub.f32 %v801_v58, %v809_v7  ;;  %v811_v28 = vsub.f32 -1e+30, %v809_v7 }
 0x6b6   :  { %v1014_v18 = vpop.permute.xlu1 %1013  ;;  %v959_v21 = vpop.permute.xlu0 %958 }
 0x6b7   :  { %v820_v10 = vmul.f32 1.442695, %v817_v9  ;;  %v1019_v22 = vsel %vm188_vm5, %v1014_v18, 0  ;;  %v814_v29 = vmul.f32 1.442695, %v811_v28 }
 0x6b9   :  { %1875 = vpow2.f32 %v820_v10 }
 0x6ba   :  { %v1012_v24 = vpop.permute.xlu1 %1011  ;;  %1877 = vpow2.f32 %v812_v26 }
 0x6bb   :  { %1879 = vpow2.f32 %v814_v29 }
 0x6be   :  { %v1874_v11 = vpop.eup %1873 }
 0x6bf   :  { %v832_v14 = vpack.c.bf16 %v1874_v11, %v1874_v11  ;;  %v824_v5 = vsel %vm188_vm5, %v1874_v11, 0.0 }
 0x6c1   :  { %1742 = vmatmul.mubr.msk.bf16.vlgmr.msra.gmra.mxu1 %vm188_vm5, %v832_v14 }
 0x6c2   :  { %1752 = vmatpush3.bf16.xpose.msra.mxu1 %v966_v16  ;;  %1753 = vmatprep.mubr.msk.bf16.mxu1 %vm1938_vm1, %v1937_v15 }
 0x6c3   :  { %1763 = vmatprep.subr.bf16.mxu1 %v1937_v15 }
 0x6c6   :  { %v1876_v17 = vpop.eup %1875 }
 0x6c7   :  { %v833_v20 = vpack.c.bf16 %v1876_v17, %v1876_v17  ;;  %v1878_v30 = vpop.eup %1877  ;;  %v827_v37 = vsel %vm188_vm5, %v1876_v17, 0.0 }
 0x6c8   :  { %v2212_v31 = vmul.f32 0.0, %v1878_v30  ;;  %v1880_v38 = vpop.eup %1879 }
 0x6c9   :  { %1748 = vmatmul.mubr.msk.bf16.vlgmr.msra.gmra.mxu0 %vm188_vm5, %v833_v20  ;;  %1754 = vmatmul.mubr.msk.bf16.vlgmr.msra.gmra.mxu1 %vm188_vm5, %v959_v21  ;;  %v2217_v44 = vmul.f32 0.0, %v1880_v38  ;;  %v313_v20 = vsel %vm188_vm5, %v2091_v23, 0.0 }
 0x6ca   :  { %1758 = vmatpush3.bf16.xpose.msra.mxu0 %v1019_v22  ;;  %1759 = vmatprep.mubr.msk.bf16.mxu0 %vm1938_vm1, %v1937_v15 }
 0x6cb   :  { %1769 = vmatprep.subr.bf16.mxu0 %v1937_v15  ;;  %1765 = vmatprep.mubr.msk.bf16.mxu1 %vm1938_vm1, %v1937_v15 }
 0x6d1   :  { %1760 = vmatmul.mubr.msk.bf16.vlgmr.msra.gmra.mxu0 %vm188_vm5, %v1012_v24 }
 0x6d2   :  { %1771 = vmatprep.mubr.msk.bf16.mxu0 %vm1938_vm1, %v1937_v15 }
 0x781   :  { %v876_v32 = vpop.f32.mrf.mxu1 }
 0x782   :  { %v2215_v34 = vadd.f32 %v876_v32, %v2212_v31 }
 0x783   :  { %v1743_v36 = vpop.f32.mrf.mxu1 }
 0x785   :  { %v879_v39 = vpop.f32.mrf.mxu1 }
 0x787   :  { %v1744_v41 = vpop.f32.mrf.mxu1 }
 0x789   :  { %v924_v45 = vpop.f32.mrf.mxu0  ;;  %v1002_v48 = vpop.f32.mrf.mxu1 }
 0x78a   :  { %v2220_v49 = vadd.f32 %v924_v45, %v2217_v44  ;;  %v1061_v51 = vsel %vm2059_vm2, %v1002_v48, -1e+30 }
 0x78b   :  { %v1749_v52 = vpop.f32.mrf.mxu0  ;;  %v1755_v53 = vpop.f32.mrf.mxu1  ;;  %v1063_v54 = vsel %vm188_vm5, %v1061_v51, -inf }
 0x78c   :  { %1064 = vmax.xlane.f32.xlu0 %v1063_v54 }
 0x78d   :  { %v927_v55 = vpop.f32.mrf.mxu0  ;;  %v1005_v56 = vpop.f32.mrf.mxu1 }
 0x78f   :  { %v1750_v57 = vpop.f32.mrf.mxu0  ;;  %v1756_v58 = vpop.f32.mrf.mxu1 }
 0x791   :  { %v1055_v59 = vpop.f32.mrf.mxu0 }
 0x792   :  { %v1062_v60 = vsel %vm2059_vm2, %v1055_v59, -1e+30 }
 0x793   :  { %v1761_v61 = vpop.f32.mrf.mxu0  ;;  %v1066_v62 = vsel %vm188_vm5, %v1062_v60, -inf }
 0x794   :  { %1067 = vmax.xlane.f32.xlu1 %v1066_v62 }
 0x795   :  { %v1058_v1 = vpop.f32.mrf.mxu0 }
 0x797   :  { %v1762_v3 = vpop.f32.mrf.mxu0 }
 0x7a2   :  { %1095 = vrot.lane.b32.xlu0 %v2188_v0, %s1950_s28 }
 0x7a5   :  { %1143 = vrot.lane.b32.xlu1 %v2186_v63, %s1950_s28 }
 0x7c1   :  { %564 = vadd.xlane.f32.xlu0 %v563_v4 }
 0x7c5   :  { %825 = vadd.xlane.f32.xlu0 %v824_v5 }
 0x7c9   :  { %828 = vadd.xlane.f32.xlu0 %v827_v37  ;;  %567 = vadd.xlane.f32.xlu1 %v566_v6 }
 0x815   :  { %v2236_v2 = vpop.xlane.xlu0 %1064 }
 0x816   :  { %v1069_v0 = vmax.f32 %v2236_v2, -1e+30 }
 0x818   :  { %v1077_v63 = vsub.f32 %v1061_v51, %v1069_v0 }
 0x819   :  { %v1096_v8 = vpop.permute.xlu0 %1095 }
 0x81a   :  { %v1079_v13 = vmul.f32 1.442695, %v1077_v63  ;;  %v1101_v7 = vsel %vm328_vm6, %v1096_v8, 0 }
 0x81b   :  { %1764 = vmatpush3.bf16.msra.mxu1 %v1101_v7 }
 0x81c   :  { %1775 = vmatprep.subr.bf16.mxu1 %v1937_v15  ;;  %1881 = vpow2.f32 %v1079_v13 }
 0x81d   :  { %v2243_v9 = vpop.xlane.xlu1 %1067 }
 0x81e   :  { %v1070_v19 = vmax.f32 %v2243_v9, -1e+30 }
 0x820   :  { %v1078_v10 = vsub.f32 %v1062_v60, %v1070_v19  ;;  %v1072_v60 = vsub.f32 -1e+30, %v1070_v19  ;;  %v1840_v19 = vld [vmem:[%s2376_s5 + $0x8] sm:$0xff]  }
 0x821   :  { %v1144_v11 = vpop.permute.xlu1 %1143 }
 0x822   :  { %v1081_v12 = vmul.f32 1.442695, %v1078_v10  ;;  %v1149_v14 = vsel %vm328_vm6, %v1144_v11, 0 }
 0x823   :  { %1770 = vmatpush3.bf16.msra.mxu0 %v1149_v14 }
 0x824   :  { %1783 = vmatprep.subr.bf16.mxu0 %v1937_v15  ;;  %1883 = vpow2.f32 %v1081_v12  ;;  %v1841_v12 = vld [vmem:[%s2376_s5] sm:$0xff]  }
 0x829   :  { %v1882_v16 = vpop.eup %1881 }
 0x82a   :  { %v1085_v17 = vsel %vm188_vm5, %v1882_v16, 0.0  ;;  %v1093_v18 = vpack.c.bf16 %v1882_v16, %v1882_v16 }
 0x82b   :  { %1086 = vadd.xlane.f32.xlu0 %v1085_v17 }
 0x82c   :  { %1766 = vmatmul.mubr.msk.bf16.vlgmr.msra.gmra.mxu1 %vm188_vm5, %v1093_v18 }
 0x82d   :  { %1779 = vmatprep.mubr.msk.bf16.mxu1 %vm1938_vm1, %v1937_v15  ;;  %1776 = vmatpush3.bf16.msra.mxu1 %v1840_v19  ;;  %v1849_v19 = vld [vmem:[%s2382_s11 + $0x18] sm:$0xff]  }
 0x82e   :  { %1777 = vmatprep.subr.bf16.mxu1 %v1937_v15 }
 0x82f   :  { %314 = vadd.xlane.f32.xlu0 %v313_v20 }
 0x831   :  { %v1884_v21 = vpop.eup %1883  ;;  %1778 = vmatpush3.bf16.msra.mxu1 %v1841_v12  ;;  %v1852_v12 = vld [vmem:[%s2382_s11] sm:$0xff]  }
 0x832   :  { %v1088_v22 = vsel %vm188_vm5, %v1884_v21, 0.0  ;;  %v1094_v24 = vpack.c.bf16 %v1884_v21, %v1884_v21  ;;  %1791 = vmatprep.subr.bf16.mxu1 %v1937_v15 }
 0x833   :  { %1089 = vadd.xlane.f32.xlu1 %v1088_v22 }
 0x834   :  { %1772 = vmatmul.mubr.msk.bf16.vlgmr.msra.gmra.mxu0 %vm188_vm5, %v1094_v24 }
 0x835   :  { %1787 = vmatprep.mubr.msk.bf16.mxu0 %vm1938_vm1, %v1937_v15 }
 0x837   :  { %317 = vadd.xlane.f32.xlu1 %v316_v25 }
 0x84a   :  { %v565_v26 = vpop.xlane.xlu0 %564 }
 0x84b   :  { %v569_v28 = vadd.f32 %v565_v26, %v2168_v33 }
 0x84d   :  { %1885 = vrcp.f32 %v569_v28 }
 0x84e   :  { %v826_v23 = vpop.xlane.xlu0 %825 }
 0x84f   :  { %v830_v29 = vadd.f32 %v826_v23, %v2212_v31 }
 0x851   :  { %1887 = vrcp.f32 %v830_v29 }
 0x852   :  { %v829_v30 = vpop.xlane.xlu0 %828  ;;  %v568_v32 = vpop.xlane.xlu1 %567 }
 0x853   :  { %v831_v36 = vadd.f32 %v829_v30, %v2217_v44  ;;  %v570_v38 = vadd.f32 %v568_v32, %v2173_v43  ;;  %v1593_v30 = vld [vmem:[%s2377_s6] ss:$0 sm:$0xff] }
 0x855   :  { %1889 = vrcp.f32 %v831_v36 }
 0x856   :  { %1891 = vrcp.f32 %v570_v38 }
 0x85a   :  { %v1886_v39 = vpop.eup %1885 }
 0x85b   :  { %v673_v27 = vmul.f32 %v1886_v39, %v2171_v35  ;;  %v1913_v39 = vld [vmem:[%s2371_s0] sm:$0xff] }
 0x85d   :  { %v1615_v41 = vpack.c.bf16 %v673_v27, %v673_v27 }
 0x85e   :  { %v1888_v45 = vpop.eup %1887 }
 0x85f   :  { %683 = vrot.lane.b32.xlu0 %v1615_v41, %s1951_s29  ;;  %v934_v33 = vmul.f32 %v1888_v45, %v2215_v34 }
 0x861   :  { %v1617_v43 = vpack.c.bf16 %v934_v33, %v934_v33 }
 0x862   :  { %v1890_v31 = vpop.eup %1889 }
 0x863   :  { %v1892_v48 = vpop.eup %1891  ;;  %v935_v51 = vmul.f32 %v1890_v31, %v2220_v49 }
 0x864   :  { %v674_v44 = vmul.f32 %v1892_v48, %v2176_v46  ;;  %v1071_v46 = vsub.f32 -1e+30, %v1069_v0  ;;  %v1914_v48 = vld [vmem:[%s2371_s0 + $0x8] sm:$0xff]  ;;  %s1954_s0 = smov [#allocation4]  }
 0x865   :  { %v1618_v35 = vpack.c.bf16 %v935_v51, %v935_v51  ;;  %s1544_s6 = sshll.u32 %s1954_s0, 4  ;;  %s1545_s6 = int_to_ptr.vmem [resolvable:$true] %s1544_s6 }
 0x866   :  { %v1616_v52 = vpack.c.bf16 %v674_v44, %v674_v44  ;;  %v1073_v49 = vmul.f32 1.442695, %v1071_v46  ;;  %s1915_s20 = scalar_lea.vmem %s1545_s6, 256  ;;  %p1920_p1 = scmp.lt.s32.totalorder %s1545_s6, %s1545_s6 }
 0x867   :  { %p1916_p0 = scmp.ne.s32.totalorder %s1545_s6, %s1915_s20  ;;  %p1921_p2 = scmp.lt.s32.totalorder %s1915_s20, %s1915_s20 }
 0x868   :  { %685 = vrot.lane.b32.xlu1 %v1616_v52, %s1951_s29 }
 0x869   :  { %p1922_p3 = por %p1921_p2, %p1920_p1 }
 0x86b   :  { %p1923_p4 = pnand %p1922_p3, %p1916_p0 }
 0x86c   :  { %944 = vrot.lane.b32.xlu1 %v1617_v43, %s1952_s30 }
 0x870   :  { %946 = vrot.lane.b32.xlu1 %v1618_v35, %s1952_s30 }
 0x8b4   :  { %v1087_v53 = vpop.xlane.xlu0 %1086 }
 0x8b8   :  { %v315_v54 = vpop.xlane.xlu0 %314 }
 0x8b9   :  { %v319_v55 = vadd.f32 %v315_v54, %v2117_v40  ;;  %v1075_v40 = vmul.f32 1.442695, %v1072_v60 }
 0x8bb   :  { %1893 = vrcp.f32 %v319_v55 }
 0x8bc   :  { %v1090_v34 = vpop.xlane.xlu1 %1089 }
 0x8c0   :  { %v318_v56 = vpop.xlane.xlu1 %317 }
 0x8c1   :  { %v320_v57 = vadd.f32 %v318_v56, %v2122_v47 }
 0x8c3   :  { %1895 = vrcp.f32 %v320_v57 }
 0x8c4   :  { %1897 = vpow2.f32 %v1073_v49  ;;  %v1843_v49 = vld [vmem:[%s2380_s9 + $0x8] sm:$0xff]  }
 0x8c5   :  { %1899 = vpow2.f32 %v1075_v40  ;;  %1784 = vmatpush3.bf16.msra.mxu0 %v1843_v49 }
 0x8c6   :  { %1785 = vmatprep.subr.bf16.mxu0 %v1937_v15 }
 0x8c8   :  { %v1894_v58 = vpop.eup %1893 }
 0x8c9   :  { %v424_v59 = vmul.f32 %v1894_v58, %v2120_v42  ;;  %v1844_v58 = vld [vmem:[%s2380_s9] sm:$0xff]  }
 0x8ca   :  { %1786 = vmatpush3.bf16.msra.mxu0 %v1844_v58 }
 0x8cb   :  { %v426_v61 = vpack.c.bf16 %v424_v59, %v424_v59 }
 0x8cd   :  { %429 = vst.msk [vmem:[#allocation3] sm:$0xf] %vm428_vm7, %v426_v61 }
 0x8d0   :  { %v1896_v62 = vpop.eup %1895 }
 0x8d1   :  { %v684_v1 = vpop.permute.xlu0 %683  ;;  %v425_v47 = vmul.f32 %v1896_v62, %v2125_v50  ;;  %v1898_v4 = vpop.eup %1897 }
 0x8d2   :  { %690 = vst.msk [vmem:[#allocation3] sm:$0xf] %vm689_vm8, %v684_v1  ;;  %v1083_v42 = vmul.f32 0.0, %v1898_v4  ;;  %v1900_v2 = vpop.eup %1899  ;;  %v1598_v4 = vld [vmem:[%s2378_s7] ss:$0 sm:$0xff] }
 0x8d3   :  { %v427_v3 = vpack.c.bf16 %v425_v47, %v425_v47  ;;  %v1084_v63 = vmul.f32 0.0, %v1900_v2 }
 0x8d4   :  { %v1091_v37 = vadd.f32 %v1087_v53, %v1083_v42 }
 0x8d5   :  { %430 = vst.msk [vmem:[#allocation3 + $0x4] sm:$0xf] %vm428_vm7, %v427_v3  ;;  %v1092_v8 = vadd.f32 %v1090_v34, %v1084_v63 }
 0x8d6   :  { %1901 = vrcp.f32 %v1091_v37 }
 0x8d7   :  { %1903 = vrcp.f32 %v1092_v8 }
 0x8da   :  { %v686_v5 = vpop.permute.xlu1 %685 }
 0x8db   :  { %691 = vst.msk [vmem:[#allocation3 + $0x4] sm:$0xf] %vm689_vm8, %v686_v5 }
 0x8de   :  { %v945_v6 = vpop.permute.xlu1 %944 }
 0x8df   :  { %951 = vst.msk [vmem:[#allocation3] sm:$0xf] %vm950_vm9, %v945_v6  ;;  %v1599_v6 = vld [vmem:[%s2379_s8] ss:$0 sm:$0xff] }
 0x8e2   :  { %v947_v0 = vpop.permute.xlu1 %946 }
 0x8e3   :  { %952 = vst.msk [vmem:[#allocation3 + $0x4] sm:$0xf] %vm950_vm9, %v947_v0  ;;  %v1902_v7 = vpop.eup %1901 }
 0x8e4   :  { %v1904_v20 = vpop.eup %1903 }
 0x8ec   :  { %v1137_v13 = vpop.f32.mrf.mxu1 }
 0x8ed   :  { %v1191_v50 = vadd.f32 %v1137_v13, %v1083_v42  ;;  %v1845_v13 = vld [vmem:[%s2382_s11 + $0x38] sm:$0xff]  }
 0x8ee   :  { %v1767_v9 = vpop.f32.mrf.mxu1 }
 0x8ef   :  { %v1195_v10 = vmul.f32 %v1902_v7, %v1191_v50  ;;  %v1846_v50 = vld [vmem:[%s2382_s11 + $0x30] sm:$0xff]   ;;  %v1847_v7 = vld [vmem:[%s2382_s11 + $0x28] sm:$0xff]   ;;  %v1848_v9 = vld [vmem:[%s2382_s11 + $0x20] sm:$0xff]  }
 0x8f0   :  { %v1140_v11 = vpop.f32.mrf.mxu1 }
 0x8f1   :  { %v1619_v14 = vpack.c.bf16 %v1195_v10, %v1195_v10  ;;  %v1850_v10 = vld [vmem:[%s2382_s11 + $0x10] sm:$0xff]   ;;  %v1851_v11 = vld [vmem:[%s2382_s11 + $0x8] sm:$0xff]  }
 0x8f2   :  { %v1768_v16 = vpop.f32.mrf.mxu1 }
 0x8f3   :  { %1205 = vrot.lane.b32.xlu0 %v1619_v14, %s1953_s17  ;;  %v1601_v14 = vld [vmem:[%s2381_s10] ss:$0 sm:$0xff] }
 0x8f4   :  { %v1185_v17 = vpop.f32.mrf.mxu0 }
 0x8f5   :  { %v1192_v18 = vadd.f32 %v1185_v17, %v1084_v63 }
 0x8f6   :  { %v1773_v21 = vpop.f32.mrf.mxu0 }
 0x8f7   :  { %v1196_v22 = vmul.f32 %v1904_v20, %v1192_v18 }
 0x8f8   :  { %v1188_v24 = vpop.f32.mrf.mxu0 }
 0x8f9   :  { %v1620_v25 = vpack.c.bf16 %v1196_v22, %v1196_v22 }
 0x8fa   :  { %v1774_v26 = vpop.f32.mrf.mxu0 }
 0x8fb   :  { %1207 = vrot.lane.b32.xlu1 %v1620_v25, %s1953_s17 }
 0x965   :  { %v1206_v28 = vpop.permute.xlu0 %1205 }
 0x966   :  { %1212 = vst.msk [vmem:[#allocation3] sm:$0xf] %vm1211_vm10, %v1206_v28 }
 0x96d   :  { %v1208_v23 = vpop.permute.xlu1 %1207 }
 0x96e   :  { %1213 = vst.msk [vmem:[#allocation3 + $0x4] sm:$0xf] %vm1211_vm10, %v1208_v23 }
 0x975   :  { %v1842_v29 = vld [vmem:[#allocation3] sm:$0xff]  }
 0x976   :  { %1780 = vmatmul.mubr.msk.bf16.vlgmr.msra.gmra.mxu1 %vm50_vm0, %v1842_v29 }
 0x977   :  { %1807 = vmatprep.mubr.msk.bf16.mxu1 %vm1938_vm1, %v1937_v15  ;;  %1792 = vmatpush3.bf16.msra.mxu1 %v1845_v13 }
 0x978   :  { %1793 = vmatprep.subr.bf16.mxu1 %v1937_v15 }
 0x97b   :  { %1794 = vmatpush3.bf16.msra.mxu1 %v1846_v50 }
 0x97c   :  { %1795 = vmatprep.subr.bf16.mxu1 %v1937_v15 }
 0x97f   :  { %1796 = vmatpush3.bf16.msra.mxu1 %v1847_v7 }
 0x980   :  { %1797 = vmatprep.subr.bf16.mxu1 %v1937_v15 }
 0x983   :  { %1798 = vmatpush3.bf16.msra.mxu1 %v1848_v9 }
 0x984   :  { %1799 = vmatprep.subr.bf16.mxu1 %v1937_v15 }
 0x987   :  { %1800 = vmatpush3.bf16.msra.mxu1 %v1849_v19 }
 0x988   :  { %1801 = vmatprep.subr.bf16.mxu1 %v1937_v15 }
 0x98b   :  { %1802 = vmatpush3.bf16.msra.mxu1 %v1850_v10 }
 0x98c   :  { %1803 = vmatprep.subr.bf16.mxu1 %v1937_v15 }
 0x98f   :  { %1804 = vmatpush3.bf16.msra.mxu1 %v1851_v11 }
 0x990   :  { %1805 = vmatprep.subr.bf16.mxu1 %v1937_v15 }
 0x993   :  { %1806 = vmatpush3.bf16.msra.mxu1 %v1852_v12 }
 0xa36   :  { %v1281_v32 = vpop.f32.mrf.mxu1 }
 0xa37   :  { %v1282_v36 = vadd.f32 %v1593_v30, %v1281_v32 }
 0xa38   :  { %v1781_v38 = vpop.f32.mrf.mxu1 }
 0xa39   :  { %v2297_v27 = vadd.f32 %v1913_v39, %v1282_v36 }
 0xa3a   :  { %v1284_v41 = vpop.f32.mrf.mxu1 }
 0xa3b   :  { %v1285_v45 = vadd.f32 %v1593_v30, %v1284_v41  ;;  %v1292_v33 = vsel %vm50_vm0, %v2297_v27, 0.0 }
 0xa3c   :  { %1293 = vadd.xlane.f32.xlu0 %v1292_v33  ;;  %v1782_v31 = vpop.f32.mrf.mxu1 }
 0xa3d   :  { %v2304_v51 = vadd.f32 %v1914_v48, %v1285_v45 }
 0xa3f   :  { %v1295_v44 = vsel %vm50_vm0, %v2304_v51, 0.0 }
 0xa40   :  { %1296 = vadd.xlane.f32.xlu1 %v1295_v44 }
 0xac5   :  { %v1294_v52 = vpop.xlane.xlu0 %1293 }
 0xac6   :  { %v1298_v43 = vmul.f32 0.03125, %v1294_v52 }
 0xac8   :  { %v1300_v35 = vsub.f32 %v2297_v27, %v1298_v43  ;;  %v1600_v43 = vld [vmem:[%s2383_s12] ss:$0 sm:$0xff] }
 0xac9   :  { %v1297_v53 = vpop.xlane.xlu1 %1296 }
 0xaca   :  { %v1299_v54 = vmul.f32 0.03125, %v1297_v53  ;;  %v1302_v55 = vmul.f32 %v1300_v35, %v1300_v35 }
 0xacc   :  { %v1301_v34 = vsub.f32 %v2304_v51, %v1299_v54  ;;  %v1304_v56 = vsel %vm50_vm0, %v1302_v55, 0.0 }
 0xacd   :  { %1305 = vadd.xlane.f32.xlu0 %v1304_v56 }
 0xace   :  { %v1303_v57 = vmul.f32 %v1301_v34, %v1301_v34 }
 0xad0   :  { %v1307_v46 = vsel %vm50_vm0, %v1303_v57, 0.0 }
 0xad1   :  { %1308 = vadd.xlane.f32.xlu0 %v1307_v46 }
 0xb56   :  { %v1306_v59 = vpop.xlane.xlu0 %1305 }
 0xb57   :  { %v1310_v60 = vmul.f32 0.03125, %v1306_v59 }
 0xb59   :  { %v1312_v61 = vadd.f32 1e-05, %v1310_v60 }
 0xb5a   :  { %v1309_v40 = vpop.xlane.xlu0 %1308 }
 0xb5b   :  { %1905 = vrsqrt.f32 %v1312_v61  ;;  %v1311_v62 = vmul.f32 0.03125, %v1309_v40 }
 0xb5d   :  { %v1313_v1 = vadd.f32 1e-05, %v1311_v62 }
 0xb5f   :  { %1907 = vrsqrt.f32 %v1313_v1 }
 0xb68   :  { %v1906_v47 = vpop.eup %1905 }
 0xb69   :  { %v1316_v3 = vmul.f32 %v1906_v47, %v1300_v35 }
 0xb6b   :  { %v1324_v37 = vmul.f32 %v1598_v4, %v1316_v3 }
 0xb6c   :  { %v1908_v5 = vpop.eup %1907 }
 0xb6d   :  { %v1317_v42 = vmul.f32 %v1908_v5, %v1301_v34  ;;  %v1332_v0 = vadd.f32 %v1599_v6, %v1324_v37 }
 0xb6f   :  { %v1325_v2 = vmul.f32 %v1598_v4, %v1317_v42 }
 0xb71   :  { %v1333_v63 = vadd.f32 %v1599_v6, %v1325_v2 }
 0xb73   :  { %v1334_v8 = vpack.c.bf16 %v1333_v63, %v1332_v0 }
 0xb75   :  { %1788 = vmatmul.mubr.msk.bf16.vlgmr.msra.gmra.mxu0 %vm50_vm0, %v1334_v8 }
 0xc35   :  { %v1402_v16 = vpop.f32.mrf.mxu0 }
 0xc36   :  { %v1403_v17 = vadd.f32 %v1601_v14, %v1402_v16 }
 0xc37   :  { %v1789_v18 = vpop.f32.mrf.mxu0 }
 0xc38   :  { %v1411_v20 = vmul.f32 0.044715, %v1403_v17  ;;  %v1409_v45 = vmul.f32 0.5, %v1403_v17 }
 0xc39   :  { %v1405_v21 = vpop.f32.mrf.mxu0 }
 0xc3a   :  { %v1413_v22 = vmul.f32 %v1411_v20, %v1403_v17  ;;  %v1406_v24 = vadd.f32 %v1601_v14, %v1405_v21 }
 0xc3b   :  { %v1790_v25 = vpop.f32.mrf.mxu0 }
 0xc3c   :  { %v1415_v26 = vmul.f32 %v1413_v22, %v1403_v17  ;;  %v1412_v28 = vmul.f32 0.044715, %v1406_v24  ;;  %v1410_v33 = vmul.f32 0.5, %v1406_v24 }
 0xc3e   :  { %v1417_v23 = vadd.f32 %v1415_v26, %v1403_v17  ;;  %v1414_v29 = vmul.f32 %v1412_v28, %v1406_v24 }
 0xc40   :  { %v1419_v30 = vmul.f32 0.7978846, %v1417_v23  ;;  %v1416_v32 = vmul.f32 %v1414_v29, %v1406_v24 }
 0xc42   :  { %1909 = vtanh.f32 %v1419_v30  ;;  %v1418_v15 = vadd.f32 %v1416_v32, %v1406_v24 }
 0xc44   :  { %v1420_v36 = vmul.f32 0.7978846, %v1418_v15 }
 0xc46   :  { %1911 = vtanh.f32 %v1420_v36 }
 0xc4f   :  { %v1910_v38 = vpop.eup %1909 }
 0xc50   :  { %v1423_v39 = vadd.f32 1.0, %v1910_v38 }
 0xc52   :  { %v1425_v48 = vmul.f32 %v1423_v39, %v1409_v45 }
 0xc53   :  { %v1912_v41 = vpop.eup %1911 }
 0xc54   :  { %v1424_v31 = vadd.f32 1.0, %v1912_v41 }
 0xc56   :  { %v1426_v44 = vmul.f32 %v1424_v31, %v1410_v33 }
 0xc58   :  { %v1427_v52 = vpack.c.bf16 %v1426_v44, %v1425_v48 }
 0xc5a   :  { %1808 = vmatmul.mubr.bf16.vlgmr.msra.gmra.mxu1 %v1427_v52 }
 0xd1a   :  { %v1526_v35 = vpop.f32.mrf.mxu1 }
 0xd1b   :  { %v1533_v53 = vadd.f32 %v1600_v43, %v1526_v35 }
 0xd1c   :  { %v1809_v54 = vpop.f32.mrf.mxu1 }
 0xd1d   :  { %v1535_v55 = vadd.f32 %v1533_v53, %v2297_v27 }
 0xd1e   :  { %v1529_v34 = vpop.f32.mrf.mxu1 }
 0xd1f   :  { %1537 = vst.msk [vmem:[#allocation4] sm:$0xff] %vm50_vm0, %v1535_v55  ;;  %v1534_v56 = vadd.f32 %v1600_v43, %v1529_v34 }
 0xd20   :  { %v1810_v57 = vpop.f32.mrf.mxu1 }
 0xd21   :  { %v1536_v46 = vadd.f32 %v1534_v56, %v2304_v51 }
 0xd23   :  { %1538 = vst.msk [vmem:[#allocation4 + $0x8] sm:$0xff] %vm50_vm0, %v1536_v46 }
 0xd24   :  { %1926 = shalt.err (!%p1923_p4)
}
 0xd25   :  { %s1955_s12 = smov 128  }
 0xd26   :  { %1550 = dma.vmem_to_hbm [thread:$0]  %s1545_s6, 256, %s2384_s13, [#allocation5], %s1955_s12, %s1955_s12, %s1951_s29  }
 0xd27   :  { %1935 = dma.done.wait [#allocation5], 256  }
 0xd28   :  { %1936 = vsyncadd [#allocation5], 4294967040 }
 0xd29   :  { %1554 = vsyncpa [#allocation5], 1 }

// kernel: tpu_custom_call.1
= control target key start
LH: loop header
LB: loop body
LE: loop exit
PB: predicated region body
PF: predicated region fallthrough
CT: control target
= control target key end

     0   :  { %vm50_vm0 = vcmask 261120   ;;  %s2371_s0 = inlined_call_operand.vmem [shape: f32[2,8,32], index: 0, kind: input, shape index: {}]   ;;  %s2372_s1 = inlined_call_operand.vmem [shape: f32[1,32], index: 1, kind: input, shape index: {}]   ;;  %s2373_s2 = inlined_call_operand.vmem [shape: f32[1,32], index: 2, kind: input, shape index: {}]   ;;  %s2374_s3 = inlined_call_operand.vmem [shape: bf16[32,96], index: 3, kind: input, shape index: {}]   ;;  %s2375_s4 = inlined_call_operand.vmem [shape: f32[1,96], index: 4, kind: input, shape index: {}]   ;;  %s2376_s5 = inlined_call_operand.vmem [shape: bf16[32,32], index: 5, kind: input, shape index: {}]   ;;  %s2377_s6 = inlined_call_operand.vmem [shape: f32[1,32], index: 6, kind: input, shape index: {}]   ;;  %s2378_s7 = inlined_call_operand.vmem [shape: f32[1,32], index: 7, kind: input, shape index: {}]   ;;  %s2379_s8 = inlined_call_operand.vmem [shape: f32[1,32], index: 8, kind: input, shape index: {}]   ;;  %s2380_s9 = inlined_call_operand.vmem [shape: bf16[32,128], index: 9, kind: input, shape index: {}]   ;;  %s2381_s10 = inlined_call_operand.vmem [shape: f32[1,128], index: 10, kind: input, shape index: {}]   ;;  %s2382_s11 = inlined_call_operand.vmem [shape: bf16[128,32], index: 11, kind: input, shape index: {}]   ;;  %s2383_s12 = inlined_call_operand.vmem [shape: f32[1,32], index: 12, kind: input, shape index: {}]   ;;  %s2384_s13 = inlined_call_operand.hbm [shape: f32[2,8,32], index: 13, kind: output, shape index: {}]  }
   0x1   :  { %v46_v0 = vld [vmem:[%s2371_s0] sm:$0xff]  ;;  %v47_v1 = vld [vmem:[%s2371_s0 + $0x8] sm:$0xff] }
   0x2   :  { %v51_v2 = vsel %vm50_vm0, %v46_v0, 0.0  ;;  %v54_v3 = vsel %vm50_vm0, %v47_v1, 0.0 }
   0x3   :  { %52 = vadd.xlane.f32.xlu0 %v51_v2 }
   0x7   :  { %55 = vadd.xlane.f32.xlu0 %v54_v3 }
   0x8   :  { %18 = vsyncpa [#allocation5], 0  ;;  %v1830_v14 = vld [vmem:[%s2374_s3 + $0x8] sm:$0xff]   ;;  %v1937_v15 = vmov 0.0   ;;  %vm1938_vm1 = vmmov 0   ;;  %v1831_v16 = vld [vmem:[%s2374_s3] sm:$0xff]   ;;  %v162_v34 = vlaneseq }
   0x9   :  { %1671 = vmatprep.subr.bf16.mxu0 %v1937_v15  ;;  %1675 = vmatprep.mubr.msk.bf16.mxu0 %vm1938_vm1, %v1937_v15  ;;  %v1555_v25 = vld [vmem:[%s2372_s1] ss:$0 sm:$0xff]  ;;  %v1939_v40 = vmov 1.0   ;;  %vm176_vm4 = vcmask 781312   ;;  %vm188_vm5 = vcmask 64512   ;;  %s1942_s20 = smov 88  }
   0xa   :  { %1672 = vmatpush3.bf16.msra.mxu0 %v1830_v14  ;;  %1691 = vmatprep.subr.bf16.mxu1 %v1937_v15  ;;  %v1556_v29 = vld [vmem:[%s2373_s2] ss:$0 sm:$0xff]  ;;  %v163_v35 = vand.u32 127, %v162_v34  ;;  %v180_v36 = vshrl.u32 %v162_v34, 7  ;;  %s1940_s2 = smov 96   ;;  %s1943_s21 = smov 120  }
   0xb   :  { %1673 = vmatprep.subr.bf16.mxu0 %v1937_v15  ;;  %1693 = vmatprep.mubr.msk.bf16.mxu1 %vm1938_vm1, %v1937_v15  ;;  %v1557_v38 = vld [vmem:[%s2375_s4] ss:$0 sm:$0xff]  ;;  %s1941_s4 = smov 64   ;;  %s1944_s22 = smov 56   ;;  %vm328_vm6 = vcmask 1043456   ;;  %vm428_vm7 = vcmask 60416  }
   0xc   :  { %vm2059_vm2 = vcmp.le.s32.totalorder %v163_v35, %v180_v36  ;;  %vm164_vm3 = vcmp.lt.s32.totalorder %v163_v35, 32  ;;  %s1945_s23 = smov 80   ;;  %s1946_s24 = smov 112   ;;  %vm689_vm8 = vcmask 126016   ;;  %vm950_vm9 = vcmask 191616  }
   0xd   :  { %v165_v41 = vsel %vm164_vm3, 0.35355338, %v1939_v40  ;;  %s1947_s25 = smov 48   ;;  %s1948_s26 = smov 72   ;;  %vm1211_vm10 = vcmask 257216  }
   0xe   :  { %1674 = vmatpush3.bf16.msra.mxu0 %v1831_v16  ;;  %s1949_s27 = smov 104   ;;  %s1950_s28 = smov 40  }
   0xf   :  { %1679 = vmatprep.subr.bf16.mxu0 %v1937_v15  ;;  %s1951_s29 = smov 8   ;;  %s1952_s30 = smov 16  }
  0x10   :  { %s1953_s17 = smov 24  }
  0x8c   :  { %v53_v4 = vpop.xlane.xlu0 %52 }
  0x8d   :  { %v58_v5 = vmul.f32 0.03125, %v53_v4 }
  0x8f   :  { %v60_v6 = vsub.f32 %v46_v0, %v58_v5 }
  0x90   :  { %v56_v7 = vpop.xlane.xlu0 %55 }
  0x91   :  { %v59_v8 = vmul.f32 0.03125, %v56_v7  ;;  %v62_v9 = vmul.f32 %v60_v6, %v60_v6 }
  0x93   :  { %v61_v10 = vsub.f32 %v47_v1, %v59_v8  ;;  %v64_v11 = vsel %vm50_vm0, %v62_v9, 0.0 }
  0x94   :  { %65 = vadd.xlane.f32.xlu1 %v64_v11 }
  0x95   :  { %v63_v12 = vmul.f32 %v61_v10, %v61_v10 }
  0x97   :  { %v67_v13 = vsel %vm50_vm0, %v63_v12, 0.0 }
  0x98   :  { %68 = vadd.xlane.f32.xlu1 %v67_v13 }
 0x11d   :  { %v66_v17 = vpop.xlane.xlu1 %65 }
 0x11e   :  { %v70_v18 = vmul.f32 0.03125, %v66_v17 }
 0x120   :  { %v72_v19 = vadd.f32 1e-05, %v70_v18 }
 0x121   :  { %v69_v20 = vpop.xlane.xlu1 %68 }
 0x122   :  { %1853 = vrsqrt.f32 %v72_v19  ;;  %v71_v21 = vmul.f32 0.03125, %v69_v20 }
 0x124   :  { %v73_v22 = vadd.f32 1e-05, %v71_v21 }
 0x126   :  { %1855 = vrsqrt.f32 %v73_v22 }
 0x12f   :  { %v1854_v23 = vpop.eup %1853 }
 0x130   :  { %v76_v24 = vmul.f32 %v1854_v23, %v60_v6 }
 0x132   :  { %v84_v28 = vmul.f32 %v1555_v25, %v76_v24 }
 0x133   :  { %v1856_v26 = vpop.eup %1855 }
 0x134   :  { %v77_v27 = vmul.f32 %v1856_v26, %v61_v10  ;;  %v92_v31 = vadd.f32 %v1556_v29, %v84_v28 }
 0x136   :  { %v85_v30 = vmul.f32 %v1555_v25, %v77_v27 }
 0x138   :  { %v93_v32 = vadd.f32 %v1556_v29, %v85_v30 }
 0x13a   :  { %v94_v33 = vpack.c.bf16 %v93_v32, %v92_v31 }
 0x13c   :  { %1676 = vmatmul.mubr.msk.bf16.vlgmr.msra.gmra.mxu0 %vm50_vm0, %v94_v33 }
 0x13d   :  { %1681 = vmatprep.mubr.msk.bf16.mxu0 %vm1938_vm1, %v1937_v15 }
 0x1fc   :  { %v155_v39 = vpop.f32.mrf.mxu0 }
 0x1fd   :  { %v156_v42 = vadd.f32 %v1557_v38, %v155_v39 }
 0x1fe   :  { %v1677_v43 = vpop.f32.mrf.mxu0 }
 0x1ff   :  { %v166_v44 = vmul.f32 %v165_v41, %v156_v42 }
 0x200   :  { %v158_v45 = vpop.f32.mrf.mxu0 }
 0x201   :  { %v1613_v46 = vpack.c.bf16 %v166_v44, %v166_v44  ;;  %v159_v47 = vadd.f32 %v1557_v38, %v158_v45 }
 0x202   :  { %v1678_v48 = vpop.f32.mrf.mxu0 }
 0x203   :  { %177 = vst.msk [vmem:[#allocation2] sm:$0xf] %vm176_vm4, %v1613_v46  ;;  %v167_v49 = vmul.f32 %v165_v41, %v159_v47 }
 0x205   :  { %v1614_v50 = vpack.c.bf16 %v167_v49, %v167_v49 }
 0x207   :  { %178 = vst.msk [vmem:[#allocation2 + $0x4] sm:$0xf] %vm176_vm4, %v1614_v50 }
 0x20a   :  { %v181_v51 = vld [vmem:[#allocation2] sm:$0xf] }
 0x20b   :  { %v1563_v52 = vcombine.low %v181_v51, %v181_v51  ;;  %v2082_v7 = vld [vmem:[#allocation2] ss:$0 sps:$4 sm:$0xff]  }
 0x20d   :  { %186 = vrot.lane.b32.xlu0 %v1563_v52, %s1940_s2 }
 0x20e   :  { %v182_v53 = vld [vmem:[#allocation2 + $0x4] sm:$0xf] }
 0x20f   :  { %v1565_v54 = vcombine.low %v182_v53, %v182_v53  ;;  %v1835_v8 = vld [vmem:[#allocation2 + $0x4] ss:$0 sps:$4 sm:$0xff]  }
 0x211   :  { %238 = vrot.lane.b32.xlu1 %v1565_v54, %s1940_s2 }
 0x27f   :  { %v187_v55 = vpop.permute.xlu0 %186 }
 0x280   :  { %v193_v56 = vsel %vm188_vm5, %v187_v55, 0 }
 0x281   :  { %1680 = vmatpush3.bf16.xpose.msra.mxu0 %v193_v56 }
 0x282   :  { %1685 = vmatprep.subr.bf16.mxu0 %v1937_v15 }
 0x283   :  { %v239_v57 = vpop.permute.xlu1 %238 }
 0x284   :  { %v244_v58 = vsel %vm188_vm5, %v239_v57, 0 }
 0x288   :  { %1682 = vmatmul.mubr.msk.bf16.vlgmr.msra.gmra.mxu0 %vm188_vm5, %v181_v51 }
 0x289   :  { %1686 = vmatpush3.bf16.xpose.msra.mxu0 %v244_v58  ;;  %1687 = vmatprep.mubr.msk.bf16.mxu0 %vm1938_vm1, %v1937_v15 }
 0x28a   :  { %1697 = vmatprep.subr.bf16.mxu0 %v1937_v15 }
 0x290   :  { %1688 = vmatmul.mubr.msk.bf16.vlgmr.msra.gmra.mxu0 %vm188_vm5, %v182_v53 }
 0x291   :  { %1699 = vmatprep.mubr.msk.bf16.mxu0 %vm1938_vm1, %v1937_v15 }
 0x348   :  { %v229_v59 = vpop.f32.mrf.mxu0 }
 0x349   :  { %v289_v60 = vsel %vm2059_vm2, %v229_v59, -1e+30 }
 0x34a   :  { %v1683_v61 = vpop.f32.mrf.mxu0  ;;  %v291_v62 = vsel %vm188_vm5, %v289_v60, -inf }
 0x34b   :  { %292 = vmax.xlane.f32.xlu1 %v291_v62 }
 0x34c   :  { %v232_v63 = vpop.f32.mrf.mxu0 }
 0x34e   :  { %v1684_v0 = vpop.f32.mrf.mxu0 }
 0x350   :  { %v280_v1 = vpop.f32.mrf.mxu0 }
 0x351   :  { %v290_v2 = vsel %vm2059_vm2, %v280_v1, -1e+30  ;;  %v1836_v1 = vld [vmem:[#allocation2 + $0x4] ss:$0 sps:$4 sm:$0xff]  }
 0x352   :  { %v1689_v3 = vpop.f32.mrf.mxu0  ;;  %v294_v4 = vsel %vm188_vm5, %v290_v2, -inf }
 0x353   :  { %295 = vmax.xlane.f32.xlu0 %v294_v4 }
 0x354   :  { %v283_v5 = vpop.f32.mrf.mxu0 }
 0x356   :  { %v1690_v6 = vpop.f32.mrf.mxu0 }
 0x35c   :  { %372 = vrot.lane.b32.xlu1 %v1565_v54, %s1941_s4 }
 0x360   :  { %438 = vrot.lane.b32.xlu1 %v2082_v7, %s1942_s20 }
 0x364   :  { %491 = vrot.lane.b32.xlu1 %v1835_v8, %s1942_s20 }
 0x368   :  { %489 = vrot.lane.b32.xlu1 %v1835_v8, %s1943_s21 }
 0x369   :  { %323 = vrot.lane.b32.xlu0 %v1563_v52, %s1941_s4 }
 0x36c   :  { %621 = vrot.lane.b32.xlu1 %v1835_v8, %s1944_s22 }
 0x36d   :  { %436 = vrot.lane.b32.xlu0 %v2082_v7, %s1943_s21 }
 0x3d4   :  { %v293_v9 = vpop.xlane.xlu1 %292 }
 0x3d5   :  { %v297_v10 = vmax.f32 %v293_v9, -1e+30 }
 0x3d7   :  { %v305_v11 = vsub.f32 %v289_v60, %v297_v10  ;;  %v299_v34 = vsub.f32 -1e+30, %v297_v10 }
 0x3d8   :  { %v373_v12 = vpop.permute.xlu1 %372 }
 0x3d9   :  { %v307_v13 = vmul.f32 1.442695, %v305_v11  ;;  %v378_v14 = vsel %vm328_vm6, %v373_v12, 0  ;;  %v301_v35 = vmul.f32 1.442695, %v299_v34 }
 0x3da   :  { %1698 = vmatpush3.bf16.msra.mxu0 %v378_v14 }
 0x3db   :  { %1709 = vmatprep.subr.bf16.mxu0 %v1937_v15  ;;  %1857 = vpow2.f32 %v307_v13 }
 0x3dc   :  { %v296_v16 = vpop.xlane.xlu0 %295  ;;  %v439_v22 = vpop.permute.xlu1 %438 }
 0x3dd   :  { %v298_v17 = vmax.f32 %v296_v16, -1e+30  ;;  %v444_v25 = vsel %vm188_vm5, %v439_v22, 0 }
 0x3df   :  { %v306_v18 = vsub.f32 %v290_v2, %v298_v17  ;;  %v300_v36 = vsub.f32 -1e+30, %v298_v17  ;;  %v2135_v2 = vld [vmem:[#allocation2] ss:$0 sps:$4 sm:$0xff]  }
 0x3e0   :  { %v324_v19 = vpop.permute.xlu0 %323  ;;  %v492_v26 = vpop.permute.xlu1 %491 }
 0x3e1   :  { %v309_v20 = vmul.f32 1.442695, %v306_v18  ;;  %v330_v21 = vsel %vm328_vm6, %v324_v19, 0  ;;  %v497_v31 = vsel %vm188_vm5, %v492_v26, 0  ;;  %v303_v38 = vmul.f32 1.442695, %v300_v36 }
 0x3e2   :  { %1692 = vmatpush3.bf16.msra.mxu1 %v330_v21 }
 0x3e3   :  { %1703 = vmatprep.subr.bf16.mxu1 %v1937_v15  ;;  %1859 = vpow2.f32 %v309_v20 }
 0x3e4   :  { %v490_v29 = vpop.permute.xlu1 %489  ;;  %v437_v30 = vpop.permute.xlu0 %436  ;;  %1861 = vpow2.f32 %v301_v35 }
 0x3e5   :  { %1863 = vpow2.f32 %v303_v38 }
 0x3e8   :  { %v2091_v23 = vpop.eup %1857  ;;  %v622_v32 = vpop.permute.xlu1 %621 }
 0x3e9   :  { %v321_v24 = vpack.c.bf16 %v2091_v23, %v2091_v23  ;;  %v627_v33 = vsel %vm328_vm6, %v622_v32, 0 }
 0x3eb   :  { %1694 = vmatmul.mubr.msk.bf16.vlgmr.msra.gmra.mxu1 %vm188_vm5, %v321_v24 }
 0x3ec   :  { %1704 = vmatpush3.bf16.xpose.msra.mxu1 %v444_v25  ;;  %1705 = vmatprep.mubr.msk.bf16.mxu1 %vm1938_vm1, %v1937_v15 }
 0x3ed   :  { %1715 = vmatprep.subr.bf16.mxu1 %v1937_v15 }
 0x3f0   :  { %v2100_v27 = vpop.eup %1859 }
 0x3f1   :  { %v322_v28 = vpack.c.bf16 %v2100_v27, %v2100_v27  ;;  %v1862_v39 = vpop.eup %1861 }
 0x3f2   :  { %v2117_v40 = vmul.f32 0.0, %v1862_v39  ;;  %v1864_v44 = vpop.eup %1863 }
 0x3f3   :  { %1700 = vmatmul.mubr.msk.bf16.vlgmr.msra.gmra.mxu0 %vm188_vm5, %v322_v28  ;;  %1706 = vmatmul.mubr.msk.bf16.vlgmr.msra.gmra.mxu1 %vm188_vm5, %v437_v30  ;;  %v2122_v47 = vmul.f32 0.0, %v1864_v44 }
 0x3f4   :  { %1710 = vmatpush3.bf16.xpose.msra.mxu0 %v497_v31  ;;  %1711 = vmatprep.mubr.msk.bf16.mxu0 %vm1938_vm1, %v1937_v15 }
 0x3f5   :  { %1721 = vmatprep.subr.bf16.mxu0 %v1937_v15  ;;  %1717 = vmatprep.mubr.msk.bf16.mxu1 %vm1938_vm1, %v1937_v15 }
 0x3fb   :  { %1712 = vmatmul.mubr.msk.bf16.vlgmr.msra.gmra.mxu0 %vm188_vm5, %v490_v29 }
 0x3fc   :  { %1722 = vmatpush3.bf16.msra.mxu0 %v627_v33  ;;  %1723 = vmatprep.mubr.msk.bf16.mxu0 %vm1938_vm1, %v1937_v15 }
 0x3fd   :  { %1733 = vmatprep.subr.bf16.mxu0 %v1937_v15 }
 0x4ab   :  { %v366_v41 = vpop.f32.mrf.mxu1 }
 0x4ac   :  { %v2120_v42 = vadd.f32 %v366_v41, %v2117_v40 }
 0x4ad   :  { %v1695_v43 = vpop.f32.mrf.mxu1 }
 0x4af   :  { %v369_v45 = vpop.f32.mrf.mxu1 }
 0x4b1   :  { %v1696_v46 = vpop.f32.mrf.mxu1 }
 0x4b3   :  { %v414_v48 = vpop.f32.mrf.mxu0  ;;  %v480_v49 = vpop.f32.mrf.mxu1 }
 0x4b4   :  { %v2125_v50 = vadd.f32 %v414_v48, %v2122_v47  ;;  %v539_v51 = vsel %vm2059_vm2, %v480_v49, -1e+30 }
 0x4b5   :  { %v1701_v52 = vpop.f32.mrf.mxu0  ;;  %v1707_v53 = vpop.f32.mrf.mxu1  ;;  %v541_v54 = vsel %vm188_vm5, %v539_v51, -inf }
 0x4b6   :  { %542 = vmax.xlane.f32.xlu0 %v541_v54 }
 0x4b7   :  { %v417_v55 = vpop.f32.mrf.mxu0  ;;  %v483_v56 = vpop.f32.mrf.mxu1 }
 0x4b9   :  { %v1702_v57 = vpop.f32.mrf.mxu0  ;;  %v1708_v58 = vpop.f32.mrf.mxu1 }
 0x4bb   :  { %v533_v59 = vpop.f32.mrf.mxu0 }
 0x4bc   :  { %v540_v60 = vsel %vm2059_vm2, %v533_v59, -1e+30 }
 0x4bd   :  { %v1713_v61 = vpop.f32.mrf.mxu0  ;;  %v544_v62 = vsel %vm188_vm5, %v540_v60, -inf }
 0x4be   :  { %545 = vmax.xlane.f32.xlu1 %v544_v62 }
 0x4bf   :  { %v536_v63 = vpop.f32.mrf.mxu0 }
 0x4c0   :  { %v2186_v63 = vld [vmem:[#allocation2 + $0x4] ss:$0 sps:$4 sm:$0xff]  }
 0x4c1   :  { %v1714_v0 = vpop.f32.mrf.mxu0 }
 0x4c2   :  { %v2188_v0 = vld [vmem:[#allocation2] ss:$0 sps:$4 sm:$0xff]  }
 0x4cc   :  { %573 = vrot.lane.b32.xlu0 %v2082_v7, %s1944_s22 }
 0x4cf   :  { %752 = vrot.lane.b32.xlu1 %v1836_v1, %s1945_s23 }
 0x4d0   :  { %699 = vrot.lane.b32.xlu0 %v2135_v2, %s1945_s23 }
 0x4d3   :  { %750 = vrot.lane.b32.xlu1 %v1836_v1, %s1946_s24 }
 0x4d4   :  { %697 = vrot.lane.b32.xlu0 %v2135_v2, %s1946_s24 }
 0x4d7   :  { %882 = vrot.lane.b32.xlu1 %v1836_v1, %s1947_s25 }
 0x53f   :  { %v543_v3 = vpop.xlane.xlu0 %542 }
 0x540   :  { %v547_v4 = vmax.f32 %v543_v3, -1e+30 }
 0x542   :  { %v555_v5 = vsub.f32 %v539_v51, %v547_v4  ;;  %v549_v28 = vsub.f32 -1e+30, %v547_v4 }
 0x543   :  { %v574_v6 = vpop.permute.xlu0 %573 }
 0x544   :  { %v557_v8 = vmul.f32 1.442695, %v555_v5  ;;  %v579_v7 = vsel %vm328_vm6, %v574_v6, 0  ;;  %v551_v29 = vmul.f32 1.442695, %v549_v28 }
 0x545   :  { %1716 = vmatpush3.bf16.msra.mxu1 %v579_v7 }
 0x546   :  { %1727 = vmatprep.subr.bf16.mxu1 %v1937_v15  ;;  %1865 = vpow2.f32 %v557_v8 }
 0x547   :  { %v546_v9 = vpop.xlane.xlu1 %545  ;;  %v700_v14 = vpop.permute.xlu0 %699 }
 0x548   :  { %v548_v10 = vmax.f32 %v546_v9, -1e+30  ;;  %v705_v17 = vsel %vm188_vm5, %v700_v14, 0 }
 0x54a   :  { %v556_v11 = vsub.f32 %v540_v60, %v548_v10  ;;  %v550_v30 = vsub.f32 -1e+30, %v548_v10 }
 0x54b   :  { %v753_v18 = vpop.permute.xlu1 %752  ;;  %v698_v21 = vpop.permute.xlu0 %697 }
 0x54c   :  { %v559_v12 = vmul.f32 1.442695, %v556_v11  ;;  %v758_v24 = vsel %vm188_vm5, %v753_v18, 0  ;;  %v553_v31 = vmul.f32 1.442695, %v550_v30 }
 0x54e   :  { %1867 = vpow2.f32 %v559_v12 }
 0x54f   :  { %v751_v22 = vpop.permute.xlu1 %750  ;;  %1869 = vpow2.f32 %v551_v29 }
 0x550   :  { %1871 = vpow2.f32 %v553_v31 }
 0x553   :  { %v2142_v13 = vpop.eup %1865  ;;  %v883_v25 = vpop.permute.xlu1 %882 }
 0x554   :  { %v571_v16 = vpack.c.bf16 %v2142_v13, %v2142_v13  ;;  %v888_v26 = vsel %vm328_vm6, %v883_v25, 0 }
 0x556   :  { %1718 = vmatmul.mubr.msk.bf16.vlgmr.msra.gmra.mxu1 %vm188_vm5, %v571_v16 }
 0x557   :  { %1728 = vmatpush3.bf16.xpose.msra.mxu1 %v705_v17  ;;  %1729 = vmatprep.mubr.msk.bf16.mxu1 %vm1938_vm1, %v1937_v15 }
 0x558   :  { %1739 = vmatprep.subr.bf16.mxu1 %v1937_v15 }
 0x55b   :  { %v2151_v19 = vpop.eup %1867 }
 0x55c   :  { %v572_v20 = vpack.c.bf16 %v2151_v19, %v2151_v19  ;;  %v1870_v32 = vpop.eup %1869 }
 0x55d   :  { %v2168_v33 = vmul.f32 0.0, %v1870_v32  ;;  %v1872_v38 = vpop.eup %1871 }
 0x55e   :  { %1724 = vmatmul.mubr.msk.bf16.vlgmr.msra.gmra.mxu0 %vm188_vm5, %v572_v20  ;;  %1730 = vmatmul.mubr.msk.bf16.vlgmr.msra.gmra.mxu1 %vm188_vm5, %v698_v21  ;;  %v2173_v43 = vmul.f32 0.0, %v1872_v38 }
 0x55f   :  { %1734 = vmatpush3.bf16.xpose.msra.mxu0 %v758_v24  ;;  %1735 = vmatprep.mubr.msk.bf16.mxu0 %vm1938_vm1, %v1937_v15 }
 0x560   :  { %1745 = vmatprep.subr.bf16.mxu0 %v1937_v15  ;;  %1741 = vmatprep.mubr.msk.bf16.mxu1 %vm1938_vm1, %v1937_v15 }
 0x566   :  { %1736 = vmatmul.mubr.msk.bf16.vlgmr.msra.gmra.mxu0 %vm188_vm5, %v751_v22 }
 0x567   :  { %1746 = vmatpush3.bf16.msra.mxu0 %v888_v26  ;;  %1747 = vmatprep.mubr.msk.bf16.mxu0 %vm1938_vm1, %v1937_v15 }
 0x568   :  { %1757 = vmatprep.subr.bf16.mxu0 %v1937_v15 }
 0x616   :  { %v615_v34 = vpop.f32.mrf.mxu1 }
 0x617   :  { %v2171_v35 = vadd.f32 %v615_v34, %v2168_v33 }
 0x618   :  { %v1719_v36 = vpop.f32.mrf.mxu1 }
 0x61a   :  { %v618_v39 = vpop.f32.mrf.mxu1 }
 0x61c   :  { %v1720_v41 = vpop.f32.mrf.mxu1 }
 0x61e   :  { %v663_v44 = vpop.f32.mrf.mxu0  ;;  %v741_v45 = vpop.f32.mrf.mxu1 }
 0x61f   :  { %v2176_v46 = vadd.f32 %v663_v44, %v2173_v43  ;;  %v800_v48 = vsel %vm2059_vm2, %v741_v45, -1e+30 }
 0x620   :  { %v1725_v49 = vpop.f32.mrf.mxu0  ;;  %v1731_v51 = vpop.f32.mrf.mxu1  ;;  %v802_v52 = vsel %vm188_vm5, %v800_v48, -inf }
 0x621   :  { %803 = vmax.xlane.f32.xlu0 %v802_v52 }
 0x622   :  { %v666_v53 = vpop.f32.mrf.mxu0  ;;  %v744_v54 = vpop.f32.mrf.mxu1 }
 0x624   :  { %v1726_v55 = vpop.f32.mrf.mxu0  ;;  %v1732_v56 = vpop.f32.mrf.mxu1 }
 0x626   :  { %v794_v57 = vpop.f32.mrf.mxu0 }
 0x627   :  { %v801_v58 = vsel %vm2059_vm2, %v794_v57, -1e+30 }
 0x628   :  { %v1737_v59 = vpop.f32.mrf.mxu0  ;;  %v805_v60 = vsel %vm188_vm5, %v801_v58, -inf }
 0x629   :  { %806 = vmax.xlane.f32.xlu1 %v805_v60 }
 0x62a   :  { %v797_v61 = vpop.f32.mrf.mxu0 }
 0x62c   :  { %v1738_v62 = vpop.f32.mrf.mxu0 }
 0x637   :  { %834 = vrot.lane.b32.xlu0 %v2135_v2, %s1947_s25 }
 0x63a   :  { %1013 = vrot.lane.b32.xlu1 %v2186_v63, %s1948_s26 }
 0x63b   :  { %960 = vrot.lane.b32.xlu0 %v2188_v0, %s1948_s26 }
 0x63e   :  { %1011 = vrot.lane.b32.xlu1 %v2186_v63, %s1949_s27 }
 0x63f   :  { %958 = vrot.lane.b32.xlu0 %v2188_v0, %s1949_s27 }
 0x6aa   :  { %v804_v1 = vpop.xlane.xlu0 %803 }
 0x6ab   :  { %v808_v3 = vmax.f32 %v804_v1, -1e+30 }
 0x6ad   :  { %v816_v4 = vsub.f32 %v800_v48, %v808_v3  ;;  %v810_v25 = vsub.f32 -1e+30, %v808_v3 }
 0x6ae   :  { %v835_v5 = vpop.permute.xlu0 %834 }
 0x6af   :  { %v818_v6 = vmul.f32 1.442695, %v816_v4  ;;  %v840_v2 = vsel %vm328_vm6, %v835_v5, 0  ;;  %v812_v26 = vmul.f32 1.442695, %v810_v25  ;;  %v563_v4 = vsel %vm188_vm5, %v2142_v13, 0.0 }
 0x6b0   :  { %1740 = vmatpush3.bf16.msra.mxu1 %v840_v2  ;;  %v316_v25 = vsel %vm188_vm5, %v2100_v27, 0.0 }
 0x6b1   :  { %1751 = vmatprep.subr.bf16.mxu1 %v1937_v15  ;;  %1873 = vpow2.f32 %v818_v6  ;;  %v566_v6 = vsel %vm188_vm5, %v2151_v19, 0.0 }
 0x6b2   :  { %v807_v8 = vpop.xlane.xlu1 %806  ;;  %v961_v12 = vpop.permute.xlu0 %960 }
 0x6b3   :  { %v809_v7 = vmax.f32 %v807_v8, -1e+30  ;;  %v966_v16 = vsel %vm188_vm5, %v961_v12, 0 }
 0x6b5   :  { %v817_v9 = vsub.f32 %v801_v58, %v809_v7  ;;  %v811_v28 = vsub.f32 -1e+30, %v809_v7 }
 0x6b6   :  { %v1014_v18 = vpop.permute.xlu1 %1013  ;;  %v959_v21 = vpop.permute.xlu0 %958 }
 0x6b7   :  { %v820_v10 = vmul.f32 1.442695, %v817_v9  ;;  %v1019_v22 = vsel %vm188_vm5, %v1014_v18, 0  ;;  %v814_v29 = vmul.f32 1.442695, %v811_v28 }
 0x6b9   :  { %1875 = vpow2.f32 %v820_v10 }
 0x6ba   :  { %v1012_v24 = vpop.permute.xlu1 %1011  ;;  %1877 = vpow2.f32 %v812_v26 }
 0x6bb   :  { %1879 = vpow2.f32 %v814_v29 }
 0x6be   :  { %v1874_v11 = vpop.eup %1873 }
 0x6bf   :  { %v832_v14 = vpack.c.bf16 %v1874_v11, %v1874_v11  ;;  %v824_v5 = vsel %vm188_vm5, %v1874_v11, 0.0 }
 0x6c1   :  { %1742 = vmatmul.mubr.msk.bf16.vlgmr.msra.gmra.mxu1 %vm188_vm5, %v832_v14 }
 0x6c2   :  { %1752 = vmatpush3.bf16.xpose.msra.mxu1 %v966_v16  ;;  %1753 = vmatprep.mubr.msk.bf16.mxu1 %vm1938_vm1, %v1937_v15 }
 0x6c3   :  { %1763 = vmatprep.subr.bf16.mxu1 %v1937_v15 }
 0x6c6   :  { %v1876_v17 = vpop.eup %1875 }
 0x6c7   :  { %v833_v20 = vpack.c.bf16 %v1876_v17, %v1876_v17  ;;  %v1878_v30 = vpop.eup %1877  ;;  %v827_v37 = vsel %vm188_vm5, %v1876_v17, 0.0 }
 0x6c8   :  { %v2212_v31 = vmul.f32 0.0, %v1878_v30  ;;  %v1880_v38 = vpop.eup %1879 }
 0x6c9   :  { %1748 = vmatmul.mubr.msk.bf16.vlgmr.msra.gmra.mxu0 %vm188_vm5, %v833_v20  ;;  %1754 = vmatmul.mubr.msk.bf16.vlgmr.msra.gmra.mxu1 %vm188_vm5, %v959_v21  ;;  %v2217_v44 = vmul.f32 0.0, %v1880_v38  ;;  %v313_v20 = vsel %vm188_vm5, %v2091_v23, 0.0 }
 0x6ca   :  { %1758 = vmatpush3.bf16.xpose.msra.mxu0 %v1019_v22  ;;  %1759 = vmatprep.mubr.msk.bf16.mxu0 %vm1938_vm1, %v1937_v15 }
 0x6cb   :  { %1769 = vmatprep.subr.bf16.mxu0 %v1937_v15  ;;  %1765 = vmatprep.mubr.msk.bf16.mxu1 %vm1938_vm1, %v1937_v15 }
 0x6d1   :  { %1760 = vmatmul.mubr.msk.bf16.vlgmr.msra.gmra.mxu0 %vm188_vm5, %v1012_v24 }
 0x6d2   :  { %1771 = vmatprep.mubr.msk.bf16.mxu0 %vm1938_vm1, %v1937_v15 }
 0x781   :  { %v876_v32 = vpop.f32.mrf.mxu1 }
 0x782   :  { %v2215_v34 = vadd.f32 %v876_v32, %v2212_v31 }
 0x783   :  { %v1743_v36 = vpop.f32.mrf.mxu1 }
 0x785   :  { %v879_v39 = vpop.f32.mrf.mxu1 }
 0x787   :  { %v1744_v41 = vpop.f32.mrf.mxu1 }
 0x789   :  { %v924_v45 = vpop.f32.mrf.mxu0  ;;  %v1002_v48 = vpop.f32.mrf.mxu1 }
 0x78a   :  { %v2220_v49 = vadd.f32 %v924_v45, %v2217_v44  ;;  %v1061_v51 = vsel %vm2059_vm2, %v1002_v48, -1e+30 }
 0x78b   :  { %v1749_v52 = vpop.f32.mrf.mxu0  ;;  %v1755_v53 = vpop.f32.mrf.mxu1  ;;  %v1063_v54 = vsel %vm188_vm5, %v1061_v51, -inf }
 0x78c   :  { %1064 = vmax.xlane.f32.xlu0 %v1063_v54 }
 0x78d   :  { %v927_v55 = vpop.f32.mrf.mxu0  ;;  %v1005_v56 = vpop.f32.mrf.mxu1 }
 0x78f   :  { %v1750_v57 = vpop.f32.mrf.mxu0  ;;  %v1756_v58 = vpop.f32.mrf.mxu1 }
 0x791   :  { %v1055_v59 = vpop.f32.mrf.mxu0 }
 0x792   :  { %v1062_v60 = vsel %vm2059_vm2, %v1055_v59, -1e+30 }
 0x793   :  { %v1761_v61 = vpop.f32.mrf.mxu0  ;;  %v1066_v62 = vsel %vm188_vm5, %v1062_v60, -inf }
 0x794   :  { %1067 = vmax.xlane.f32.xlu1 %v1066_v62 }
 0x795   :  { %v1058_v1 = vpop.f32.mrf.mxu0 }
 0x797   :  { %v1762_v3 = vpop.f32.mrf.mxu0 }
 0x7a2   :  { %1095 = vrot.lane.b32.xlu0 %v2188_v0, %s1950_s28 }
 0x7a5   :  { %1143 = vrot.lane.b32.xlu1 %v2186_v63, %s1950_s28 }
 0x7c1   :  { %564 = vadd.xlane.f32.xlu0 %v563_v4 }
 0x7c5   :  { %825 = vadd.xlane.f32.xlu0 %v824_v5 }
 0x7c9   :  { %828 = vadd.xlane.f32.xlu0 %v827_v37  ;;  %567 = vadd.xlane.f32.xlu1 %v566_v6 }
 0x815   :  { %v2236_v2 = vpop.xlane.xlu0 %1064 }
 0x816   :  { %v1069_v0 = vmax.f32 %v2236_v2, -1e+30 }
 0x818   :  { %v1077_v63 = vsub.f32 %v1061_v51, %v1069_v0 }
 0x819   :  { %v1096_v8 = vpop.permute.xlu0 %1095 }
 0x81a   :  { %v1079_v13 = vmul.f32 1.442695, %v1077_v63  ;;  %v1101_v7 = vsel %vm328_vm6, %v1096_v8, 0 }
 0x81b   :  { %1764 = vmatpush3.bf16.msra.mxu1 %v1101_v7 }
 0x81c   :  { %1775 = vmatprep.subr.bf16.mxu1 %v1937_v15  ;;  %1881 = vpow2.f32 %v1079_v13 }
 0x81d   :  { %v2243_v9 = vpop.xlane.xlu1 %1067 }
 0x81e   :  { %v1070_v19 = vmax.f32 %v2243_v9, -1e+30 }
 0x820   :  { %v1078_v10 = vsub.f32 %v1062_v60, %v1070_v19  ;;  %v1072_v60 = vsub.f32 -1e+30, %v1070_v19  ;;  %v1840_v19 = vld [vmem:[%s2376_s5 + $0x8] sm:$0xff]  }
 0x821   :  { %v1144_v11 = vpop.permute.xlu1 %1143 }
 0x822   :  { %v1081_v12 = vmul.f32 1.442695, %v1078_v10  ;;  %v1149_v14 = vsel %vm328_vm6, %v1144_v11, 0 }
 0x823   :  { %1770 = vmatpush3.bf16.msra.mxu0 %v1149_v14 }
 0x824   :  { %1783 = vmatprep.subr.bf16.mxu0 %v1937_v15  ;;  %1883 = vpow2.f32 %v1081_v12  ;;  %v1841_v12 = vld [vmem:[%s2376_s5] sm:$0xff]  }
 0x829   :  { %v1882_v16 = vpop.eup %1881 }
 0x82a   :  { %v1085_v17 = vsel %vm188_vm5, %v1882_v16, 0.0  ;;  %v1093_v18 = vpack.c.bf16 %v1882_v16, %v1882_v16 }
 0x82b   :  { %1086 = vadd.xlane.f32.xlu0 %v1085_v17 }
 0x82c   :  { %1766 = vmatmul.mubr.msk.bf16.vlgmr.msra.gmra.mxu1 %vm188_vm5, %v1093_v18 }
 0x82d   :  { %1779 = vmatprep.mubr.msk.bf16.mxu1 %vm1938_vm1, %v1937_v15  ;;  %1776 = vmatpush3.bf16.msra.mxu1 %v1840_v19  ;;  %v1849_v19 = vld [vmem:[%s2382_s11 + $0x18] sm:$0xff]  }
 0x82e   :  { %1777 = vmatprep.subr.bf16.mxu1 %v1937_v15 }
 0x82f   :  { %314 = vadd.xlane.f32.xlu0 %v313_v20 }
 0x831   :  { %v1884_v21 = vpop.eup %1883  ;;  %1778 = vmatpush3.bf16.msra.mxu1 %v1841_v12  ;;  %v1852_v12 = vld [vmem:[%s2382_s11] sm:$0xff]  }
 0x832   :  { %v1088_v22 = vsel %vm188_vm5, %v1884_v21, 0.0  ;;  %v1094_v24 = vpack.c.bf16 %v1884_v21, %v1884_v21  ;;  %1791 = vmatprep.subr.bf16.mxu1 %v1937_v15 }
 0x833   :  { %1089 = vadd.xlane.f32.xlu1 %v1088_v22 }
 0x834   :  { %1772 = vmatmul.mubr.msk.bf16.vlgmr.msra.gmra.mxu0 %vm188_vm5, %v1094_v24 }
 0x835   :  { %1787 = vmatprep.mubr.msk.bf16.mxu0 %vm1938_vm1, %v1937_v15 }
 0x837   :  { %317 = vadd.xlane.f32.xlu1 %v316_v25 }
 0x84a   :  { %v565_v26 = vpop.xlane.xlu0 %564 }
 0x84b   :  { %v569_v28 = vadd.f32 %v565_v26, %v2168_v33 }
 0x84d   :  { %1885 = vrcp.f32 %v569_v28 }
 0x84e   :  { %v826_v23 = vpop.xlane.xlu0 %825 }
 0x84f   :  { %v830_v29 = vadd.f32 %v826_v23, %v2212_v31 }
 0x851   :  { %1887 = vrcp.f32 %v830_v29 }
 0x852   :  { %v829_v30 = vpop.xlane.xlu0 %828  ;;  %v568_v32 = vpop.xlane.xlu1 %567 }
 0x853   :  { %v831_v36 = vadd.f32 %v829_v30, %v2217_v44  ;;  %v570_v38 = vadd.f32 %v568_v32, %v2173_v43  ;;  %v1593_v30 = vld [vmem:[%s2377_s6] ss:$0 sm:$0xff] }
 0x855   :  { %1889 = vrcp.f32 %v831_v36 }
 0x856   :  { %1891 = vrcp.f32 %v570_v38 }
 0x85a   :  { %v1886_v39 = vpop.eup %1885 }
 0x85b   :  { %v673_v27 = vmul.f32 %v1886_v39, %v2171_v35  ;;  %v1913_v39 = vld [vmem:[%s2371_s0] sm:$0xff] }
 0x85d   :  { %v1615_v41 = vpack.c.bf16 %v673_v27, %v673_v27 }
 0x85e   :  { %v1888_v45 = vpop.eup %1887 }
 0x85f   :  { %683 = vrot.lane.b32.xlu0 %v1615_v41, %s1951_s29  ;;  %v934_v33 = vmul.f32 %v1888_v45, %v2215_v34 }
 0x861   :  { %v1617_v43 = vpack.c.bf16 %v934_v33, %v934_v33 }
 0x862   :  { %v1890_v31 = vpop.eup %1889 }
 0x863   :  { %v1892_v48 = vpop.eup %1891  ;;  %v935_v51 = vmul.f32 %v1890_v31, %v2220_v49 }
 0x864   :  { %v674_v44 = vmul.f32 %v1892_v48, %v2176_v46  ;;  %v1071_v46 = vsub.f32 -1e+30, %v1069_v0  ;;  %v1914_v48 = vld [vmem:[%s2371_s0 + $0x8] sm:$0xff]  ;;  %s1954_s0 = smov [#allocation4]  }
 0x865   :  { %v1618_v35 = vpack.c.bf16 %v935_v51, %v935_v51  ;;  %s1544_s6 = sshll.u32 %s1954_s0, 4  ;;  %s1545_s6 = int_to_ptr.vmem [resolvable:$true] %s1544_s6 }
 0x866   :  { %v1616_v52 = vpack.c.bf16 %v674_v44, %v674_v44  ;;  %v1073_v49 = vmul.f32 1.442695, %v1071_v46  ;;  %s1915_s20 = scalar_lea.vmem %s1545_s6, 256  ;;  %p1920_p1 = scmp.lt.s32.totalorder %s1545_s6, %s1545_s6 }
 0x867   :  { %p1916_p0 = scmp.ne.s32.totalorder %s1545_s6, %s1915_s20  ;;  %p1921_p2 = scmp.lt.s32.totalorder %s1915_s20, %s1915_s20 }
 0x868   :  { %685 = vrot.lane.b32.xlu1 %v1616_v52, %s1951_s29 }
 0x869   :  { %p1922_p3 = por %p1921_p2, %p1920_p1 }
 0x86b   :  { %p1923_p4 = pnand %p1922_p3, %p1916_p0 }
 0x86c   :  { %944 = vrot.lane.b32.xlu1 %v1617_v43, %s1952_s30 }
 0x870   :  { %946 = vrot.lane.b32.xlu1 %v1618_v35, %s1952_s30 }
 0x8b4   :  { %v1087_v53 = vpop.xlane.xlu0 %1086 }
 0x8b8   :  { %v315_v54 = vpop.xlane.xlu0 %314 }
 0x8b9   :  { %v319_v55 = vadd.f32 %v315_v54, %v2117_v40  ;;  %v1075_v40 = vmul.f32 1.442695, %v1072_v60 }
 0x8bb   :  { %1893 = vrcp.f32 %v319_v55 }
 0x8bc   :  { %v1090_v34 = vpop.xlane.xlu1 %1089 }
 0x8c0   :  { %v318_v56 = vpop.xlane.xlu1 %317 }
 0x8c1   :  { %v320_v57 = vadd.f32 %v318_v56, %v2122_v47 }
 0x8c3   :  { %1895 = vrcp.f32 %v320_v57 }
 0x8c4   :  { %1897 = vpow2.f32 %v1073_v49  ;;  %v1843_v49 = vld [vmem:[%s2380_s9 + $0x8] sm:$0xff]  }
 0x8c5   :  { %1899 = vpow2.f32 %v1075_v40  ;;  %1784 = vmatpush3.bf16.msra.mxu0 %v1843_v49 }
 0x8c6   :  { %1785 = vmatprep.subr.bf16.mxu0 %v1937_v15 }
 0x8c8   :  { %v1894_v58 = vpop.eup %1893 }
 0x8c9   :  { %v424_v59 = vmul.f32 %v1894_v58, %v2120_v42  ;;  %v1844_v58 = vld [vmem:[%s2380_s9] sm:$0xff]  }
 0x8ca   :  { %1786 = vmatpush3.bf16.msra.mxu0 %v1844_v58 }
 0x8cb   :  { %v426_v61 = vpack.c.bf16 %v424_v59, %v424_v59 }
 0x8cd   :  { %429 = vst.msk [vmem:[#allocation3] sm:$0xf] %vm428_vm7, %v426_v61 }
 0x8d0   :  { %v1896_v62 = vpop.eup %1895 }
 0x8d1   :  { %v684_v1 = vpop.permute.xlu0 %683  ;;  %v425_v47 = vmul.f32 %v1896_v62, %v2125_v50  ;;  %v1898_v4 = vpop.eup %1897 }
 0x8d2   :  { %690 = vst.msk [vmem:[#allocation3] sm:$0xf] %vm689_vm8, %v684_v1  ;;  %v1083_v42 = vmul.f32 0.0, %v1898_v4  ;;  %v1900_v2 = vpop.eup %1899  ;;  %v1598_v4 = vld [vmem:[%s2378_s7] ss:$0 sm:$0xff] }
 0x8d3   :  { %v427_v3 = vpack.c.bf16 %v425_v47, %v425_v47  ;;  %v1084_v63 = vmul.f32 0.0, %v1900_v2 }
 0x8d4   :  { %v1091_v37 = vadd.f32 %v1087_v53, %v1083_v42 }
 0x8d5   :  { %430 = vst.msk [vmem:[#allocation3 + $0x4] sm:$0xf] %vm428_vm7, %v427_v3  ;;  %v1092_v8 = vadd.f32 %v1090_v34, %v1084_v63 }
 0x8d6   :  { %1901 = vrcp.f32 %v1091_v37 }
 0x8d7   :  { %1903 = vrcp.f32 %v1092_v8 }
 0x8da   :  { %v686_v5 = vpop.permute.xlu1 %685 }
 0x8db   :  { %691 = vst.msk [vmem:[#allocation3 + $0x4] sm:$0xf] %vm689_vm8, %v686_v5 }
 0x8de   :  { %v945_v6 = vpop.permute.xlu1 %944 }
 0x8df   :  { %951 = vst.msk [vmem:[#allocation3] sm:$0xf] %vm950_vm9, %v945_v6  ;;  %v1599_v6 = vld [vmem:[%s2379_s8] ss:$0 sm:$0xff] }
 0x8e2   :  { %v947_v0 = vpop.permute.xlu1 %946 }
 0x8e3   :  { %952 = vst.msk [vmem:[#allocation3 + $0x4] sm:$0xf] %vm950_vm9, %v947_v0  ;;  %v1902_v7 = vpop.eup %1901 }
 0x8e4   :  { %v1904_v20 = vpop.eup %1903 }
 0x8ec   :  { %v1137_v13 = vpop.f32.mrf.mxu1 }
 0x8ed   :  { %v1191_v50 = vadd.f32 %v1137_v13, %v1083_v42  ;;  %v1845_v13 = vld [vmem:[%s2382_s11 + $0x38] sm:$0xff]  }
 0x8ee   :  { %v1767_v9 = vpop.f32.mrf.mxu1 }
 0x8ef   :  { %v1195_v10 = vmul.f32 %v1902_v7, %v1191_v50  ;;  %v1846_v50 = vld [vmem:[%s2382_s11 + $0x30] sm:$0xff]   ;;  %v1847_v7 = vld [vmem:[%s2382_s11 + $0x28] sm:$0xff]   ;;  %v1848_v9 = vld [vmem:[%s2382_s11 + $0x20] sm:$0xff]  }
 0x8f0   :  { %v1140_v11 = vpop.f32.mrf.mxu1 }
 0x8f1   :  { %v1619_v14 = vpack.c.bf16 %v1195_v10, %v1195_v10  ;;  %v1850_v10 = vld [vmem:[%s2382_s11 + $0x10] sm:$0xff]   ;;  %v1851_v11 = vld [vmem:[%s2382_s11 + $0x8] sm:$0xff]  }
 0x8f2   :  { %v1768_v16 = vpop.f32.mrf.mxu1 }
 0x8f3   :  { %1205 = vrot.lane.b32.xlu0 %v1619_v14, %s1953_s17  ;;  %v1601_v14 = vld [vmem:[%s2381_s10] ss:$0 sm:$0xff] }
 0x8f4   :  { %v1185_v17 = vpop.f32.mrf.mxu0 }
 0x8f5   :  { %v1192_v18 = vadd.f32 %v1185_v17, %v1084_v63 }
 0x8f6   :  { %v1773_v21 = vpop.f32.mrf.mxu0 }
 0x8f7   :  { %v1196_v22 = vmul.f32 %v1904_v20, %v1192_v18 }
 0x8f8   :  { %v1188_v24 = vpop.f32.mrf.mxu0 }
 0x8f9   :  { %v1620_v25 = vpack.c.bf16 %v1196_v22, %v1196_v22 }
 0x8fa   :  { %v1774_v26 = vpop.f32.mrf.mxu0 }
 0x8fb   :  { %1207 = vrot.lane.b32.xlu1 %v1620_v25, %s1953_s17 }
 0x965   :  { %v1206_v28 = vpop.permute.xlu0 %1205 }
 0x966   :  { %1212 = vst.msk [vmem:[#allocation3] sm:$0xf] %vm1211_vm10, %v1206_v28 }
 0x96d   :  { %v1208_v23 = vpop.permute.xlu1 %1207 }
 0x96e   :  { %1213 = vst.msk [vmem:[#allocation3 + $0x4] sm:$0xf] %vm1211_vm10, %v1208_v23 }
 0x975   :  { %v1842_v29 = vld [vmem:[#allocation3] sm:$0xff]  }
 0x976   :  { %1780 = vmatmul.mubr.msk.bf16.vlgmr.msra.gmra.mxu1 %vm50_vm0, %v1842_v29 }
 0x977   :  { %1807 = vmatprep.mubr.msk.bf16.mxu1 %vm1938_vm1, %v1937_v15  ;;  %1792 = vmatpush3.bf16.msra.mxu1 %v1845_v13 }
 0x978   :  { %1793 = vmatprep.subr.bf16.mxu1 %v1937_v15 }
 0x97b   :  { %1794 = vmatpush3.bf16.msra.mxu1 %v1846_v50 }
 0x97c   :  { %1795 = vmatprep.subr.bf16.mxu1 %v1937_v15 }
 0x97f   :  { %1796 = vmatpush3.bf16.msra.mxu1 %v1847_v7 }
 0x980   :  { %1797 = vmatprep.subr.bf16.mxu1 %v1937_v15 }
 0x983   :  { %1798 = vmatpush3.bf16.msra.mxu1 %v1848_v9 }
 0x984   :  { %1799 = vmatprep.subr.bf16.mxu1 %v1937_v15 }
 0x987   :  { %1800 = vmatpush3.bf16.msra.mxu1 %v1849_v19 }
 0x988   :  { %1801 = vmatprep.subr.bf16.mxu1 %v1937_v15 }
 0x98b   :  { %1802 = vmatpush3.bf16.msra.mxu1 %v1850_v10 }
 0x98c   :  { %1803 = vmatprep.subr.bf16.mxu1 %v1937_v15 }
 0x98f   :  { %1804 = vmatpush3.bf16.msra.mxu1 %v1851_v11 }
 0x990   :  { %1805 = vmatprep.subr.bf16.mxu1 %v1937_v15 }
 0x993   :  { %1806 = vmatpush3.bf16.msra.mxu1 %v1852_v12 }
 0xa36   :  { %v1281_v32 = vpop.f32.mrf.mxu1 }
 0xa37   :  { %v1282_v36 = vadd.f32 %v1593_v30, %v1281_v32 }
 0xa38   :  { %v1781_v38 = vpop.f32.mrf.mxu1 }
 0xa39   :  { %v2297_v27 = vadd.f32 %v1913_v39, %v1282_v36 }
 0xa3a   :  { %v1284_v41 = vpop.f32.mrf.mxu1 }
 0xa3b   :  { %v1285_v45 = vadd.f32 %v1593_v30, %v1284_v41  ;;  %v1292_v33 = vsel %vm50_vm0, %v2297_v27, 0.0 }
 0xa3c   :  { %1293 = vadd.xlane.f32.xlu0 %v1292_v33  ;;  %v1782_v31 = vpop.f32.mrf.mxu1 }
 0xa3d   :  { %v2304_v51 = vadd.f32 %v1914_v48, %v1285_v45 }
 0xa3f   :  { %v1295_v44 = vsel %vm50_vm0, %v2304_v51, 0.0 }
 0xa40   :  { %1296 = vadd.xlane.f32.xlu1 %v1295_v44 }
 0xac5   :  { %v1294_v52 = vpop.xlane.xlu0 %1293 }
 0xac6   :  { %v1298_v43 = vmul.f32 0.03125, %v1294_v52 }
 0xac8   :  { %v1300_v35 = vsub.f32 %v2297_v27, %v1298_v43  ;;  %v1600_v43 = vld [vmem:[%s2383_s12] ss:$0 sm:$0xff] }
 0xac9   :  { %v1297_v53 = vpop.xlane.xlu1 %1296 }
 0xaca   :  { %v1299_v54 = vmul.f32 0.03125, %v1297_v53  ;;  %v1302_v55 = vmul.f32 %v1300_v35, %v1300_v35 }
 0xacc   :  { %v1301_v34 = vsub.f32 %v2304_v51, %v1299_v54  ;;  %v1304_v56 = vsel %vm50_vm0, %v1302_v55, 0.0 }
 0xacd   :  { %1305 = vadd.xlane.f32.xlu0 %v1304_v56 }
 0xace   :  { %v1303_v57 = vmul.f32 %v1301_v34, %v1301_v34 }
 0xad0   :  { %v1307_v46 = vsel %vm50_vm0, %v1303_v57, 0.0 }
 0xad1   :  { %1308 = vadd.xlane.f32.xlu0 %v1307_v46 }
 0xb56   :  { %v1306_v59 = vpop.xlane.xlu0 %1305 }
 0xb57   :  { %v1310_v60 = vmul.f32 0.03125, %v1306_v59 }
 0xb59   :  { %v1312_v61 = vadd.f32 1e-05, %v1310_v60 }
 0xb5a   :  { %v1309_v40 = vpop.xlane.xlu0 %1308 }
 0xb5b   :  { %1905 = vrsqrt.f32 %v1312_v61  ;;  %v1311_v62 = vmul.f32 0.03125, %v1309_v40 }
 0xb5d   :  { %v1313_v1 = vadd.f32 1e-05, %v1311_v62 }
 0xb5f   :  { %1907 = vrsqrt.f32 %v1313_v1 }
 0xb68   :  { %v1906_v47 = vpop.eup %1905 }
 0xb69   :  { %v1316_v3 = vmul.f32 %v1906_v47, %v1300_v35 }
 0xb6b   :  { %v1324_v37 = vmul.f32 %v1598_v4, %v1316_v3 }
 0xb6c   :  { %v1908_v5 = vpop.eup %1907 }
 0xb6d   :  { %v1317_v42 = vmul.f32 %v1908_v5, %v1301_v34  ;;  %v1332_v0 = vadd.f32 %v1599_v6, %v1324_v37 }
 0xb6f   :  { %v1325_v2 = vmul.f32 %v1598_v4, %v1317_v42 }
 0xb71   :  { %v1333_v63 = vadd.f32 %v1599_v6, %v1325_v2 }
 0xb73   :  { %v1334_v8 = vpack.c.bf16 %v1333_v63, %v1332_v0 }
 0xb75   :  { %1788 = vmatmul.mubr.msk.bf16.vlgmr.msra.gmra.mxu0 %vm50_vm0, %v1334_v8 }
 0xc35   :  { %v1402_v16 = vpop.f32.mrf.mxu0 }
 0xc36   :  { %v1403_v17 = vadd.f32 %v1601_v14, %v1402_v16 }
 0xc37   :  { %v1789_v18 = vpop.f32.mrf.mxu0 }
 0xc38   :  { %v1411_v20 = vmul.f32 0.044715, %v1403_v17  ;;  %v1409_v45 = vmul.f32 0.5, %v1403_v17 }
 0xc39   :  { %v1405_v21 = vpop.f32.mrf.mxu0 }
 0xc3a   :  { %v1413_v22 = vmul.f32 %v1411_v20, %v1403_v17  ;;  %v1406_v24 = vadd.f32 %v1601_v14, %v1405_v21 }
 0xc3b   :  { %v1790_v25 = vpop.f32.mrf.mxu0 }
 0xc3c   :  { %v1415_v26 = vmul.f32 %v1413_v22, %v1403_v17  ;;  %v1412_v28 = vmul.f32 0.044715, %v1406_v24  ;;  %v1410_v33 = vmul.f32 0.5, %v1406_v24 }
 0xc3e   :  { %v1417_v23 = vadd.f32 %v1415_v26, %v1403_v17  ;;  %v1414_v29 = vmul.f32 %v1412_v28, %v1406_v24 }
 0xc40   :  { %v1419_v30 = vmul.f32 0.7978846, %v1417_v23  ;;  %v1416_v32 = vmul.f32 %v1414_v29, %v1406_v24 }
 0xc42   :  { %1909 = vtanh.f32 %v1419_v30  ;;  %v1418_v15 = vadd.f32 %v1416_v32, %v1406_v24 }
 0xc44   :  { %v1420_v36 = vmul.f32 0.7978846, %v1418_v15 }
 0xc46   :  { %1911 = vtanh.f32 %v1420_v36 }
 0xc4f   :  { %v1910_v38 = vpop.eup %1909 }
 0xc50   :  { %v1423_v39 = vadd.f32 1.0, %v1910_v38 }
 0xc52   :  { %v1425_v48 = vmul.f32 %v1423_v39, %v1409_v45 }
 0xc53   :  { %v1912_v41 = vpop.eup %1911 }
 0xc54   :  { %v1424_v31 = vadd.f32 1.0, %v1912_v41 }
 0xc56   :  { %v1426_v44 = vmul.f32 %v1424_v31, %v1410_v33 }
 0xc58   :  { %v1427_v52 = vpack.c.bf16 %v1426_v44, %v1425_v48 }
 0xc5a   :  { %1808 = vmatmul.mubr.bf16.vlgmr.msra.gmra.mxu1 %v1427_v52 }
 0xd1a   :  { %v1526_v35 = vpop.f32.mrf.mxu1 }
 0xd1b   :  { %v1533_v53 = vadd.f32 %v1600_v43, %v1526_v35 }
 0xd1c   :  { %v1809_v54 = vpop.f32.mrf.mxu1 }
 0xd1d   :  { %v1535_v55 = vadd.f32 %v1533_v53, %v2297_v27 }
 0xd1e   :  { %v1529_v34 = vpop.f32.mrf.mxu1 }
 0xd1f   :  { %1537 = vst.msk [vmem:[#allocation4] sm:$0xff] %vm50_vm0, %v1535_v55  ;;  %v1534_v56 = vadd.f32 %v1600_v43, %v1529_v34 }
 0xd20   :  { %v1810_v57 = vpop.f32.mrf.mxu1 }
 0xd21   :  { %v1536_v46 = vadd.f32 %v1534_v56, %v2304_v51 }
 0xd23   :  { %1538 = vst.msk [vmem:[#allocation4 + $0x8] sm:$0xff] %vm50_vm0, %v1536_v46 }
 0xd24   :  { %1926 = shalt.err (!%p1923_p4)
}
 0xd25   :  { %s1955_s12 = smov 128  }
 0xd26   :  { %1550 = dma.vmem_to_hbm [thread:$0]  %s1545_s6, 256, %s2384_s13, [#allocation5], %s1955_s12, %s1955_s12, %s1951_s29  }
 0xd27   :  { %1935 = dma.done.wait [#allocation5], 256  }
 0xd28   :  { %1936 = vsyncadd [#allocation5], 4294967040 }
 0xd29   :  { %1554 = vsyncpa [#allocation5], 1 }

</bundles_post_ra>
